<compile_context>
chip_gen: v5e
topology: v5e:2x2
jax: 0.10.0
libtpu: 0.0.40
codegen_flags: <defaults>
</compile_context>

<pallas_src>
import jax
import jax.numpy as jnp
from jax.experimental import pallas as pl
from jax.experimental.pallas import tpu as pltpu

# Small, TPU-friendly sizes (module defaults are E=128, H=256; we keep E and use
# lane-width-128 H/V for a compact synthetic test).
B = 2      # batch
T = 8      # sequence length
V = 128    # vocab_size
E = 128    # embedding_size
H = 128    # hidden_size
TB = T * B


def bigram_fwd_kernel(tokens_ref,                 # SMEM (B, T) int32 (scalar prefetch)
                      emb_ref,                    # VMEM (V, E)  f32
                      w_ih_ref, w_hh_ref,         # VMEM (E, 3H), (H, 3H)  bf16
                      b_gates_ref, b_hn_ref,      # VMEM (1, 3H), (1, H)   f32
                      w_fc_ref, b_fc_ref,         # VMEM (H, V) bf16, (1, V) f32
                      out_ref,                    # VMEM (TB, V) f32  (t-major rows)
                      x_sc,                       # VMEM (TB, E) f32 scratch
                      gi_sc,                      # VMEM (TB, 3H) f32 scratch
                      hs_sc):                     # VMEM (TB, H) f32 scratch
    # 1) Gather all embedding rows up front (no dependence on the recurrence).
    for t in range(T):
        for b in range(B):
            tok = tokens_ref[b, t]                          # scalar from SMEM
            x_sc[pl.ds(t * B + b, 1), :] = emb_ref[tok].reshape(1, E)

    # 2) Batched input-gate matmul over all (t, b): one (TB, E) @ (E, 3H) MXU call.
    #    b_gates already contains b_ih + [b_hh_r | b_hh_z | 0].
    gi_sc[...] = (
        jnp.dot(x_sc[...].astype(jnp.bfloat16), w_ih_ref[...],
                preferred_element_type=jnp.float32)
        + b_gates_ref[...])

    # 3) GRU recurrence over T with the batch fused: (B, H) @ (H, 3H) per step.
    b_hn = b_hn_ref[...]                                    # (1, H)
    h = jnp.zeros((B, H), jnp.float32)                      # h_0 = 0 (PyTorch default)
    for t in range(T):                                      # static unroll, T small
        gi = gi_sc[pl.ds(t * B, B), :]                      # (B, 3H) static slice
        gh = jnp.dot(h.astype(jnp.bfloat16), w_hh_ref[...],
                     preferred_element_type=jnp.float32)    # (B, 3H), no bias yet
        r = jax.nn.sigmoid(gi[:, 0:H] + gh[:, 0:H])
        z = jax.nn.sigmoid(gi[:, H:2 * H] + gh[:, H:2 * H])
        n = jnp.tanh(gi[:, 2 * H:3 * H] + r * (gh[:, 2 * H:3 * H] + b_hn))
        h = (1.0 - z) * n + z * h
        hs_sc[pl.ds(t * B, B), :] = h                       # cheap vst; no live hs list

    # TODO(synk): nn.Dropout(p=0.5) is identity in eval mode; training-mode RNG mask
    # (pltpu.prng_seed / prng_random_bits) not emitted here.

    # 4) Output projection as one (TB, H) @ (H, V) matmul; lane-dense (TB, 128) store.
    out_ref[...] = (
        jnp.dot(hs_sc[...].astype(jnp.bfloat16), w_fc_ref[...],
                preferred_element_type=jnp.float32)
        + b_fc_ref[...])


@jax.jit
def bigram_forward(tokens, emb, w_ih_t, w_hh_t, b_ih, b_hh, w_fc_t, b_fc):
    # Fold b_hh[:, :2H] (r/z gates) into the input-gate bias. b_hh[:, 2H:3H] must stay
    # inside gh so it is multiplied by r (PyTorch GRU n-gate semantics).
    b_gates = b_ih + jnp.concatenate(
        [b_hh[:, :2 * H], jnp.zeros((1, H), jnp.float32)], axis=1)
    b_hn = b_hh[:, 2 * H:3 * H]

    # bf16 weights: halves HBM->VMEM bytes for the matmul weights; f32 accumulation.
    w_ih_b = w_ih_t.astype(jnp.bfloat16)
    w_hh_b = w_hh_t.astype(jnp.bfloat16)
    w_fc_b = w_fc_t.astype(jnp.bfloat16)

    full = lambda i, tok: (0, 0)
    grid_spec = pltpu.PrefetchScalarGridSpec(
        num_scalar_prefetch=1,                  # tokens -> SMEM
        grid=(1,),                              # batch fused into one invocation
        in_specs=[
            pl.BlockSpec((V, E), full),
            pl.BlockSpec((E, 3 * H), full),
            pl.BlockSpec((H, 3 * H), full),
            pl.BlockSpec((1, 3 * H), full),
            pl.BlockSpec((1, H), full),
            pl.BlockSpec((H, V), full),
            pl.BlockSpec((1, V), full),
        ],
        out_specs=pl.BlockSpec((TB, V), full),
        scratch_shapes=[
            pltpu.VMEM((TB, E), jnp.float32),       # gathered embeddings
            pltpu.VMEM((TB, 3 * H), jnp.float32),   # precomputed input gates
            pltpu.VMEM((TB, H), jnp.float32),       # per-step hidden states
        ],
    )
    out = pl.pallas_call(
        bigram_fwd_kernel,
        out_shape=jax.ShapeDtypeStruct((TB, V), jnp.float32),
        grid_spec=grid_spec,
        compiler_params=pltpu.CompilerParams(dimension_semantics=("arbitrary",)),
    )(tokens, emb, w_ih_b, w_hh_b, b_gates, b_hn, w_fc_b, b_fc)
    # Kernel rows are t-major (row = t*B + b)  ->  (T, B, V)  ->  (B, T, V).
    return jnp.transpose(out.reshape(T, B, V), (1, 0, 2))


def reference_forward(tokens, emb, w_ih_t, w_hh_t, b_ih, b_hh, w_fc_t, b_fc):
    """Plain-JAX reference for Embedding + GRU(batch_first) + Linear, mirroring the
    kernel's bf16-matmul / f32-accumulate / f32-gate-math policy."""
    wih = w_ih_t.astype(jnp.bfloat16)
    whh = w_hh_t.astype(jnp.bfloat16)
    wfc = w_fc_t.astype(jnp.bfloat16)
    x_seq = emb[tokens].astype(jnp.bfloat16)                 # (B, T, E)

    def step(h, x_t):                                        # h (B,H) f32, x_t (B,E)
        gi = jnp.dot(x_t, wih, preferred_element_type=jnp.float32) + b_ih
        gh = jnp.dot(h.astype(jnp.bfloat16), whh,
                     preferred_element_type=jnp.float32) + b_hh
        r = jax.nn.sigmoid(gi[:, 0:H] + gh[:, 0:H])
        z = jax.nn.sigmoid(gi[:, H:2 * H] + gh[:, H:2 * H])
        n = jnp.tanh(gi[:, 2 * H:3 * H] + r * gh[:, 2 * H:3 * H])
        h_new = (1.0 - z) * n + z * h
        return h_new, h_new

    h0 = jnp.zeros((B, H), jnp.float32)
    _, hs = jax.lax.scan(step, h0, jnp.swapaxes(x_seq, 0, 1))  # (T, B, H)
    gru_out = jnp.swapaxes(hs, 0, 1)                           # (B, T, H)
    return jnp.dot(gru_out.astype(jnp.bfloat16), wfc,
                   preferred_element_type=jnp.float32) + b_fc  # (B, T, V)


if __name__ == "__main__":
    key = jax.random.PRNGKey(0)
    ks = jax.random.split(key, 8)
    scale = 0.1
    emb    = scale * jax.random.normal(ks[0], (V, E), jnp.float32)
    w_ih_t = scale * jax.random.normal(ks[1], (E, 3 * H), jnp.float32)   # [r|z|n]
    w_hh_t = scale * jax.random.normal(ks[2], (H, 3 * H), jnp.float32)
    b_ih   = scale * jax.random.normal(ks[3], (1, 3 * H), jnp.float32)
    b_hh   = scale * jax.random.normal(ks[4], (1, 3 * H), jnp.float32)
    w_fc_t = scale * jax.random.normal(ks[5], (H, V), jnp.float32)
    b_fc   = scale * jax.random.normal(ks[6], (1, V), jnp.float32)
    tokens = jax.random.randint(ks[7], (B, T), 0, V, dtype=jnp.int32)

    logits = bigram_forward(tokens, emb, w_ih_t, w_hh_t, b_ih, b_hh, w_fc_t, b_fc)
    logits = jax.block_until_ready(logits)

    ref = reference_forward(tokens, emb, w_ih_t, w_hh_t, b_ih, b_hh, w_fc_t, b_fc)
    assert logits.shape == (B, T, V)
    err = jnp.max(jnp.abs(logits - ref))
    assert jnp.allclose(logits, ref, atol=2e-3, rtol=2e-3), f"max abs err {err}"

    # targets=None path of the PyTorch forward -> loss is None (not computed).
    print("KERNEL_OK")
</pallas_src>

<mosaic_0001>
module attributes {stable_mosaic.version = 11 : i64} {
  func.func @bigram_fwd_kernel(%arg0: i32, %arg1: memref<2x8xi32, #tpu.memory_space<smem>>, %arg2: memref<128x128xf32, #tpu.memory_space<vmem>>, %arg3: memref<128x384xbf16, #tpu.memory_space<vmem>>, %arg4: memref<128x384xbf16, #tpu.memory_space<vmem>>, %arg5: memref<1x384xf32, #tpu.memory_space<vmem>>, %arg6: memref<1x128xf32, #tpu.memory_space<vmem>>, %arg7: memref<128x128xbf16, #tpu.memory_space<vmem>>, %arg8: memref<1x128xf32, #tpu.memory_space<vmem>>, %arg9: memref<16x128xf32, #tpu.memory_space<vmem>>, %arg10: memref<16x128xf32, #tpu.memory_space<vmem>>, %arg11: memref<16x384xf32, #tpu.memory_space<vmem>>, %arg12: memref<16x128xf32, #tpu.memory_space<vmem>>) attributes {dimension_semantics = [#tpu.dimension_semantics<arbitrary>], iteration_bounds = array<i64: 1>, scalar_prefetch = 1 : i64, scratch_operands = 3 : i64, tpu.core_type = #tpu.core_type<tc>, window_params = [{pipeline_mode = #tpu.pipeline_mode<synchronous>, transform_indices = @transform_0, window_bounds = array<i64: 128, 128>}, {pipeline_mode = #tpu.pipeline_mode<synchronous>, transform_indices = @transform_1, window_bounds = array<i64: 128, 384>}, {pipeline_mode = #tpu.pipeline_mode<synchronous>, transform_indices = @transform_2, window_bounds = array<i64: 128, 384>}, {pipeline_mode = #tpu.pipeline_mode<synchronous>, transform_indices = @transform_3, window_bounds = array<i64: 1, 384>}, {pipeline_mode = #tpu.pipeline_mode<synchronous>, transform_indices = @transform_4, window_bounds = array<i64: 1, 128>}, {pipeline_mode = #tpu.pipeline_mode<synchronous>, transform_indices = @transform_5, window_bounds = array<i64: 128, 128>}, {pipeline_mode = #tpu.pipeline_mode<synchronous>, transform_indices = @transform_6, window_bounds = array<i64: 1, 128>}, {pipeline_mode = #tpu.pipeline_mode<synchronous>, transform_indices = @transform_7, window_bounds = array<i64: 16, 128>}]} {
    %c0 = arith.constant 0 : index
    %c0_0 = arith.constant 0 : index
    %0 = memref.load %arg1[%c0, %c0_0] : memref<2x8xi32, #tpu.memory_space<smem>>
    %1 = arith.index_cast %0 : i32 to index
    %c0_1 = arith.constant 0 : index
    %2 = vector.load %arg2[%1, %c0_1] : memref<128x128xf32, #tpu.memory_space<vmem>>, vector<1x128xf32>
    %3 = vector.shape_cast %2 : vector<1x128xf32> to vector<128xf32>
    %4 = vector.shape_cast %3 : vector<128xf32> to vector<1x128xf32>
    %c0_2 = arith.constant 0 : index
    %c0_3 = arith.constant 0 : index
    %5 = vector.load %arg10[%c0_2, %c0_3] : memref<16x128xf32, #tpu.memory_space<vmem>>, vector<1x128xf32>
    tpu.vector_store %arg10[%c0_2, %c0_3], %4 {strides = array<i32>} : memref<16x128xf32, #tpu.memory_space<vmem>>, vector<1x128xf32>,
    %c1 = arith.constant 1 : index
    %c0_4 = arith.constant 0 : index
    %6 = memref.load %arg1[%c1, %c0_4] : memref<2x8xi32, #tpu.memory_space<smem>>
    %7 = arith.index_cast %6 : i32 to index
    %c0_5 = arith.constant 0 : index
    %8 = vector.load %arg2[%7, %c0_5] : memref<128x128xf32, #tpu.memory_space<vmem>>, vector<1x128xf32>
    %9 = vector.shape_cast %8 : vector<1x128xf32> to vector<128xf32>
    %10 = vector.shape_cast %9 : vector<128xf32> to vector<1x128xf32>
    %c1_6 = arith.constant 1 : index
    %c0_7 = arith.constant 0 : index
    %11 = vector.load %arg10[%c1_6, %c0_7] : memref<16x128xf32, #tpu.memory_space<vmem>>, vector<1x128xf32>
    tpu.vector_store %arg10[%c1_6, %c0_7], %10 {strides = array<i32>} : memref<16x128xf32, #tpu.memory_space<vmem>>, vector<1x128xf32>,
    %c0_8 = arith.constant 0 : index
    %c1_9 = arith.constant 1 : index
    %12 = memref.load %arg1[%c0_8, %c1_9] : memref<2x8xi32, #tpu.memory_space<smem>>
    %13 = arith.index_cast %12 : i32 to index
    %c0_10 = arith.constant 0 : index
    %14 = vector.load %arg2[%13, %c0_10] : memref<128x128xf32, #tpu.memory_space<vmem>>, vector<1x128xf32>
    %15 = vector.shape_cast %14 : vector<1x128xf32> to vector<128xf32>
    %16 = vector.shape_cast %15 : vector<128xf32> to vector<1x128xf32>
    %c2 = arith.constant 2 : index
    %c0_11 = arith.constant 0 : index
    %17 = vector.load %arg10[%c2, %c0_11] : memref<16x128xf32, #tpu.memory_space<vmem>>, vector<1x128xf32>
    tpu.vector_store %arg10[%c2, %c0_11], %16 {strides = array<i32>} : memref<16x128xf32, #tpu.memory_space<vmem>>, vector<1x128xf32>,
    %c1_12 = arith.constant 1 : index
    %c1_13 = arith.constant 1 : index
    %18 = memref.load %arg1[%c1_12, %c1_13] : memref<2x8xi32, #tpu.memory_space<smem>>
    %19 = arith.index_cast %18 : i32 to index
    %c0_14 = arith.constant 0 : index
    %20 = vector.load %arg2[%19, %c0_14] : memref<128x128xf32, #tpu.memory_space<vmem>>, vector<1x128xf32>
    %21 = vector.shape_cast %20 : vector<1x128xf32> to vector<128xf32>
    %22 = vector.shape_cast %21 : vector<128xf32> to vector<1x128xf32>
    %c3 = arith.constant 3 : index
    %c0_15 = arith.constant 0 : index
    %23 = vector.load %arg10[%c3, %c0_15] : memref<16x128xf32, #tpu.memory_space<vmem>>, vector<1x128xf32>
    tpu.vector_store %arg10[%c3, %c0_15], %22 {strides = array<i32>} : memref<16x128xf32, #tpu.memory_space<vmem>>, vector<1x128xf32>,
    %c0_16 = arith.constant 0 : index
    %c2_17 = arith.constant 2 : index
    %24 = memref.load %arg1[%c0_16, %c2_17] : memref<2x8xi32, #tpu.memory_space<smem>>
    %25 = arith.index_cast %24 : i32 to index
    %c0_18 = arith.constant 0 : index
    %26 = vector.load %arg2[%25, %c0_18] : memref<128x128xf32, #tpu.memory_space<vmem>>, vector<1x128xf32>
    %27 = vector.shape_cast %26 : vector<1x128xf32> to vector<128xf32>
    %28 = vector.shape_cast %27 : vector<128xf32> to vector<1x128xf32>
    %c4 = arith.constant 4 : index
    %c0_19 = arith.constant 0 : index
    %29 = vector.load %arg10[%c4, %c0_19] : memref<16x128xf32, #tpu.memory_space<vmem>>, vector<1x128xf32>
    tpu.vector_store %arg10[%c4, %c0_19], %28 {strides = array<i32>} : memref<16x128xf32, #tpu.memory_space<vmem>>, vector<1x128xf32>,
    %c1_20 = arith.constant 1 : index
    %c2_21 = arith.constant 2 : index
    %30 = memref.load %arg1[%c1_20, %c2_21] : memref<2x8xi32, #tpu.memory_space<smem>>
    %31 = arith.index_cast %30 : i32 to index
    %c0_22 = arith.constant 0 : index
    %32 = vector.load %arg2[%31, %c0_22] : memref<128x128xf32, #tpu.memory_space<vmem>>, vector<1x128xf32>
    %33 = vector.shape_cast %32 : vector<1x128xf32> to vector<128xf32>
    %34 = vector.shape_cast %33 : vector<128xf32> to vector<1x128xf32>
    %c5 = arith.constant 5 : index
    %c0_23 = arith.constant 0 : index
    %35 = vector.load %arg10[%c5, %c0_23] : memref<16x128xf32, #tpu.memory_space<vmem>>, vector<1x128xf32>
    tpu.vector_store %arg10[%c5, %c0_23], %34 {strides = array<i32>} : memref<16x128xf32, #tpu.memory_space<vmem>>, vector<1x128xf32>,
    %c0_24 = arith.constant 0 : index
    %c3_25 = arith.constant 3 : index
    %36 = memref.load %arg1[%c0_24, %c3_25] : memref<2x8xi32, #tpu.memory_space<smem>>
    %37 = arith.index_cast %36 : i32 to index
    %c0_26 = arith.constant 0 : index
    %38 = vector.load %arg2[%37, %c0_26] : memref<128x128xf32, #tpu.memory_space<vmem>>, vector<1x128xf32>
    %39 = vector.shape_cast %38 : vector<1x128xf32> to vector<128xf32>
    %40 = vector.shape_cast %39 : vector<128xf32> to vector<1x128xf32>
    %c6 = arith.constant 6 : index
    %c0_27 = arith.constant 0 : index
    %41 = vector.load %arg10[%c6, %c0_27] : memref<16x128xf32, #tpu.memory_space<vmem>>, vector<1x128xf32>
    tpu.vector_store %arg10[%c6, %c0_27], %40 {strides = array<i32>} : memref<16x128xf32, #tpu.memory_space<vmem>>, vector<1x128xf32>,
    %c1_28 = arith.constant 1 : index
    %c3_29 = arith.constant 3 : index
    %42 = memref.load %arg1[%c1_28, %c3_29] : memref<2x8xi32, #tpu.memory_space<smem>>
    %43 = arith.index_cast %42 : i32 to index
    %c0_30 = arith.constant 0 : index
    %44 = vector.load %arg2[%43, %c0_30] : memref<128x128xf32, #tpu.memory_space<vmem>>, vector<1x128xf32>
    %45 = vector.shape_cast %44 : vector<1x128xf32> to vector<128xf32>
    %46 = vector.shape_cast %45 : vector<128xf32> to vector<1x128xf32>
    %c7 = arith.constant 7 : index
    %c0_31 = arith.constant 0 : index
    %47 = vector.load %arg10[%c7, %c0_31] : memref<16x128xf32, #tpu.memory_space<vmem>>, vector<1x128xf32>
    tpu.vector_store %arg10[%c7, %c0_31], %46 {strides = array<i32>} : memref<16x128xf32, #tpu.memory_space<vmem>>, vector<1x128xf32>,
    %c0_32 = arith.constant 0 : index
    %c4_33 = arith.constant 4 : index
    %48 = memref.load %arg1[%c0_32, %c4_33] : memref<2x8xi32, #tpu.memory_space<smem>>
    %49 = arith.index_cast %48 : i32 to index
    %c0_34 = arith.constant 0 : index
    %50 = vector.load %arg2[%49, %c0_34] : memref<128x128xf32, #tpu.memory_space<vmem>>, vector<1x128xf32>
    %51 = vector.shape_cast %50 : vector<1x128xf32> to vector<128xf32>
    %52 = vector.shape_cast %51 : vector<128xf32> to vector<1x128xf32>
    %c8 = arith.constant 8 : index
    %c0_35 = arith.constant 0 : index
    %53 = vector.load %arg10[%c8, %c0_35] : memref<16x128xf32, #tpu.memory_space<vmem>>, vector<1x128xf32>
    tpu.vector_store %arg10[%c8, %c0_35], %52 {strides = array<i32>} : memref<16x128xf32, #tpu.memory_space<vmem>>, vector<1x128xf32>,
    %c1_36 = arith.constant 1 : index
    %c4_37 = arith.constant 4 : index
    %54 = memref.load %arg1[%c1_36, %c4_37] : memref<2x8xi32, #tpu.memory_space<smem>>
    %55 = arith.index_cast %54 : i32 to index
    %c0_38 = arith.constant 0 : index
    %56 = vector.load %arg2[%55, %c0_38] : memref<128x128xf32, #tpu.memory_space<vmem>>, vector<1x128xf32>
    %57 = vector.shape_cast %56 : vector<1x128xf32> to vector<128xf32>
    %58 = vector.shape_cast %57 : vector<128xf32> to vector<1x128xf32>
    %c9 = arith.constant 9 : index
    %c0_39 = arith.constant 0 : index
    %59 = vector.load %arg10[%c9, %c0_39] : memref<16x128xf32, #tpu.memory_space<vmem>>, vector<1x128xf32>
    tpu.vector_store %arg10[%c9, %c0_39], %58 {strides = array<i32>} : memref<16x128xf32, #tpu.memory_space<vmem>>, vector<1x128xf32>,
    %c0_40 = arith.constant 0 : index
    %c5_41 = arith.constant 5 : index
    %60 = memref.load %arg1[%c0_40, %c5_41] : memref<2x8xi32, #tpu.memory_space<smem>>
    %61 = arith.index_cast %60 : i32 to index
    %c0_42 = arith.constant 0 : index
    %62 = vector.load %arg2[%61, %c0_42] : memref<128x128xf32, #tpu.memory_space<vmem>>, vector<1x128xf32>
    %63 = vector.shape_cast %62 : vector<1x128xf32> to vector<128xf32>
    %64 = vector.shape_cast %63 : vector<128xf32> to vector<1x128xf32>
    %c10 = arith.constant 10 : index
    %c0_43 = arith.constant 0 : index
    %65 = vector.load %arg10[%c10, %c0_43] : memref<16x128xf32, #tpu.memory_space<vmem>>, vector<1x128xf32>
    tpu.vector_store %arg10[%c10, %c0_43], %64 {strides = array<i32>} : memref<16x128xf32, #tpu.memory_space<vmem>>, vector<1x128xf32>,
    %c1_44 = arith.constant 1 : index
    %c5_45 = arith.constant 5 : index
    %66 = memref.load %arg1[%c1_44, %c5_45] : memref<2x8xi32, #tpu.memory_space<smem>>
    %67 = arith.index_cast %66 : i32 to index
    %c0_46 = arith.constant 0 : index
    %68 = vector.load %arg2[%67, %c0_46] : memref<128x128xf32, #tpu.memory_space<vmem>>, vector<1x128xf32>
    %69 = vector.shape_cast %68 : vector<1x128xf32> to vector<128xf32>
    %70 = vector.shape_cast %69 : vector<128xf32> to vector<1x128xf32>
    %c11 = arith.constant 11 : index
    %c0_47 = arith.constant 0 : index
    %71 = vector.load %arg10[%c11, %c0_47] : memref<16x128xf32, #tpu.memory_space<vmem>>, vector<1x128xf32>
    tpu.vector_store %arg10[%c11, %c0_47], %70 {strides = array<i32>} : memref<16x128xf32, #tpu.memory_space<vmem>>, vector<1x128xf32>,
    %c0_48 = arith.constant 0 : index
    %c6_49 = arith.constant 6 : index
    %72 = memref.load %arg1[%c0_48, %c6_49] : memref<2x8xi32, #tpu.memory_space<smem>>
    %73 = arith.index_cast %72 : i32 to index
    %c0_50 = arith.constant 0 : index
    %74 = vector.load %arg2[%73, %c0_50] : memref<128x128xf32, #tpu.memory_space<vmem>>, vector<1x128xf32>
    %75 = vector.shape_cast %74 : vector<1x128xf32> to vector<128xf32>
    %76 = vector.shape_cast %75 : vector<128xf32> to vector<1x128xf32>
    %c12 = arith.constant 12 : index
    %c0_51 = arith.constant 0 : index
    %77 = vector.load %arg10[%c12, %c0_51] : memref<16x128xf32, #tpu.memory_space<vmem>>, vector<1x128xf32>
    tpu.vector_store %arg10[%c12, %c0_51], %76 {strides = array<i32>} : memref<16x128xf32, #tpu.memory_space<vmem>>, vector<1x128xf32>,
    %c1_52 = arith.constant 1 : index
    %c6_53 = arith.constant 6 : index
    %78 = memref.load %arg1[%c1_52, %c6_53] : memref<2x8xi32, #tpu.memory_space<smem>>
    %79 = arith.index_cast %78 : i32 to index
    %c0_54 = arith.constant 0 : index
    %80 = vector.load %arg2[%79, %c0_54] : memref<128x128xf32, #tpu.memory_space<vmem>>, vector<1x128xf32>
    %81 = vector.shape_cast %80 : vector<1x128xf32> to vector<128xf32>
    %82 = vector.shape_cast %81 : vector<128xf32> to vector<1x128xf32>
    %c13 = arith.constant 13 : index
    %c0_55 = arith.constant 0 : index
    %83 = vector.load %arg10[%c13, %c0_55] : memref<16x128xf32, #tpu.memory_space<vmem>>, vector<1x128xf32>
    tpu.vector_store %arg10[%c13, %c0_55], %82 {strides = array<i32>} : memref<16x128xf32, #tpu.memory_space<vmem>>, vector<1x128xf32>,
    %c0_56 = arith.constant 0 : index
    %c7_57 = arith.constant 7 : index
    %84 = memref.load %arg1[%c0_56, %c7_57] : memref<2x8xi32, #tpu.memory_space<smem>>
    %85 = arith.index_cast %84 : i32 to index
    %c0_58 = arith.constant 0 : index
    %86 = vector.load %arg2[%85, %c0_58] : memref<128x128xf32, #tpu.memory_space<vmem>>, vector<1x128xf32>
    %87 = vector.shape_cast %86 : vector<1x128xf32> to vector<128xf32>
    %88 = vector.shape_cast %87 : vector<128xf32> to vector<1x128xf32>
    %c14 = arith.constant 14 : index
    %c0_59 = arith.constant 0 : index
    %89 = vector.load %arg10[%c14, %c0_59] : memref<16x128xf32, #tpu.memory_space<vmem>>, vector<1x128xf32>
    tpu.vector_store %arg10[%c14, %c0_59], %88 {strides = array<i32>} : memref<16x128xf32, #tpu.memory_space<vmem>>, vector<1x128xf32>,
    %c1_60 = arith.constant 1 : index
    %c7_61 = arith.constant 7 : index
    %90 = memref.load %arg1[%c1_60, %c7_61] : memref<2x8xi32, #tpu.memory_space<smem>>
    %91 = arith.index_cast %90 : i32 to index
    %c0_62 = arith.constant 0 : index
    %92 = vector.load %arg2[%91, %c0_62] : memref<128x128xf32, #tpu.memory_space<vmem>>, vector<1x128xf32>
    %93 = vector.shape_cast %92 : vector<1x128xf32> to vector<128xf32>
    %94 = vector.shape_cast %93 : vector<128xf32> to vector<1x128xf32>
    %c15 = arith.constant 15 : index
    %c0_63 = arith.constant 0 : index
    %95 = vector.load %arg10[%c15, %c0_63] : memref<16x128xf32, #tpu.memory_space<vmem>>, vector<1x128xf32>
    tpu.vector_store %arg10[%c15, %c0_63], %94 {strides = array<i32>} : memref<16x128xf32, #tpu.memory_space<vmem>>, vector<1x128xf32>,
    %c0_64 = arith.constant 0 : index
    %c0_65 = arith.constant 0 : index
    %96 = vector.load %arg10[%c0_64, %c0_65] : memref<16x128xf32, #tpu.memory_space<vmem>>, vector<16x128xf32>
    %97 = arith.truncf %96 : vector<16x128xf32> to vector<16x128xbf16>
    %c0_66 = arith.constant 0 : index
    %c0_67 = arith.constant 0 : index
    %98 = vector.load %arg3[%c0_66, %c0_67] : memref<128x384xbf16, #tpu.memory_space<vmem>>, vector<128x384xbf16>
    %cst = arith.constant dense<0.000000e+00> : vector<16x384xf32>
    %99 = tpu.matmul %97, %98, %cst {dimension_numbers = #tpu.dot_dimension_numbers<[1], [0], [0], [1], [0, 0, 1, 1], [], []>} : vector<16x128xbf16>, vector<128x384xbf16>, vector<16x384xf32> -> vector<16x384xf32>
    %c0_68 = arith.constant 0 : index
    %c0_69 = arith.constant 0 : index
    %100 = vector.load %arg5[%c0_68, %c0_69] : memref<1x384xf32, #tpu.memory_space<vmem>>, vector<1x384xf32>
    %101 = vector.broadcast %100 : vector<1x384xf32> to vector<16x384xf32>
    %102 = arith.addf %99, %101 : vector<16x384xf32>
    %c0_70 = arith.constant 0 : index
    %c0_71 = arith.constant 0 : index
    %103 = vector.load %arg11[%c0_70, %c0_71] : memref<16x384xf32, #tpu.memory_space<vmem>>, vector<16x384xf32>
    tpu.vector_store %arg11[%c0_70, %c0_71], %102 {strides = array<i32>} : memref<16x384xf32, #tpu.memory_space<vmem>>, vector<16x384xf32>,
    %c0_72 = arith.constant 0 : index
    %c0_73 = arith.constant 0 : index
    %104 = vector.load %arg6[%c0_72, %c0_73] : memref<1x128xf32, #tpu.memory_space<vmem>>, vector<1x128xf32>
    %cst_74 = arith.constant 0.000000e+00 : f32
    %105 = vector.broadcast %cst_74 : f32 to vector<2x128xf32>
    %c0_75 = arith.constant 0 : index
    %c0_76 = arith.constant 0 : index
    %106 = vector.load %arg11[%c0_75, %c0_76] : memref<16x384xf32, #tpu.memory_space<vmem>>, vector<2x384xf32>
    %107 = arith.truncf %105 : vector<2x128xf32> to vector<2x128xbf16>
    %c0_77 = arith.constant 0 : index
    %c0_78 = arith.constant 0 : index
    %108 = vector.load %arg4[%c0_77, %c0_78] : memref<128x384xbf16, #tpu.memory_space<vmem>>, vector<128x384xbf16>
    %cst_79 = arith.constant dense<0.000000e+00> : vector<2x384xf32>
    %109 = tpu.matmul %107, %108, %cst_79 {dimension_numbers = #tpu.dot_dimension_numbers<[1], [0], [0], [1], [0, 0, 1, 1], [], []>} : vector<2x128xbf16>, vector<128x384xbf16>, vector<2x384xf32> -> vector<2x384xf32>
    %110 = vector.extract_strided_slice %106 {offsets = [0, 0], sizes = [2, 128], strides = [1, 1]} : vector<2x384xf32> to vector<2x128xf32>
    %111 = vector.extract_strided_slice %109 {offsets = [0, 0], sizes = [2, 128], strides = [1, 1]} : vector<2x384xf32> to vector<2x128xf32>
    %112 = arith.addf %110, %111 : vector<2x128xf32>
    %113 = arith.negf %112 : vector<2x128xf32>
    %114 = math.exp %113 : vector<2x128xf32>
    %cst_80 = arith.constant 1.000000e+00 : f32
    %115 = vector.broadcast %cst_80 : f32 to vector<2x128xf32>
    %116 = arith.addf %115, %114 : vector<2x128xf32>
    %117 = arith.divf %115, %116 : vector<2x128xf32>
    %118 = vector.extract_strided_slice %106 {offsets = [0, 128], sizes = [2, 128], strides = [1, 1]} : vector<2x384xf32> to vector<2x128xf32>
    %119 = vector.extract_strided_slice %109 {offsets = [0, 128], sizes = [2, 128], strides = [1, 1]} : vector<2x384xf32> to vector<2x128xf32>
    %120 = arith.addf %118, %119 : vector<2x128xf32>
    %121 = arith.negf %120 : vector<2x128xf32>
    %122 = math.exp %121 : vector<2x128xf32>
    %cst_81 = arith.constant 1.000000e+00 : f32
    %123 = vector.broadcast %cst_81 : f32 to vector<2x128xf32>
    %124 = arith.addf %123, %122 : vector<2x128xf32>
    %125 = arith.divf %123, %124 : vector<2x128xf32>
    %126 = vector.extract_strided_slice %106 {offsets = [0, 256], sizes = [2, 128], strides = [1, 1]} : vector<2x384xf32> to vector<2x128xf32>
    %127 = vector.extract_strided_slice %109 {offsets = [0, 256], sizes = [2, 128], strides = [1, 1]} : vector<2x384xf32> to vector<2x128xf32>
    %128 = vector.broadcast %104 : vector<1x128xf32> to vector<2x128xf32>
    %129 = arith.addf %127, %128 : vector<2x128xf32>
    %130 = arith.mulf %117, %129 : vector<2x128xf32>
    %131 = arith.addf %126, %130 : vector<2x128xf32>
    %132 = math.tanh %131 : vector<2x128xf32>
    %cst_82 = arith.constant 1.000000e+00 : f32
    %133 = vector.broadcast %cst_82 : f32 to vector<2x128xf32>
    %134 = arith.subf %133, %125 : vector<2x128xf32>
    %135 = arith.mulf %134, %132 : vector<2x128xf32>
    %136 = arith.mulf %125, %105 : vector<2x128xf32>
    %137 = arith.addf %135, %136 : vector<2x128xf32>
    %c0_83 = arith.constant 0 : index
    %c0_84 = arith.constant 0 : index
    %138 = vector.load %arg12[%c0_83, %c0_84] : memref<16x128xf32, #tpu.memory_space<vmem>>, vector<2x128xf32>
    tpu.vector_store %arg12[%c0_83, %c0_84], %137 {strides = array<i32>} : memref<16x128xf32, #tpu.memory_space<vmem>>, vector<2x128xf32>,
    %c2_85 = arith.constant 2 : index
    %c0_86 = arith.constant 0 : index
    %139 = vector.load %arg11[%c2_85, %c0_86] : memref<16x384xf32, #tpu.memory_space<vmem>>, vector<2x384xf32>
    %140 = arith.truncf %137 : vector<2x128xf32> to vector<2x128xbf16>
    %c0_87 = arith.constant 0 : index
    %c0_88 = arith.constant 0 : index
    %141 = vector.load %arg4[%c0_87, %c0_88] : memref<128x384xbf16, #tpu.memory_space<vmem>>, vector<128x384xbf16>
    %cst_89 = arith.constant dense<0.000000e+00> : vector<2x384xf32>
    %142 = tpu.matmul %140, %141, %cst_89 {dimension_numbers = #tpu.dot_dimension_numbers<[1], [0], [0], [1], [0, 0, 1, 1], [], []>} : vector<2x128xbf16>, vector<128x384xbf16>, vector<2x384xf32> -> vector<2x384xf32>
    %143 = vector.extract_strided_slice %139 {offsets = [0, 0], sizes = [2, 128], strides = [1, 1]} : vector<2x384xf32> to vector<2x128xf32>
    %144 = vector.extract_strided_slice %142 {offsets = [0, 0], sizes = [2, 128], strides = [1, 1]} : vector<2x384xf32> to vector<2x128xf32>
    %145 = arith.addf %143, %144 : vector<2x128xf32>
    %146 = arith.negf %145 : vector<2x128xf32>
    %147 = math.exp %146 : vector<2x128xf32>
    %cst_90 = arith.constant 1.000000e+00 : f32
    %148 = vector.broadcast %cst_90 : f32 to vector<2x128xf32>
    %149 = arith.addf %148, %147 : vector<2x128xf32>
    %150 = arith.divf %148, %149 : vector<2x128xf32>
    %151 = vector.extract_strided_slice %139 {offsets = [0, 128], sizes = [2, 128], strides = [1, 1]} : vector<2x384xf32> to vector<2x128xf32>
    %152 = vector.extract_strided_slice %142 {offsets = [0, 128], sizes = [2, 128], strides = [1, 1]} : vector<2x384xf32> to vector<2x128xf32>
    %153 = arith.addf %151, %152 : vector<2x128xf32>
    %154 = arith.negf %153 : vector<2x128xf32>
    %155 = math.exp %154 : vector<2x128xf32>
    %cst_91 = arith.constant 1.000000e+00 : f32
    %156 = vector.broadcast %cst_91 : f32 to vector<2x128xf32>
    %157 = arith.addf %156, %155 : vector<2x128xf32>
    %158 = arith.divf %156, %157 : vector<2x128xf32>
    %159 = vector.extract_strided_slice %139 {offsets = [0, 256], sizes = [2, 128], strides = [1, 1]} : vector<2x384xf32> to vector<2x128xf32>
    %160 = vector.extract_strided_slice %142 {offsets = [0, 256], sizes = [2, 128], strides = [1, 1]} : vector<2x384xf32> to vector<2x128xf32>
    %161 = vector.broadcast %104 : vector<1x128xf32> to vector<2x128xf32>
    %162 = arith.addf %160, %161 : vector<2x128xf32>
    %163 = arith.mulf %150, %162 : vector<2x128xf32>
    %164 = arith.addf %159, %163 : vector<2x128xf32>
    %165 = math.tanh %164 : vector<2x128xf32>
    %cst_92 = arith.constant 1.000000e+00 : f32
    %166 = vector.broadcast %cst_92 : f32 to vector<2x128xf32>
    %167 = arith.subf %166, %158 : vector<2x128xf32>
    %168 = arith.mulf %167, %165 : vector<2x128xf32>
    %169 = arith.mulf %158, %137 : vector<2x128xf32>
    %170 = arith.addf %168, %169 : vector<2x128xf32>
    %c2_93 = arith.constant 2 : index
    %c0_94 = arith.constant 0 : index
    %171 = vector.load %arg12[%c2_93, %c0_94] : memref<16x128xf32, #tpu.memory_space<vmem>>, vector<2x128xf32>
    tpu.vector_store %arg12[%c2_93, %c0_94], %170 {strides = array<i32>} : memref<16x128xf32, #tpu.memory_space<vmem>>, vector<2x128xf32>,
    %c4_95 = arith.constant 4 : index
    %c0_96 = arith.constant 0 : index
    %172 = vector.load %arg11[%c4_95, %c0_96] : memref<16x384xf32, #tpu.memory_space<vmem>>, vector<2x384xf32>
    %173 = arith.truncf %170 : vector<2x128xf32> to vector<2x128xbf16>
    %c0_97 = arith.constant 0 : index
    %c0_98 = arith.constant 0 : index
    %174 = vector.load %arg4[%c0_97, %c0_98] : memref<128x384xbf16, #tpu.memory_space<vmem>>, vector<128x384xbf16>
    %cst_99 = arith.constant dense<0.000000e+00> : vector<2x384xf32>
    %175 = tpu.matmul %173, %174, %cst_99 {dimension_numbers = #tpu.dot_dimension_numbers<[1], [0], [0], [1], [0, 0, 1, 1], [], []>} : vector<2x128xbf16>, vector<128x384xbf16>, vector<2x384xf32> -> vector<2x384xf32>
    %176 = vector.extract_strided_slice %172 {offsets = [0, 0], sizes = [2, 128], strides = [1, 1]} : vector<2x384xf32> to vector<2x128xf32>
    %177 = vector.extract_strided_slice %175 {offsets = [0, 0], sizes = [2, 128], strides = [1, 1]} : vector<2x384xf32> to vector<2x128xf32>
    %178 = arith.addf %176, %177 : vector<2x128xf32>
    %179 = arith.negf %178 : vector<2x128xf32>
    %180 = math.exp %179 : vector<2x128xf32>
    %cst_100 = arith.constant 1.000000e+00 : f32
    %181 = vector.broadcast %cst_100 : f32 to vector<2x128xf32>
    %182 = arith.addf %181, %180 : vector<2x128xf32>
    %183 = arith.divf %181, %182 : vector<2x128xf32>
    %184 = vector.extract_strided_slice %172 {offsets = [0, 128], sizes = [2, 128], strides = [1, 1]} : vector<2x384xf32> to vector<2x128xf32>
    %185 = vector.extract_strided_slice %175 {offsets = [0, 128], sizes = [2, 128], strides = [1, 1]} : vector<2x384xf32> to vector<2x128xf32>
    %186 = arith.addf %184, %185 : vector<2x128xf32>
    %187 = arith.negf %186 : vector<2x128xf32>
    %188 = math.exp %187 : vector<2x128xf32>
    %cst_101 = arith.constant 1.000000e+00 : f32
    %189 = vector.broadcast %cst_101 : f32 to vector<2x128xf32>
    %190 = arith.addf %189, %188 : vector<2x128xf32>
    %191 = arith.divf %189, %190 : vector<2x128xf32>
    %192 = vector.extract_strided_slice %172 {offsets = [0, 256], sizes = [2, 128], strides = [1, 1]} : vector<2x384xf32> to vector<2x128xf32>
    %193 = vector.extract_strided_slice %175 {offsets = [0, 256], sizes = [2, 128], strides = [1, 1]} : vector<2x384xf32> to vector<2x128xf32>
    %194 = vector.broadcast %104 : vector<1x128xf32> to vector<2x128xf32>
    %195 = arith.addf %193, %194 : vector<2x128xf32>
    %196 = arith.mulf %183, %195 : vector<2x128xf32>
    %197 = arith.addf %192, %196 : vector<2x128xf32>
    %198 = math.tanh %197 : vector<2x128xf32>
    %cst_102 = arith.constant 1.000000e+00 : f32
    %199 = vector.broadcast %cst_102 : f32 to vector<2x128xf32>
    %200 = arith.subf %199, %191 : vector<2x128xf32>
    %201 = arith.mulf %200, %198 : vector<2x128xf32>
    %202 = arith.mulf %191, %170 : vector<2x128xf32>
    %203 = arith.addf %201, %202 : vector<2x128xf32>
    %c4_103 = arith.constant 4 : index
    %c0_104 = arith.constant 0 : index
    %204 = vector.load %arg12[%c4_103, %c0_104] : memref<16x128xf32, #tpu.memory_space<vmem>>, vector<2x128xf32>
    tpu.vector_store %arg12[%c4_103, %c0_104], %203 {strides = array<i32>} : memref<16x128xf32, #tpu.memory_space<vmem>>, vector<2x128xf32>,
    %c6_105 = arith.constant 6 : index
    %c0_106 = arith.constant 0 : index
    %205 = vector.load %arg11[%c6_105, %c0_106] : memref<16x384xf32, #tpu.memory_space<vmem>>, vector<2x384xf32>
    %206 = arith.truncf %203 : vector<2x128xf32> to vector<2x128xbf16>
    %c0_107 = arith.constant 0 : index
    %c0_108 = arith.constant 0 : index
    %207 = vector.load %arg4[%c0_107, %c0_108] : memref<128x384xbf16, #tpu.memory_space<vmem>>, vector<128x384xbf16>
    %cst_109 = arith.constant dense<0.000000e+00> : vector<2x384xf32>
    %208 = tpu.matmul %206, %207, %cst_109 {dimension_numbers = #tpu.dot_dimension_numbers<[1], [0], [0], [1], [0, 0, 1, 1], [], []>} : vector<2x128xbf16>, vector<128x384xbf16>, vector<2x384xf32> -> vector<2x384xf32>
    %209 = vector.extract_strided_slice %205 {offsets = [0, 0], sizes = [2, 128], strides = [1, 1]} : vector<2x384xf32> to vector<2x128xf32>
    %210 = vector.extract_strided_slice %208 {offsets = [0, 0], sizes = [2, 128], strides = [1, 1]} : vector<2x384xf32> to vector<2x128xf32>
    %211 = arith.addf %209, %210 : vector<2x128xf32>
    %212 = arith.negf %211 : vector<2x128xf32>
    %213 = math.exp %212 : vector<2x128xf32>
    %cst_110 = arith.constant 1.000000e+00 : f32
    %214 = vector.broadcast %cst_110 : f32 to vector<2x128xf32>
    %215 = arith.addf %214, %213 : vector<2x128xf32>
    %216 = arith.divf %214, %215 : vector<2x128xf32>
    %217 = vector.extract_strided_slice %205 {offsets = [0, 128], sizes = [2, 128], strides = [1, 1]} : vector<2x384xf32> to vector<2x128xf32>
    %218 = vector.extract_strided_slice %208 {offsets = [0, 128], sizes = [2, 128], strides = [1, 1]} : vector<2x384xf32> to vector<2x128xf32>
    %219 = arith.addf %217, %218 : vector<2x128xf32>
    %220 = arith.negf %219 : vector<2x128xf32>
    %221 = math.exp %220 : vector<2x128xf32>
    %cst_111 = arith.constant 1.000000e+00 : f32
    %222 = vector.broadcast %cst_111 : f32 to vector<2x128xf32>
    %223 = arith.addf %222, %221 : vector<2x128xf32>
    %224 = arith.divf %222, %223 : vector<2x128xf32>
    %225 = vector.extract_strided_slice %205 {offsets = [0, 256], sizes = [2, 128], strides = [1, 1]} : vector<2x384xf32> to vector<2x128xf32>
    %226 = vector.extract_strided_slice %208 {offsets = [0, 256], sizes = [2, 128], strides = [1, 1]} : vector<2x384xf32> to vector<2x128xf32>
    %227 = vector.broadcast %104 : vector<1x128xf32> to vector<2x128xf32>
    %228 = arith.addf %226, %227 : vector<2x128xf32>
    %229 = arith.mulf %216, %228 : vector<2x128xf32>
    %230 = arith.addf %225, %229 : vector<2x128xf32>
    %231 = math.tanh %230 : vector<2x128xf32>
    %cst_112 = arith.constant 1.000000e+00 : f32
    %232 = vector.broadcast %cst_112 : f32 to vector<2x128xf32>
    %233 = arith.subf %232, %224 : vector<2x128xf32>
    %234 = arith.mulf %233, %231 : vector<2x128xf32>
    %235 = arith.mulf %224, %203 : vector<2x128xf32>
    %236 = arith.addf %234, %235 : vector<2x128xf32>
    %c6_113 = arith.constant 6 : index
    %c0_114 = arith.constant 0 : index
    %237 = vector.load %arg12[%c6_113, %c0_114] : memref<16x128xf32, #tpu.memory_space<vmem>>, vector<2x128xf32>
    tpu.vector_store %arg12[%c6_113, %c0_114], %236 {strides = array<i32>} : memref<16x128xf32, #tpu.memory_space<vmem>>, vector<2x128xf32>,
    %c8_115 = arith.constant 8 : index
    %c0_116 = arith.constant 0 : index
    %238 = vector.load %arg11[%c8_115, %c0_116] : memref<16x384xf32, #tpu.memory_space<vmem>>, vector<2x384xf32>
    %239 = arith.truncf %236 : vector<2x128xf32> to vector<2x128xbf16>
    %c0_117 = arith.constant 0 : index
    %c0_118 = arith.constant 0 : index
    %240 = vector.load %arg4[%c0_117, %c0_118] : memref<128x384xbf16, #tpu.memory_space<vmem>>, vector<128x384xbf16>
    %cst_119 = arith.constant dense<0.000000e+00> : vector<2x384xf32>
    %241 = tpu.matmul %239, %240, %cst_119 {dimension_numbers = #tpu.dot_dimension_numbers<[1], [0], [0], [1], [0, 0, 1, 1], [], []>} : vector<2x128xbf16>, vector<128x384xbf16>, vector<2x384xf32> -> vector<2x384xf32>
    %242 = vector.extract_strided_slice %238 {offsets = [0, 0], sizes = [2, 128], strides = [1, 1]} : vector<2x384xf32> to vector<2x128xf32>
    %243 = vector.extract_strided_slice %241 {offsets = [0, 0], sizes = [2, 128], strides = [1, 1]} : vector<2x384xf32> to vector<2x128xf32>
    %244 = arith.addf %242, %243 : vector<2x128xf32>
    %245 = arith.negf %244 : vector<2x128xf32>
    %246 = math.exp %245 : vector<2x128xf32>
    %cst_120 = arith.constant 1.000000e+00 : f32
    %247 = vector.broadcast %cst_120 : f32 to vector<2x128xf32>
    %248 = arith.addf %247, %246 : vector<2x128xf32>
    %249 = arith.divf %247, %248 : vector<2x128xf32>
    %250 = vector.extract_strided_slice %238 {offsets = [0, 128], sizes = [2, 128], strides = [1, 1]} : vector<2x384xf32> to vector<2x128xf32>
    %251 = vector.extract_strided_slice %241 {offsets = [0, 128], sizes = [2, 128], strides = [1, 1]} : vector<2x384xf32> to vector<2x128xf32>
    %252 = arith.addf %250, %251 : vector<2x128xf32>
    %253 = arith.negf %252 : vector<2x128xf32>
    %254 = math.exp %253 : vector<2x128xf32>
    %cst_121 = arith.constant 1.000000e+00 : f32
    %255 = vector.broadcast %cst_121 : f32 to vector<2x128xf32>
    %256 = arith.addf %255, %254 : vector<2x128xf32>
    %257 = arith.divf %255, %256 : vector<2x128xf32>
    %258 = vector.extract_strided_slice %238 {offsets = [0, 256], sizes = [2, 128], strides = [1, 1]} : vector<2x384xf32> to vector<2x128xf32>
    %259 = vector.extract_strided_slice %241 {offsets = [0, 256], sizes = [2, 128], strides = [1, 1]} : vector<2x384xf32> to vector<2x128xf32>
    %260 = vector.broadcast %104 : vector<1x128xf32> to vector<2x128xf32>
    %261 = arith.addf %259, %260 : vector<2x128xf32>
    %262 = arith.mulf %249, %261 : vector<2x128xf32>
    %263 = arith.addf %258, %262 : vector<2x128xf32>
    %264 = math.tanh %263 : vector<2x128xf32>
    %cst_122 = arith.constant 1.000000e+00 : f32
    %265 = vector.broadcast %cst_122 : f32 to vector<2x128xf32>
    %266 = arith.subf %265, %257 : vector<2x128xf32>
    %267 = arith.mulf %266, %264 : vector<2x128xf32>
    %268 = arith.mulf %257, %236 : vector<2x128xf32>
    %269 = arith.addf %267, %268 : vector<2x128xf32>
    %c8_123 = arith.constant 8 : index
    %c0_124 = arith.constant 0 : index
    %270 = vector.load %arg12[%c8_123, %c0_124] : memref<16x128xf32, #tpu.memory_space<vmem>>, vector<2x128xf32>
    tpu.vector_store %arg12[%c8_123, %c0_124], %269 {strides = array<i32>} : memref<16x128xf32, #tpu.memory_space<vmem>>, vector<2x128xf32>,
    %c10_125 = arith.constant 10 : index
    %c0_126 = arith.constant 0 : index
    %271 = vector.load %arg11[%c10_125, %c0_126] : memref<16x384xf32, #tpu.memory_space<vmem>>, vector<2x384xf32>
    %272 = arith.truncf %269 : vector<2x128xf32> to vector<2x128xbf16>
    %c0_127 = arith.constant 0 : index
    %c0_128 = arith.constant 0 : index
    %273 = vector.load %arg4[%c0_127, %c0_128] : memref<128x384xbf16, #tpu.memory_space<vmem>>, vector<128x384xbf16>
    %cst_129 = arith.constant dense<0.000000e+00> : vector<2x384xf32>
    %274 = tpu.matmul %272, %273, %cst_129 {dimension_numbers = #tpu.dot_dimension_numbers<[1], [0], [0], [1], [0, 0, 1, 1], [], []>} : vector<2x128xbf16>, vector<128x384xbf16>, vector<2x384xf32> -> vector<2x384xf32>
    %275 = vector.extract_strided_slice %271 {offsets = [0, 0], sizes = [2, 128], strides = [1, 1]} : vector<2x384xf32> to vector<2x128xf32>
    %276 = vector.extract_strided_slice %274 {offsets = [0, 0], sizes = [2, 128], strides = [1, 1]} : vector<2x384xf32> to vector<2x128xf32>
    %277 = arith.addf %275, %276 : vector<2x128xf32>
    %278 = arith.negf %277 : vector<2x128xf32>
    %279 = math.exp %278 : vector<2x128xf32>
    %cst_130 = arith.constant 1.000000e+00 : f32
    %280 = vector.broadcast %cst_130 : f32 to vector<2x128xf32>
    %281 = arith.addf %280, %279 : vector<2x128xf32>
    %282 = arith.divf %280, %281 : vector<2x128xf32>
    %283 = vector.extract_strided_slice %271 {offsets = [0, 128], sizes = [2, 128], strides = [1, 1]} : vector<2x384xf32> to vector<2x128xf32>
    %284 = vector.extract_strided_slice %274 {offsets = [0, 128], sizes = [2, 128], strides = [1, 1]} : vector<2x384xf32> to vector<2x128xf32>
    %285 = arith.addf %283, %284 : vector<2x128xf32>
    %286 = arith.negf %285 : vector<2x128xf32>
    %287 = math.exp %286 : vector<2x128xf32>
    %cst_131 = arith.constant 1.000000e+00 : f32
    %288 = vector.broadcast %cst_131 : f32 to vector<2x128xf32>
    %289 = arith.addf %288, %287 : vector<2x128xf32>
    %290 = arith.divf %288, %289 : vector<2x128xf32>
    %291 = vector.extract_strided_slice %271 {offsets = [0, 256], sizes = [2, 128], strides = [1, 1]} : vector<2x384xf32> to vector<2x128xf32>
    %292 = vector.extract_strided_slice %274 {offsets = [0, 256], sizes = [2, 128], strides = [1, 1]} : vector<2x384xf32> to vector<2x128xf32>
    %293 = vector.broadcast %104 : vector<1x128xf32> to vector<2x128xf32>
    %294 = arith.addf %292, %293 : vector<2x128xf32>
    %295 = arith.mulf %282, %294 : vector<2x128xf32>
    %296 = arith.addf %291, %295 : vector<2x128xf32>
    %297 = math.tanh %296 : vector<2x128xf32>
    %cst_132 = arith.constant 1.000000e+00 : f32
    %298 = vector.broadcast %cst_132 : f32 to vector<2x128xf32>
    %299 = arith.subf %298, %290 : vector<2x128xf32>
    %300 = arith.mulf %299, %297 : vector<2x128xf32>
    %301 = arith.mulf %290, %269 : vector<2x128xf32>
    %302 = arith.addf %300, %301 : vector<2x128xf32>
    %c10_133 = arith.constant 10 : index
    %c0_134 = arith.constant 0 : index
    %303 = vector.load %arg12[%c10_133, %c0_134] : memref<16x128xf32, #tpu.memory_space<vmem>>, vector<2x128xf32>
    tpu.vector_store %arg12[%c10_133, %c0_134], %302 {strides = array<i32>} : memref<16x128xf32, #tpu.memory_space<vmem>>, vector<2x128xf32>,
    %c12_135 = arith.constant 12 : index
    %c0_136 = arith.constant 0 : index
    %304 = vector.load %arg11[%c12_135, %c0_136] : memref<16x384xf32, #tpu.memory_space<vmem>>, vector<2x384xf32>
    %305 = arith.truncf %302 : vector<2x128xf32> to vector<2x128xbf16>
    %c0_137 = arith.constant 0 : index
    %c0_138 = arith.constant 0 : index
    %306 = vector.load %arg4[%c0_137, %c0_138] : memref<128x384xbf16, #tpu.memory_space<vmem>>, vector<128x384xbf16>
    %cst_139 = arith.constant dense<0.000000e+00> : vector<2x384xf32>
    %307 = tpu.matmul %305, %306, %cst_139 {dimension_numbers = #tpu.dot_dimension_numbers<[1], [0], [0], [1], [0, 0, 1, 1], [], []>} : vector<2x128xbf16>, vector<128x384xbf16>, vector<2x384xf32> -> vector<2x384xf32>
    %308 = vector.extract_strided_slice %304 {offsets = [0, 0], sizes = [2, 128], strides = [1, 1]} : vector<2x384xf32> to vector<2x128xf32>
    %309 = vector.extract_strided_slice %307 {offsets = [0, 0], sizes = [2, 128], strides = [1, 1]} : vector<2x384xf32> to vector<2x128xf32>
    %310 = arith.addf %308, %309 : vector<2x128xf32>
    %311 = arith.negf %310 : vector<2x128xf32>
    %312 = math.exp %311 : vector<2x128xf32>
    %cst_140 = arith.constant 1.000000e+00 : f32
    %313 = vector.broadcast %cst_140 : f32 to vector<2x128xf32>
    %314 = arith.addf %313, %312 : vector<2x128xf32>
    %315 = arith.divf %313, %314 : vector<2x128xf32>
    %316 = vector.extract_strided_slice %304 {offsets = [0, 128], sizes = [2, 128], strides = [1, 1]} : vector<2x384xf32> to vector<2x128xf32>
    %317 = vector.extract_strided_slice %307 {offsets = [0, 128], sizes = [2, 128], strides = [1, 1]} : vector<2x384xf32> to vector<2x128xf32>
    %318 = arith.addf %316, %317 : vector<2x128xf32>
    %319 = arith.negf %318 : vector<2x128xf32>
    %320 = math.exp %319 : vector<2x128xf32>
    %cst_141 = arith.constant 1.000000e+00 : f32
    %321 = vector.broadcast %cst_141 : f32 to vector<2x128xf32>
    %322 = arith.addf %321, %320 : vector<2x128xf32>
    %323 = arith.divf %321, %322 : vector<2x128xf32>
    %324 = vector.extract_strided_slice %304 {offsets = [0, 256], sizes = [2, 128], strides = [1, 1]} : vector<2x384xf32> to vector<2x128xf32>
    %325 = vector.extract_strided_slice %307 {offsets = [0, 256], sizes = [2, 128], strides = [1, 1]} : vector<2x384xf32> to vector<2x128xf32>
    %326 = vector.broadcast %104 : vector<1x128xf32> to vector<2x128xf32>
    %327 = arith.addf %325, %326 : vector<2x128xf32>
    %328 = arith.mulf %315, %327 : vector<2x128xf32>
    %329 = arith.addf %324, %328 : vector<2x128xf32>
    %330 = math.tanh %329 : vector<2x128xf32>
    %cst_142 = arith.constant 1.000000e+00 : f32
    %331 = vector.broadcast %cst_142 : f32 to vector<2x128xf32>
    %332 = arith.subf %331, %323 : vector<2x128xf32>
    %333 = arith.mulf %332, %330 : vector<2x128xf32>
    %334 = arith.mulf %323, %302 : vector<2x128xf32>
    %335 = arith.addf %333, %334 : vector<2x128xf32>
    %c12_143 = arith.constant 12 : index
    %c0_144 = arith.constant 0 : index
    %336 = vector.load %arg12[%c12_143, %c0_144] : memref<16x128xf32, #tpu.memory_space<vmem>>, vector<2x128xf32>
    tpu.vector_store %arg12[%c12_143, %c0_144], %335 {strides = array<i32>} : memref<16x128xf32, #tpu.memory_space<vmem>>, vector<2x128xf32>,
    %c14_145 = arith.constant 14 : index
    %c0_146 = arith.constant 0 : index
    %337 = vector.load %arg11[%c14_145, %c0_146] : memref<16x384xf32, #tpu.memory_space<vmem>>, vector<2x384xf32>
    %338 = arith.truncf %335 : vector<2x128xf32> to vector<2x128xbf16>
    %c0_147 = arith.constant 0 : index
    %c0_148 = arith.constant 0 : index
    %339 = vector.load %arg4[%c0_147, %c0_148] : memref<128x384xbf16, #tpu.memory_space<vmem>>, vector<128x384xbf16>
    %cst_149 = arith.constant dense<0.000000e+00> : vector<2x384xf32>
    %340 = tpu.matmul %338, %339, %cst_149 {dimension_numbers = #tpu.dot_dimension_numbers<[1], [0], [0], [1], [0, 0, 1, 1], [], []>} : vector<2x128xbf16>, vector<128x384xbf16>, vector<2x384xf32> -> vector<2x384xf32>
    %341 = vector.extract_strided_slice %337 {offsets = [0, 0], sizes = [2, 128], strides = [1, 1]} : vector<2x384xf32> to vector<2x128xf32>
    %342 = vector.extract_strided_slice %340 {offsets = [0, 0], sizes = [2, 128], strides = [1, 1]} : vector<2x384xf32> to vector<2x128xf32>
    %343 = arith.addf %341, %342 : vector<2x128xf32>
    %344 = arith.negf %343 : vector<2x128xf32>
    %345 = math.exp %344 : vector<2x128xf32>
    %cst_150 = arith.constant 1.000000e+00 : f32
    %346 = vector.broadcast %cst_150 : f32 to vector<2x128xf32>
    %347 = arith.addf %346, %345 : vector<2x128xf32>
    %348 = arith.divf %346, %347 : vector<2x128xf32>
    %349 = vector.extract_strided_slice %337 {offsets = [0, 128], sizes = [2, 128], strides = [1, 1]} : vector<2x384xf32> to vector<2x128xf32>
    %350 = vector.extract_strided_slice %340 {offsets = [0, 128], sizes = [2, 128], strides = [1, 1]} : vector<2x384xf32> to vector<2x128xf32>
    %351 = arith.addf %349, %350 : vector<2x128xf32>
    %352 = arith.negf %351 : vector<2x128xf32>
    %353 = math.exp %352 : vector<2x128xf32>
    %cst_151 = arith.constant 1.000000e+00 : f32
    %354 = vector.broadcast %cst_151 : f32 to vector<2x128xf32>
    %355 = arith.addf %354, %353 : vector<2x128xf32>
    %356 = arith.divf %354, %355 : vector<2x128xf32>
    %357 = vector.extract_strided_slice %337 {offsets = [0, 256], sizes = [2, 128], strides = [1, 1]} : vector<2x384xf32> to vector<2x128xf32>
    %358 = vector.extract_strided_slice %340 {offsets = [0, 256], sizes = [2, 128], strides = [1, 1]} : vector<2x384xf32> to vector<2x128xf32>
    %359 = vector.broadcast %104 : vector<1x128xf32> to vector<2x128xf32>
    %360 = arith.addf %358, %359 : vector<2x128xf32>
    %361 = arith.mulf %348, %360 : vector<2x128xf32>
    %362 = arith.addf %357, %361 : vector<2x128xf32>
    %363 = math.tanh %362 : vector<2x128xf32>
    %cst_152 = arith.constant 1.000000e+00 : f32
    %364 = vector.broadcast %cst_152 : f32 to vector<2x128xf32>
    %365 = arith.subf %364, %356 : vector<2x128xf32>
    %366 = arith.mulf %365, %363 : vector<2x128xf32>
    %367 = arith.mulf %356, %335 : vector<2x128xf32>
    %368 = arith.addf %366, %367 : vector<2x128xf32>
    %c14_153 = arith.constant 14 : index
    %c0_154 = arith.constant 0 : index
    %369 = vector.load %arg12[%c14_153, %c0_154] : memref<16x128xf32, #tpu.memory_space<vmem>>, vector<2x128xf32>
    tpu.vector_store %arg12[%c14_153, %c0_154], %368 {strides = array<i32>} : memref<16x128xf32, #tpu.memory_space<vmem>>, vector<2x128xf32>,
    %c0_155 = arith.constant 0 : index
    %c0_156 = arith.constant 0 : index
    %370 = vector.load %arg12[%c0_155, %c0_156] : memref<16x128xf32, #tpu.memory_space<vmem>>, vector<16x128xf32>
    %371 = arith.truncf %370 : vector<16x128xf32> to vector<16x128xbf16>
    %c0_157 = arith.constant 0 : index
    %c0_158 = arith.constant 0 : index
    %372 = vector.load %arg7[%c0_157, %c0_158] : memref<128x128xbf16, #tpu.memory_space<vmem>>, vector<128x128xbf16>
    %cst_159 = arith.constant dense<0.000000e+00> : vector<16x128xf32>
    %373 = tpu.matmul %371, %372, %cst_159 {dimension_numbers = #tpu.dot_dimension_numbers<[1], [0], [0], [1], [0, 0, 1, 1], [], []>} : vector<16x128xbf16>, vector<128x128xbf16>, vector<16x128xf32> -> vector<16x128xf32>
    %c0_160 = arith.constant 0 : index
    %c0_161 = arith.constant 0 : index
    %374 = vector.load %arg8[%c0_160, %c0_161] : memref<1x128xf32, #tpu.memory_space<vmem>>, vector<1x128xf32>
    %375 = vector.broadcast %374 : vector<1x128xf32> to vector<16x128xf32>
    %376 = arith.addf %373, %375 : vector<16x128xf32>
    %c0_162 = arith.constant 0 : index
    %c0_163 = arith.constant 0 : index
    %377 = vector.load %arg9[%c0_162, %c0_163] : memref<16x128xf32, #tpu.memory_space<vmem>>, vector<16x128xf32>
    tpu.vector_store %arg9[%c0_162, %c0_163], %376 {strides = array<i32>} : memref<16x128xf32, #tpu.memory_space<vmem>>, vector<16x128xf32>,
    return
  }
  func.func @transform_0(%arg0: i32, %arg1: memref<2x8xi32, #tpu.memory_space<smem>>) -> (i32, i32) {
    %c0_i32 = arith.constant 0 : i32
    %c0_i32_0 = arith.constant 0 : i32
    %c0_i32_1 = arith.constant 0 : i32
    return %c0_i32, %c0_i32_0 : i32, i32
  }
  func.func @transform_1(%arg0: i32, %arg1: memref<2x8xi32, #tpu.memory_space<smem>>) -> (i32, i32) {
    %c0_i32 = arith.constant 0 : i32
    %c0_i32_0 = arith.constant 0 : i32
    %c0_i32_1 = arith.constant 0 : i32
    return %c0_i32, %c0_i32_0 : i32, i32
  }
  func.func @transform_2(%arg0: i32, %arg1: memref<2x8xi32, #tpu.memory_space<smem>>) -> (i32, i32) {
    %c0_i32 = arith.constant 0 : i32
    %c0_i32_0 = arith.constant 0 : i32
    %c0_i32_1 = arith.constant 0 : i32
    return %c0_i32, %c0_i32_0 : i32, i32
  }
  func.func @transform_3(%arg0: i32, %arg1: memref<2x8xi32, #tpu.memory_space<smem>>) -> (i32, i32) {
    %c0_i32 = arith.constant 0 : i32
    %c0_i32_0 = arith.constant 0 : i32
    %c0_i32_1 = arith.constant 0 : i32
    return %c0_i32, %c0_i32_0 : i32, i32
  }
  func.func @transform_4(%arg0: i32, %arg1: memref<2x8xi32, #tpu.memory_space<smem>>) -> (i32, i32) {
    %c0_i32 = arith.constant 0 : i32
    %c0_i32_0 = arith.constant 0 : i32
    %c0_i32_1 = arith.constant 0 : i32
    return %c0_i32, %c0_i32_0 : i32, i32
  }
  func.func @transform_5(%arg0: i32, %arg1: memref<2x8xi32, #tpu.memory_space<smem>>) -> (i32, i32) {
    %c0_i32 = arith.constant 0 : i32
    %c0_i32_0 = arith.constant 0 : i32
    %c0_i32_1 = arith.constant 0 : i32
    return %c0_i32, %c0_i32_0 : i32, i32
  }
  func.func @transform_6(%arg0: i32, %arg1: memref<2x8xi32, #tpu.memory_space<smem>>) -> (i32, i32) {
    %c0_i32 = arith.constant 0 : i32
    %c0_i32_0 = arith.constant 0 : i32
    %c0_i32_1 = arith.constant 0 : i32
    return %c0_i32, %c0_i32_0 : i32, i32
  }
  func.func @transform_7(%arg0: i32, %arg1: memref<2x8xi32, #tpu.memory_space<smem>>) -> (i32, i32) {
    %c0_i32 = arith.constant 0 : i32
    %c0_i32_0 = arith.constant 0 : i32
    %c0_i32_1 = arith.constant 0 : i32
    return %c0_i32, %c0_i32_0 : i32, i32
  }
}

</mosaic_0001>

<bundles_post_ra>
// kernel: bigram_forward.1
= control target key start
LH: loop header
LB: loop body
LE: loop exit
PB: predicated region body
PF: predicated region fallthrough
CT: control target
= control target key end

     0   :  { %s3785_s30 = smov [#allocation6]   ;;  %s5456_s0 = inlined_call_operand.vmem [shape: s32[2,8], index: 0, kind: input, shape index: {}]   ;;  %s5457_s1 = inlined_call_operand.vmem [shape: f32[128,128], index: 1, kind: input, shape index: {}]   ;;  %s5458_s2 = inlined_call_operand.vmem [shape: bf16[128,384], index: 2, kind: input, shape index: {}]   ;;  %s5459_s3 = inlined_call_operand.vmem [shape: bf16[128,384], index: 3, kind: input, shape index: {}]   ;;  %s5460_s4 = inlined_call_operand.vmem [shape: f32[1,384], index: 4, kind: input, shape index: {}]   ;;  %s5461_s5 = inlined_call_operand.vmem [shape: f32[1,128], index: 5, kind: input, shape index: {}]   ;;  %s5462_s6 = inlined_call_operand.vmem [shape: bf16[128,128], index: 6, kind: input, shape index: {}]   ;;  %s5463_s7 = inlined_call_operand.vmem [shape: f32[1,128], index: 7, kind: input, shape index: {}]   ;;  %s5464_s8 = inlined_call_operand.vmem [shape: f32[16,128], index: 8, kind: output, shape index: {}]  }
   0x1   :  { %s14_s29 = sshll.u32 %s5456_s0, 4  ;;  %s15_s29 = int_to_ptr.vmem [resolvable:$true] %s14_s29 }
   0x2   :  { %17 = dma.vmem_to_smem %s15_s29, 32, %s3785_s30, [#allocation5] }
   0x3   :  { %3783 = dma.done.wait [#allocation5], 32 }
   0x4   :  { %3784 = vsyncadd [#allocation5], 4294967264 }
   0x5   :  { %20 = sfence }
   0x6   :  { %v2636_v0 = vld [vmem:[%s5458_s2 + $0xa8] sm:$0xf]  ;;  %v3484_v1 = vld [vmem:[%s5458_s2 + $0xb0] sm:$0xf0]  ;;  %v2624_v2 = vld [vmem:[%s5458_s2 + $0x90] sm:$0xf] }
   0x7   :  { %v2637_v3 = vor.u32 %v3484_v1, %v2636_v0  ;;  %v3481_v4 = vld [vmem:[%s5458_s2 + $0x98] sm:$0xf0]  ;;  %v2732_v5 = vld [vmem:[%s5459_s3 + $0xa8] sm:$0xf]  ;;  %v3508_v6 = vld [vmem:[%s5459_s3 + $0xb0] sm:$0xf0] }
   0x8   :  { %v2733_v7 = vor.u32 %v3508_v6, %v2732_v5  ;;  %v2720_v8 = vld [vmem:[%s5459_s3 + $0x90] sm:$0xf]  ;;  %v2625_v9 = vor.u32 %v3481_v4, %v2624_v2  ;;  %v3505_v10 = vld [vmem:[%s5459_s3 + $0x98] sm:$0xf0]  ;;  %v3483_v11 = vld [vmem:[%s5458_s2 + $0xac] sm:$0xf] }
   0x9   :  { %271 = vmatpush.bf16.msra.mxu0 %v2637_v3  ;;  %v2638_v12 = vld [vmem:[%s5458_s2 + $0xb4] sm:$0xf0]  ;;  %v3478_v14 = vld [vmem:[%s5458_s2 + $0x80] sm:$0xf0]  ;;  %v2721_v15 = vor.u32 %v3505_v10, %v2720_v8  ;;  %v3480_v19 = vld [vmem:[%s5458_s2 + $0x94] sm:$0xf] }
   0xa   :  { %483 = vmatpush.bf16.msra.mxu3 %v2733_v7  ;;  %v2612_v13 = vld [vmem:[%s5458_s2 + $0x78] sm:$0xf]  ;;  %v2641_v16 = vor.u32 %v3483_v11, %v2638_v12  ;;  %v3502_v18 = vld [vmem:[%s5459_s3 + $0x80] sm:$0xf0]  ;;  %v2626_v20 = vld [vmem:[%s5458_s2 + $0x9c] sm:$0xf0] }
   0xb   :  { %v2708_v17 = vld [vmem:[%s5459_s3 + $0x78] sm:$0xf]  ;;  %v2629_v21 = vor.u32 %v3480_v19, %v2626_v20  ;;  %v2613_v22 = vor.u32 %v3478_v14, %v2612_v13  ;;  %v3477_v23 = vld [vmem:[%s5458_s2 + $0x7c] sm:$0xf]  ;;  %v2614_v24 = vld [vmem:[%s5458_s2 + $0x84] sm:$0xf0] }
   0xc   :  { %285 = vmatpush.bf16.msra.mxu1 %v2641_v16  ;;  %v2600_v25 = vld [vmem:[%s5458_s2 + $0x60] sm:$0xf]  ;;  %v3475_v26 = vld [vmem:[%s5458_s2 + $0x68] sm:$0xf0]  ;;  %v2709_v27 = vor.u32 %v3502_v18, %v2708_v17  ;;  %v2617_v30 = vor.u32 %v3477_v23, %v2614_v24  ;;  %v2588_v32 = vld [vmem:[%s5458_s2 + $0x48] sm:$0xf] }
   0xd   :  { %272 = vmatpush.bf16.msra.mxu0 %v2625_v9  ;;  %v2696_v28 = vld [vmem:[%s5459_s3 + $0x60] sm:$0xf]  ;;  %v3499_v29 = vld [vmem:[%s5459_s3 + $0x68] sm:$0xf0]  ;;  %v2601_v31 = vor.u32 %v3475_v26, %v2600_v25  ;;  %v3474_v33 = vld [vmem:[%s5458_s2 + $0x64] sm:$0xf] }
   0xe   :  { %484 = vmatpush.bf16.msra.mxu3 %v2721_v15  ;;  %v2602_v34 = vld [vmem:[%s5458_s2 + $0x6c] sm:$0xf0]  ;;  %v3472_v35 = vld [vmem:[%s5458_s2 + $0x50] sm:$0xf0]  ;;  %v2697_v36 = vor.u32 %v3499_v29, %v2696_v28  ;;  %v3485_v38 = vld [vmem:[%s5458_s2 + $0xb8] sm:$0xf0] }
   0xf   :  { %v2644_v37 = vld [vmem:[%s5458_s2 + $0xb0] sm:$0xf]  ;;  %v2684_v39 = vld [vmem:[%s5459_s3 + $0x48] sm:$0xf]  ;;  %v3496_v40 = vld [vmem:[%s5459_s3 + $0x50] sm:$0xf0]  ;;  %v2605_v42 = vor.u32 %v3474_v33, %v2602_v34  ;;  %v2589_v44 = vor.u32 %v3472_v35, %v2588_v32 }
  0x10   :  { %286 = vmatpush.bf16.msra.mxu1 %v2629_v21  ;;  %v2645_v41 = vor.u32 %v3485_v38, %v2644_v37  ;;  %v3471_v43 = vld [vmem:[%s5458_s2 + $0x4c] sm:$0xf]  ;;  %v2590_v45 = vld [vmem:[%s5458_s2 + $0x54] sm:$0xf0]  ;;  %v3482_v47 = vld [vmem:[%s5458_s2 + $0xa0] sm:$0xf0]  ;;  %v2685_v50 = vor.u32 %v3496_v40, %v2684_v39 }
  0x11   :  { %273 = vmatpush.bf16.msra.mxu0 %v2613_v22  ;;  %v2632_v46 = vld [vmem:[%s5458_s2 + $0x98] sm:$0xf]  ;;  %v2576_v48 = vld [vmem:[%s5458_s2 + $0x30] sm:$0xf]  ;;  %v3469_v49 = vld [vmem:[%s5458_s2 + $0x38] sm:$0xf0]  ;;  %v2593_v56 = vor.u32 %v3471_v43, %v2590_v45 }
  0x12   :  { %485 = vmatpush.bf16.msra.mxu3 %v2709_v27  ;;  %299 = vmatpush.bf16.msra.mxu2 %v2645_v41  ;;  %v2633_v51 = vor.u32 %v3482_v47, %v2632_v46  ;;  %s3943_s12 = sld [smem:[#allocation6]]  ;;  %v2672_v52 = vld [vmem:[%s5459_s3 + $0x30] sm:$0xf]  ;;  %v3493_v53 = vld [vmem:[%s5459_s3 + $0x38] sm:$0xf0]  ;;  %v2577_v59 = vor.u32 %v3469_v49, %v2576_v48 }
  0x13   :  { %s3951_s16 = sld [smem:[#allocation6 + $0x80]]  ;;  %v2564_v54 = vld [vmem:[%s5458_s2 + $0x18] sm:$0xf]  ;;  %v3466_v55 = vld [vmem:[%s5458_s2 + $0x20] sm:$0xf0]  ;;  %v2673_v62 = vor.u32 %v3493_v53, %v2672_v52 }
  0x14   :  { %287 = vmatpush.bf16.msra.mxu1 %v2617_v30  ;;  %v3468_v57 = vld [vmem:[%s5458_s2 + $0x34] sm:$0xf]  ;;  %v2578_v58 = vld [vmem:[%s5458_s2 + $0x3c] sm:$0xf0]  ;;  %s3965_s25 = sld [smem:[#allocation6 + $0x1]]  ;;  %v2565_v8 = vor.u32 %v3466_v55, %v2564_v54 }
  0x15   :  { %274 = vmatpush.bf16.msra.mxu0 %v2601_v31  ;;  %s3967_s26 = sld [smem:[#allocation6 + $0x81]]  ;;  %v2620_v60 = vld [vmem:[%s5458_s2 + $0x80] sm:$0xf]  ;;  %v3479_v61 = vld [vmem:[%s5458_s2 + $0x88] sm:$0xf0]  ;;  %v2581_v6 = vor.u32 %v3468_v57, %v2578_v58 }
  0x16   :  { %486 = vmatpush.bf16.msra.mxu3 %v2697_v36  ;;  %300 = vmatpush.bf16.msra.mxu2 %v2633_v51  ;;  %v2660_v63 = vld [vmem:[%s5459_s3 + $0x18] sm:$0xf]  ;;  %v3490_v0 = vld [vmem:[%s5459_s3 + $0x20] sm:$0xf0]  ;;  %s3981_s14 = sld [smem:[#allocation6 + $0x2]]  ;;  %v2621_v1 = vor.u32 %v3479_v61, %v2620_v60 }
  0x17   :  { %s3983_s0 = sld [smem:[#allocation6 + $0x82]]  ;;  %v3988_v2 = vld [vmem:[%s5458_s2 + $0x1c] sm:$0xf]  ;;  %v2566_v3 = vld [vmem:[%s5458_s2 + $0x24] sm:$0xf0]  ;;  %v2661_v15 = vor.u32 %v3490_v0, %v2660_v63 }
  0x18   :  { %288 = vmatpush.bf16.msra.mxu1 %v2605_v42  ;;  %v2552_v4 = vld [vmem:[%s5458_s2] sm:$0xf]  ;;  %v3463_v5 = vld [vmem:[%s5458_s2 + $0x8] sm:$0xf0]  ;;  %s37_s28 = scalar_lea.vmem %s5457_s1, %s3943_s12  ;;  %s4003_s29 = sld [smem:[#allocation6 + $0x3]]  ;;  %v2569_v22 = vor.u32 %v3988_v2, %v2566_v3 }
  0x19   :  { %275 = vmatpush.bf16.msra.mxu0 %v2589_v44  ;;  %v2608_v7 = vld [vmem:[%s5458_s2 + $0x68] sm:$0xf]  ;;  %v3507_v9 = vld [vmem:[%s5459_s3 + $0xac] sm:$0xf]  ;;  %v2734_v10 = vld [vmem:[%s5459_s3 + $0xb4] sm:$0xf0]  ;;  %s41_s18 = scalar_lea.vmem %s5457_s1, %s3951_s16  ;;  %v2553_v23 = vor.u32 %v3463_v5, %v2552_v4 }
  0x1a   :  { %487 = vmatpush.bf16.msra.mxu3 %v2685_v50  ;;  %v38_v11 = vld [vmem:[%s37_s28] sm:$0x1]  ;;  %s4018_s19 = sld [smem:[#allocation6 + $0x83]]  ;;  %v3487_v13 = vld [vmem:[%s5459_s3 + $0x8] sm:$0xf0]  ;;  %301 = vmatpush.bf16.msra.mxu2 %v2621_v1  ;;  %s45_s30 = scalar_lea.vmem %s5457_s1, %s3965_s25  ;;  %v2737_v27 = vor.u32 %v3507_v9, %v2734_v10  ;;  %v3786_v44 = vmov 0  }
  0x1b   :  { %v2648_v12 = vld [vmem:[%s5459_s3] sm:$0xf]  ;;  %v3476_v14 = vld [vmem:[%s5458_s2 + $0x70] sm:$0xf0]  ;;  %39 = vst [vmem:[#allocation2] sm:$0x1] %v38_v11  ;;  %s49_s13 = scalar_lea.vmem %s5457_s1, %s3967_s26 }
  0x1c   :  { %289 = vmatpush.bf16.msra.mxu1 %v2593_v56  ;;  %v42_v16 = vld [vmem:[%s41_s18] sm:$0x1]  ;;  %s4033_s9 = sld [smem:[#allocation6 + $0x4]]  ;;  %v2609_v17 = vor.u32 %v3476_v14, %v2608_v7  ;;  %v3462_v19 = vld [vmem:[%s5458_s2 + $0x4] sm:$0xf]  ;;  %s53_s22 = scalar_lea.vmem %s5457_s1, %s3981_s14  ;;  %v2649_v29 = vor.u32 %v3487_v13, %v2648_v12 }
  0x1d   :  { %276 = vmatpush.bf16.msra.mxu0 %v2577_v59  ;;  %43 = vst [vmem:[#allocation2 + $0x1] sm:$0x1] %v42_v16  ;;  %v46_v18 = vld [vmem:[%s45_s30] sm:$0x1]  ;;  %s4039_s15 = sld [smem:[#allocation6 + $0x84]]  ;;  %s57_s27 = scalar_lea.vmem %s5457_s1, %s3983_s0 }
  0x1e   :  { %488 = vmatpush.bf16.msra.mxu3 %v2673_v62  ;;  %v2554_v20 = vld [vmem:[%s5458_s2 + $0xc] sm:$0xf0]  ;;  %47 = vst [vmem:[#allocation2 + $0x2] sm:$0x1] %v46_v18  ;;  %v50_v21 = vld [vmem:[%s49_s13] sm:$0x1]  ;;  %302 = vmatpush.bf16.msra.mxu2 %v2609_v17  ;;  %s61_s0 = scalar_lea.vmem %s5457_s1, %s4003_s29 }
  0x1f   :  { %s4051_s23 = sld [smem:[#allocation6 + $0x5]]  ;;  %51 = vst [vmem:[#allocation2 + $0x3] sm:$0x1] %v50_v21  ;;  %v54_v24 = vld [vmem:[%s53_s22] sm:$0x1]  ;;  %v2557_v32 = vor.u32 %v3462_v19, %v2554_v20 }
  0x20   :  { %290 = vmatpush.bf16.msra.mxu1 %v2581_v6  ;;  %s4058_s16 = sld [smem:[#allocation6 + $0x85]]  ;;  %v3504_v25 = vld [vmem:[%s5459_s3 + $0x94] sm:$0xf]  ;;  %v2722_v26 = vld [vmem:[%s5459_s3 + $0x9c] sm:$0xf0]  ;;  %s65_s20 = scalar_lea.vmem %s5457_s1, %s4018_s19 }
  0x21   :  { %277 = vmatpush.bf16.msra.mxu0 %v2565_v8  ;;  %55 = vst [vmem:[#allocation2 + $0x4] sm:$0x1] %v54_v24  ;;  %v58_v28 = vld [vmem:[%s57_s27] sm:$0x1]  ;;  %s4070_s17 = sld [smem:[#allocation6 + $0x6]]  ;;  %v2725_v37 = vor.u32 %v3504_v25, %v2722_v26 }
  0x22   :  { %489 = vmatpush.bf16.msra.mxu3 %v2661_v15  ;;  %59 = vst [vmem:[#allocation2 + $0x5] sm:$0x1] %v58_v28  ;;  %v62_v30 = vld [vmem:[%s61_s0] sm:$0x1]  ;;  %s4076_s25 = sld [smem:[#allocation6 + $0x86]]  ;;  %s69_s26 = scalar_lea.vmem %s5457_s1, %s4033_s9 }
  0x23   :  { %63 = vst [vmem:[#allocation2 + $0x6] sm:$0x1] %v62_v30  ;;  %v66_v31 = vld [vmem:[%s65_s20] sm:$0x1]  ;;  %s4082_s29 = sld [smem:[#allocation6 + $0x7]]  ;;  %s73_s19 = scalar_lea.vmem %s5457_s1, %s4039_s15 }
  0x24   :  { %291 = vmatpush.bf16.msra.mxu1 %v2569_v22  ;;  %67 = vst [vmem:[#allocation2 + $0x7] sm:$0x1] %v66_v31  ;;  %v70_v33 = vld [vmem:[%s69_s26] sm:$0x1]  ;;  %s4088_s28 = sld [smem:[#allocation6 + $0x87]] }
  0x25   :  { %278 = vmatpush.bf16.msra.mxu0 %v2553_v23  ;;  %v3501_v34 = vld [vmem:[%s5459_s3 + $0x7c] sm:$0xf]  ;;  %v2710_v35 = vld [vmem:[%s5459_s3 + $0x84] sm:$0xf0]  ;;  %71 = vst [vmem:[#allocation2 + $0x8] sm:$0x1] %v70_v33  ;;  %s77_s0 = scalar_lea.vmem %s5457_s1, %s4051_s23 }
  0x26   :  { %v74_v36 = vld [vmem:[%s73_s19] sm:$0x1]  ;;  %490 = vmatpush.bf16.msra.mxu3 %v2649_v29  ;;  %v2740_v38 = vld [vmem:[%s5459_s3 + $0xb0] sm:$0xf]  ;;  %s81_s21 = scalar_lea.vmem %s5457_s1, %s4058_s16  ;;  %v3509_v40 = vld [vmem:[%s5459_s3 + $0xb8] sm:$0xf0]  ;;  %v2713_v48 = vor.u32 %v3501_v34, %v2710_v35 }
  0x27   :  { %75 = vst [vmem:[#allocation2 + $0x9] sm:$0x1] %v74_v36  ;;  %v78_v39 = vld [vmem:[%s77_s0] sm:$0x1]  ;;  %s85_s27 = scalar_lea.vmem %s5457_s1, %s4070_s17  ;;  %v2741_v42 = vor.u32 %v3509_v40, %v2740_v38  ;;  %v3498_v45 = vld [vmem:[%s5459_s3 + $0x64] sm:$0xf] }
  0x28   :  { %79 = vst [vmem:[#allocation2 + $0xa] sm:$0x1] %v78_v39  ;;  %v82_v41 = vld [vmem:[%s81_s21] sm:$0x1]  ;;  %292 = vmatpush.bf16.msra.mxu1 %v2557_v32  ;;  %s89_s16 = scalar_lea.vmem %s5457_s1, %s4076_s25  ;;  %v2698_v46 = vld [vmem:[%s5459_s3 + $0x6c] sm:$0xf0] }
  0x29   :  { %496 = vmatpush.bf16.msrb.mxu0 %v2737_v27  ;;  %83 = vst [vmem:[#allocation2 + $0xb] sm:$0x1] %v82_v41  ;;  %v86_v43 = vld [vmem:[%s85_s27] sm:$0x1]  ;;  %491 = vmatmul.bf16.vlgmr.msra.gmra.mxu3 %v3786_v44  ;;  %s93_s0 = scalar_lea.vmem %s5457_s1, %s4082_s29  ;;  %v2596_v49 = vld [vmem:[%s5458_s2 + $0x50] sm:$0xf]  ;;  %v2701_v56 = vor.u32 %v3498_v45, %v2698_v46 }
  0x2a   :  { %87 = vst [vmem:[#allocation2 + $0xc] sm:$0x1] %v86_v43  ;;  %v90_v47 = vld [vmem:[%s89_s16] sm:$0x1]  ;;  %s97_s20 = scalar_lea.vmem %s5457_s1, %s4088_s28  ;;  %v3473_v51 = vld [vmem:[%s5458_s2 + $0x58] sm:$0xf0] }
  0x2b   :  { %91 = vst [vmem:[#allocation2 + $0xd] sm:$0x1] %v90_v47  ;;  %v94_v50 = vld [vmem:[%s93_s0] sm:$0x1]  ;;  %v2597_v53 = vor.u32 %v3473_v51, %v2596_v49  ;;  %v2728_v54 = vld [vmem:[%s5459_s3 + $0x98] sm:$0xf] }
  0x2c   :  { %509 = vmatpush.bf16.msrb.mxu1 %v2741_v42  ;;  %95 = vst [vmem:[#allocation2 + $0xe] sm:$0x1] %v94_v50  ;;  %v98_v52 = vld [vmem:[%s97_s20] sm:$0x1]  ;;  %v3506_v55 = vld [vmem:[%s5459_s3 + $0xa0] sm:$0xf0] }
  0x2d   :  { %497 = vmatpush.bf16.msrb.mxu0 %v2725_v37  ;;  %99 = vst [vmem:[#allocation2 + $0xf] sm:$0x1] %v98_v52  ;;  %303 = vmatpush.bf16.msra.mxu2 %v2597_v53  ;;  %v2729_v57 = vor.u32 %v3506_v55, %v2728_v54  ;;  %v3495_v58 = vld [vmem:[%s5459_s3 + $0x4c] sm:$0xf]  ;;  %v2686_v59 = vld [vmem:[%s5459_s3 + $0x54] sm:$0xf0] }
  0x2e   :  { %v2584_v60 = vld [vmem:[%s5458_s2 + $0x38] sm:$0xf]  ;;  %v3470_v61 = vld [vmem:[%s5458_s2 + $0x40] sm:$0xf0]  ;;  %v2716_v62 = vld [vmem:[%s5459_s3 + $0x80] sm:$0xf]  ;;  %v2689_v7 = vor.u32 %v3495_v58, %v2686_v59 }
  0x2f   :  { %v3503_v63 = vld [vmem:[%s5459_s3 + $0x88] sm:$0xf0]  ;;  %v2585_v0 = vor.u32 %v3470_v61, %v2584_v60  ;;  %v2572_v2 = vld [vmem:[%s5458_s2 + $0x20] sm:$0xf]  ;;  %v2704_v4 = vld [vmem:[%s5459_s3 + $0x68] sm:$0xf] }
  0x30   :  { %510 = vmatpush.bf16.msrb.mxu1 %v2729_v57  ;;  %v2717_v1 = vor.u32 %v3503_v63, %v2716_v62  ;;  %v3467_v3 = vld [vmem:[%s5458_s2 + $0x28] sm:$0xf0]  ;;  %v3500_v5 = vld [vmem:[%s5459_s3 + $0x70] sm:$0xf0]  ;;  %v100_v6 = vld [vmem:[#allocation2] sm:$0xff] }
  0x31   :  { %498 = vmatpush.bf16.msrb.mxu0 %v2713_v48  ;;  %304 = vmatpush.bf16.msra.mxu2 %v2585_v0  ;;  %v3492_v8 = vld [vmem:[%s5459_s3 + $0x34] sm:$0xf]  ;;  %v2573_v9 = vor.u32 %v3467_v3, %v2572_v2  ;;  %v2674_v10 = vld [vmem:[%s5459_s3 + $0x3c] sm:$0xf0]  ;;  %v2560_v11 = vld [vmem:[%s5458_s2 + $0x8] sm:$0xf]  ;;  %v2705_v14 = vor.u32 %v3500_v5, %v2704_v4 }
  0x32   :  { %v3464_v12 = vld [vmem:[%s5458_s2 + $0x10] sm:$0xf0]  ;;  %v2692_v16 = vld [vmem:[%s5459_s3 + $0x50] sm:$0xf]  ;;  %v3497_v17 = vld [vmem:[%s5459_s3 + $0x58] sm:$0xf0]  ;;  %v2677_v18 = vor.u32 %v3492_v8, %v2674_v10 }
  0x33   :  { %v3489_v19 = vld [vmem:[%s5459_s3 + $0x1c] sm:$0xf]  ;;  %v2561_v20 = vor.u32 %v3464_v12, %v2560_v11  ;;  %v2662_v21 = vld [vmem:[%s5459_s3 + $0x24] sm:$0xf0]  ;;  %v2693_v22 = vor.u32 %v3497_v17, %v2692_v16  ;;  %v2680_v23 = vld [vmem:[%s5459_s3 + $0x38] sm:$0xf] }
  0x34   :  { %v101_v13 = vld [vmem:[#allocation2 + $0x8] sm:$0xff]  ;;  %511 = vmatpush.bf16.msrb.mxu1 %v2717_v1  ;;  %v3494_v24 = vld [vmem:[%s5459_s3 + $0x40] sm:$0xf0]  ;;  %v2665_v25 = vor.u32 %v3489_v19, %v2662_v21  ;;  %v2650_v27 = vld [vmem:[%s5459_s3 + $0xc] sm:$0xf0] }
  0x35   :  { %499 = vmatpush.bf16.msrb.mxu0 %v2701_v56  ;;  %v102_v15 = vpack.c.bf16 %v101_v13, %v100_v6  ;;  %305 = vmatpush.bf16.msra.mxu2 %v2573_v9  ;;  %v3486_v26 = vld [vmem:[%s5459_s3 + $0x4] sm:$0xf]  ;;  %v2681_v28 = vor.u32 %v3494_v24, %v2680_v23  ;;  %v2668_v29 = vld [vmem:[%s5459_s3 + $0x20] sm:$0xf]  ;;  %v3491_v30 = vld [vmem:[%s5459_s3 + $0x28] sm:$0xf0] }
  0x36   :  { %v2653_v31 = vor.u32 %v3486_v26, %v2650_v27  ;;  %v2669_v32 = vor.u32 %v3491_v30, %v2668_v29  ;;  %v2656_v33 = vld [vmem:[%s5459_s3 + $0x8] sm:$0xf]  ;;  %v3488_v34 = vld [vmem:[%s5459_s3 + $0x10] sm:$0xf0]  ;;  %v4228_v37 = vld [vmem:[%s5460_s4] sm:$0x7] }
  0x37   :  { %279 = vmatmul.bf16.vlgmr.msra.gmra.mxu0 %v102_v15  ;;  %293 = vmatmul.bf16.vlgmr.msra.gmra.mxu1 %v102_v15  ;;  %v2657_v35 = vor.u32 %v3488_v34, %v2656_v33  ;;  %v137_v38 = vperm.slane %v4228_v37, 0  ;;  %v138_v39 = vperm.slane %v4228_v37, 1  ;;  %v2830_v46 = vld [vmem:[%s5459_s3 + $0xa8] sm:$0xf]  ;;  %v3531_v47 = vld [vmem:[%s5459_s3 + $0xac] sm:$0xf] }
  0x38   :  { %512 = vmatpush.bf16.msrb.mxu1 %v2705_v14  ;;  %v2832_v49 = vld [vmem:[%s5459_s3 + $0xb4] sm:$0xf0]  ;;  %v2838_v50 = vld [vmem:[%s5459_s3 + $0xb0] sm:$0xf]  ;;  %v3533_v52 = vld [vmem:[%s5459_s3 + $0xb8] sm:$0xf0] }
  0x39   :  { %500 = vmatpush.bf16.msrb.mxu0 %v2689_v7  ;;  %306 = vmatpush.bf16.msra.mxu2 %v2561_v20  ;;  %v2835_v51 = vor.u32 %v3531_v47, %v2832_v49  ;;  %v2839_v53 = vor.u32 %v3533_v52, %v2838_v50  ;;  %v2818_v54 = vld [vmem:[%s5459_s3 + $0x90] sm:$0xf]  ;;  %v3529_v55 = vld [vmem:[%s5459_s3 + $0x98] sm:$0xf0]  ;;  %v3528_v56 = vld [vmem:[%s5459_s3 + $0x94] sm:$0xf] }
  0x3a   :  { %v2819_v57 = vor.u32 %v3529_v55, %v2818_v54  ;;  %v2820_v58 = vld [vmem:[%s5459_s3 + $0x9c] sm:$0xf0]  ;;  %v2826_v59 = vld [vmem:[%s5459_s3 + $0x98] sm:$0xf]  ;;  %v3530_v60 = vld [vmem:[%s5459_s3 + $0xa0] sm:$0xf0] }
  0x3b   :  { %751 = vmatpush.bf16.msrb.mxu3 %v2835_v51  ;;  %v2823_v63 = vor.u32 %v3528_v56, %v2820_v58  ;;  %v2827_v0 = vor.u32 %v3530_v60, %v2826_v59  ;;  %v139_v3 = vperm.slane %v4228_v37, 2  ;;  %v2806_v5 = vld [vmem:[%s5459_s3 + $0x78] sm:$0xf]  ;;  %v3526_v6 = vld [vmem:[%s5459_s3 + $0x80] sm:$0xf0] }
  0x3c   :  { %513 = vmatpush.bf16.msrb.mxu1 %v2693_v22  ;;  %307 = vmatmul.bf16.vlgmr.msra.gmra.mxu2 %v102_v15  ;;  %v2807_v8 = vor.u32 %v3526_v6, %v2806_v5  ;;  %v3525_v9 = vld [vmem:[%s5459_s3 + $0x7c] sm:$0xf]  ;;  %v2808_v12 = vld [vmem:[%s5459_s3 + $0x84] sm:$0xf0]  ;;  %v2814_v13 = vld [vmem:[%s5459_s3 + $0x80] sm:$0xf] }
  0x3d   :  { %501 = vmatpush.bf16.msrb.mxu0 %v2677_v18  ;;  %v2811_v16 = vor.u32 %v3525_v9, %v2808_v12  ;;  %v3527_v17 = vld [vmem:[%s5459_s3 + $0x88] sm:$0xf0]  ;;  %v2794_v18 = vld [vmem:[%s5459_s3 + $0x60] sm:$0xf]  ;;  %v3522_v21 = vld [vmem:[%s5459_s3 + $0x64] sm:$0xf] }
  0x3e   :  { %v2815_v19 = vor.u32 %v3527_v17, %v2814_v13  ;;  %v3523_v20 = vld [vmem:[%s5459_s3 + $0x68] sm:$0xf0]  ;;  %v2796_v22 = vld [vmem:[%s5459_s3 + $0x6c] sm:$0xf0]  ;;  %v3524_v26 = vld [vmem:[%s5459_s3 + $0x70] sm:$0xf0] }
  0x3f   :  { %752 = vmatpush.bf16.msrb.mxu3 %v2823_v63  ;;  %v2795_v23 = vor.u32 %v3523_v20, %v2794_v18  ;;  %v2799_v24 = vor.u32 %v3522_v21, %v2796_v22  ;;  %v2782_v29 = vld [vmem:[%s5459_s3 + $0x48] sm:$0xf]  ;;  %v3520_v30 = vld [vmem:[%s5459_s3 + $0x50] sm:$0xf0]  ;;  %v2784_v34 = vld [vmem:[%s5459_s3 + $0x54] sm:$0xf0] }
  0x40   :  { %514 = vmatpush.bf16.msrb.mxu1 %v2681_v28  ;;  %v2783_v33 = vor.u32 %v3520_v30, %v2782_v29  ;;  %v2770_v37 = vld [vmem:[%s5459_s3 + $0x30] sm:$0xf]  ;;  %v2778_v49 = vld [vmem:[%s5459_s3 + $0x38] sm:$0xf]  ;;  %v3518_v50 = vld [vmem:[%s5459_s3 + $0x40] sm:$0xf0] }
  0x41   :  { %502 = vmatpush.bf16.msrb.mxu0 %v2665_v25  ;;  %v2802_v25 = vld [vmem:[%s5459_s3 + $0x68] sm:$0xf]  ;;  %v2758_v52 = vld [vmem:[%s5459_s3 + $0x18] sm:$0xf]  ;;  %v2779_v56 = vor.u32 %v3518_v50, %v2778_v49  ;;  %v2766_v60 = vld [vmem:[%s5459_s3 + $0x20] sm:$0xf] }
  0x42   :  { %v2803_v28 = vor.u32 %v3524_v26, %v2802_v25  ;;  %v2760_v58 = vld [vmem:[%s5459_s3 + $0x24] sm:$0xf0]  ;;  %v3511_v63 = vld [vmem:[%s5459_s3 + $0x8] sm:$0xf0]  ;;  %v3510_v5 = vld [vmem:[%s5459_s3 + $0x4] sm:$0xf] }
  0x43   :  { %753 = vmatpush.bf16.msrb.mxu3 %v2811_v16  ;;  %v2748_v6 = vld [vmem:[%s5459_s3 + $0xc] sm:$0xf0]  ;;  %v3512_v9 = vld [vmem:[%s5459_s3 + $0x10] sm:$0xf0]  ;;  %v2928_v50 = vld [vmem:[%s5459_s3 + $0xa8] sm:$0xf] }
  0x44   :  { %515 = vmatpush.bf16.msrb.mxu1 %v2669_v32  ;;  %v2751_v12 = vor.u32 %v3510_v5, %v2748_v6 }
  0x45   :  { %503 = vmatpush.bf16.msrb.mxu0 %v2653_v31  ;;  %v3519_v31 = vld [vmem:[%s5459_s3 + $0x4c] sm:$0xf] }
  0x47   :  { %754 = vmatpush.bf16.msrb.mxu3 %v2799_v24 }
  0x48   :  { %504 = vmatmul.bf16.vlgmr.msrb.gmra.mxu0 %v3786_v44  ;;  %516 = vmatpush.bf16.msrb.mxu1 %v2657_v35  ;;  %v2790_v35 = vld [vmem:[%s5459_s3 + $0x50] sm:$0xf] }
  0x49   :  { %764 = vmatpush.bf16.msra.mxu0 %v2839_v53  ;;  %v3514_v53 = vld [vmem:[%s5459_s3 + $0x20] sm:$0xf0] }
  0x4a   :  { %v2759_v59 = vor.u32 %v3514_v53, %v2758_v52  ;;  %v3555_v53 = vld [vmem:[%s5459_s3 + $0xac] sm:$0xf] }
  0x4b   :  { %517 = vmatmul.bf16.vlgmr.msrb.gmra.mxu1 %v3786_v44  ;;  %v3532_v44 = vld [vmem:[%s5459_s3 + $0xb0] sm:$0xf0] }
  0x4c   :  { %v2831_v48 = vor.u32 %v3532_v44, %v2830_v46  ;;  %v2772_v46 = vld [vmem:[%s5459_s3 + $0x3c] sm:$0xf0] }
  0x4d   :  { %765 = vmatpush.bf16.msra.mxu0 %v2827_v0 }
  0x4e   :  { %738 = vmatpush.bf16.msrb.mxu2 %v2831_v48 }
  0x51   :  { %766 = vmatpush.bf16.msra.mxu0 %v2815_v19 }
  0x52   :  { %739 = vmatpush.bf16.msrb.mxu2 %v2819_v57  ;;  %v3513_v57 = vld [vmem:[%s5459_s3 + $0x1c] sm:$0xf] }
  0x55   :  { %767 = vmatpush.bf16.msra.mxu0 %v2803_v28 }
  0x56   :  { %740 = vmatpush.bf16.msrb.mxu2 %v2807_v8  ;;  %v2754_v8 = vld [vmem:[%s5459_s3 + $0x8] sm:$0xf] }
  0x57   :  { %v2755_v13 = vor.u32 %v3512_v9, %v2754_v8  ;;  %v2904_v9 = vld [vmem:[%s5459_s3 + $0x78] sm:$0xf] }
  0x5a   :  { %741 = vmatpush.bf16.msrb.mxu2 %v2795_v23 }
  0x5e   :  { %742 = vmatpush.bf16.msrb.mxu2 %v2783_v33 }
  0xac   :  { %v492_v36 = vpop.f32.mrf.mxu3 }
  0xb4   :  { %v280_v40 = vpop.f32.mrf.mxu0  ;;  %v294_v41 = vpop.f32.mrf.mxu1 }
  0xb5   :  { %v281_v42 = vadd.f32 %v280_v40, %v137_v38  ;;  %v295_v43 = vadd.f32 %v294_v41, %v138_v39  ;;  %v494_v45 = vpop.f32.mrf.mxu3  ;;  %v2787_v40 = vor.u32 %v3519_v31, %v2784_v34 }
  0xb6   :  { %v3516_v45 = vld [vmem:[%s5459_s3 + $0x34] sm:$0xf] }
  0xb7   :  { %313 = vst [vmem:[#allocation3 + $0x28] sm:$0xff] %v281_v42  ;;  %755 = vmatpush.bf16.msrb.mxu3 %v2787_v40  ;;  %v2775_v54 = vor.u32 %v3516_v45, %v2772_v46 }
  0xb8   :  { %314 = vst [vmem:[#allocation3 + $0x10] sm:$0xff] %v295_v43 }
  0xbb   :  { %756 = vmatpush.bf16.msrb.mxu3 %v2775_v54  ;;  %v2930_v54 = vld [vmem:[%s5459_s3 + $0xb4] sm:$0xf0] }
  0xbc   :  { %v282_v61 = vpop.f32.mrf.mxu0  ;;  %v296_v62 = vpop.f32.mrf.mxu1 }
  0xbd   :  { %v283_v1 = vadd.f32 %v282_v61, %v137_v38  ;;  %v297_v2 = vadd.f32 %v296_v62, %v138_v39  ;;  %v3517_v38 = vld [vmem:[%s5459_s3 + $0x38] sm:$0xf0]  ;;  %v3515_v61 = vld [vmem:[%s5459_s3 + $0x28] sm:$0xf0]  ;;  %v2746_v62 = vld [vmem:[%s5459_s3] sm:$0xf] }
  0xbe   :  { %v320_v4 = vld [vmem:[#allocation3 + $0x28] sm:$0x3]  ;;  %v2771_v48 = vor.u32 %v3517_v38, %v2770_v37  ;;  %v574_v45 = vld [vmem:[#allocation3 + $0x28] sm:$0xc] }
  0xbf   :  { %316 = vst [vmem:[#allocation3] sm:$0xff] %v283_v1  ;;  %v522_v7 = vadd.f32 %v492_v36, %v320_v4  ;;  %v321_v10 = vld [vmem:[#allocation3 + $0x10] sm:$0x3]  ;;  %v308_v11 = vpop.f32.mrf.mxu2  ;;  %v3521_v36 = vld [vmem:[%s5459_s3 + $0x58] sm:$0xf0]  ;;  %v2763_v1 = vor.u32 %v3513_v57, %v2760_v58  ;;  %v2767_v4 = vor.u32 %v3515_v61, %v2766_v60 }
  0xc0   :  { %317 = vst [vmem:[#allocation3 + $0x18] sm:$0xff] %v297_v2  ;;  %v309_v15 = vadd.f32 %v308_v11, %v139_v3  ;;  %v2791_v43 = vor.u32 %v3521_v36, %v2790_v35  ;;  %743 = vmatpush.bf16.msrb.mxu2 %v2771_v48  ;;  %v3557_v60 = vld [vmem:[%s5459_s3 + $0xb8] sm:$0xf0]  ;;  %v2916_v61 = vld [vmem:[%s5459_s3 + $0x90] sm:$0xf] }
  0xc1   :  { %v2742_v14 = vmul.f32 -1.442695, %v522_v7  ;;  %v2747_v7 = vor.u32 %v3511_v63, %v2746_v62  ;;  %757 = vmatpush.bf16.msrb.mxu3 %v2763_v1  ;;  %v3553_v62 = vld [vmem:[%s5459_s3 + $0x98] sm:$0xf0]  ;;  %v3552_v1 = vld [vmem:[%s5459_s3 + $0x94] sm:$0xf] }
  0xc2   :  { %315 = vst [vmem:[#allocation3 + $0x8] sm:$0xff] %v309_v15  ;;  %768 = vmatpush.bf16.msra.mxu0 %v2791_v43  ;;  %v4382_v15 = vld [vmem:[%s5461_s5] ss:$0 sm:$0xff] }
  0xc3   :  { %3690 = vpow2.f32 %v2742_v14 }
  0xc4   :  { %744 = vmatpush.bf16.msrb.mxu2 %v2759_v59  ;;  %v2933_v59 = vor.u32 %v3555_v53, %v2930_v54  ;;  %v2856_v53 = vld [vmem:[%s5459_s3 + $0x18] sm:$0xf]  ;;  %v3538_v54 = vld [vmem:[%s5459_s3 + $0x20] sm:$0xf0] }
  0xc5   :  { %v505_v27 = vpop.f32.mrf.mxu0  ;;  %758 = vmatpush.bf16.msrb.mxu3 %v2751_v12  ;;  %v2906_v12 = vld [vmem:[%s5459_s3 + $0x84] sm:$0xf0] }
  0xc6   :  { %v542_v32 = vadd.f32 %v505_v27, %v321_v10  ;;  %769 = vmatpush.bf16.msra.mxu0 %v2779_v56 }
  0xc7   :  { %v310_v42 = vpop.f32.mrf.mxu2 }
  0xc8   :  { %v2743_v39 = vmul.f32 -1.442695, %v542_v32  ;;  %v4329_v41 = vpop.f32.mrf.mxu1  ;;  %v311_v47 = vadd.f32 %v310_v42, %v139_v3  ;;  %745 = vmatpush.bf16.msrb.mxu2 %v2747_v7  ;;  %v3554_v7 = vld [vmem:[%s5459_s3 + $0xa0] sm:$0xf0] }
  0xc9   :  { %v3691_v44 = vpop.eup %3690  ;;  %v565_v22 = vadd.f32 %v4382_v15, %v4329_v41  ;;  %v322_v27 = vld [vmem:[#allocation3 + $0x8] sm:$0x3] }
  0xca   :  { %3692 = vpow2.f32 %v2743_v39  ;;  %v526_v51 = vadd.f32 1.0, %v3691_v44  ;;  %318 = vst [vmem:[#allocation3 + $0x20] sm:$0xff] %v311_v47  ;;  %770 = vmatpush.bf16.msra.mxu0 %v2767_v4  ;;  %v575_v44 = vld [vmem:[#allocation3 + $0x10] sm:$0xc] }
  0xcc   :  { %3694 = vrcp.f32 %v526_v51  ;;  %v538_v16 = vand.u32 2147483648, %v526_v51  ;;  %vm532_vm0 = vweird.f32 %v526_v51  ;;  %v536_v18 = vand.u32 2147483647, %v526_v51  ;;  %1018 = vmatpush.bf16.msra.mxu2 %v2933_v59 }
  0xcd   :  { %v507_v55 = vpop.f32.mrf.mxu0 }
  0xce   :  { %771 = vmatpush.bf16.msra.mxu0 %v2755_v13  ;;  %v539_v23 = vor.u32 1.1754944e-38, %v538_v16  ;;  %vm537_vm3 = vcmp.eq.f32.partialorder %v536_v18, 8.507059e+37  ;;  %v2936_v55 = vld [vmem:[%s5459_s3 + $0xb0] sm:$0xf]  ;;  %v2912_v13 = vld [vmem:[%s5459_s3 + $0x80] sm:$0xf] }
  0xcf   :  { %v2937_v63 = vor.u32 %v3557_v60, %v2936_v55 }
  0xd0   :  { %v3693_v0 = vpop.eup %3692  ;;  %v520_v3 = vpop.f32.mrf.mxu1 }
  0xd1   :  { %v546_v2 = vadd.f32 1.0, %v3693_v0  ;;  %v2917_v0 = vor.u32 %v3553_v62, %v2916_v61  ;;  %v2924_v3 = vld [vmem:[%s5459_s3 + $0x98] sm:$0xf]  ;;  %1031 = vmatpush.bf16.msra.mxu3 %v2937_v63  ;;  %v2864_v61 = vld [vmem:[%s5459_s3 + $0x20] sm:$0xf] }
  0xd2   :  { %v3695_v10 = vpop.eup %3694  ;;  %v2925_v8 = vor.u32 %v3554_v7, %v2924_v3  ;;  %v3539_v62 = vld [vmem:[%s5459_s3 + $0x28] sm:$0xf0]  ;;  %v2844_v3 = vld [vmem:[%s5459_s3] sm:$0xf] }
  0xd3   :  { %3696 = vrcp.f32 %v546_v2  ;;  %v528_v11 = vmul.f32 %v3695_v10, %v526_v51  ;;  %vm533_vm1 = vweird.f32 %v3695_v10  ;;  %v558_v26 = vand.u32 2147483648, %v546_v2  ;;  %v3556_v51 = vld [vmem:[%s5459_s3 + $0xb0] sm:$0xf0] }
  0xd4   :  { %vm534_vm2 = vmor %vm532_vm0, %vm533_vm1  ;;  %v556_v31 = vand.u32 2147483647, %v546_v2  ;;  %vm552_vm5 = vweird.f32 %v546_v2  ;;  %v2929_v52 = vor.u32 %v3556_v51, %v2928_v50  ;;  %v3542_v50 = vld [vmem:[%s5459_s3 + $0x40] sm:$0xf0]  ;;  %v2865_v7 = vor.u32 %v3539_v62, %v2864_v61  ;;  %v3577_v61 = vld [vmem:[%s5459_s3 + $0x98] sm:$0xf0] }
  0xd5   :  { %v529_v14 = vsub.f32 1.0, %v528_v11  ;;  %v559_v34 = vor.u32 1.1754944e-38, %v558_v26  ;;  %v3549_v11 = vld [vmem:[%s5459_s3 + $0x7c] sm:$0xf]  ;;  %1032 = vmatpush.bf16.msra.mxu3 %v2925_v8  ;;  %v3548_v26 = vld [vmem:[%s5459_s3 + $0x70] sm:$0xf0] }
  0xd6   :  { %vm557_vm7 = vcmp.eq.f32.partialorder %v556_v31, 8.507059e+37  ;;  %1005 = vmatpush.bf16.msra.mxu1 %v2929_v52  ;;  %v3544_v31 = vld [vmem:[%s5459_s3 + $0x50] sm:$0xf0]  ;;  %v3534_v8 = vld [vmem:[%s5459_s3 + $0x4] sm:$0xf] }
  0xd7   :  { %v530_v17 = vmul.f32 %v3695_v10, %v529_v14  ;;  %v3551_v14 = vld [vmem:[%s5459_s3 + $0x88] sm:$0xf0] }
  0xd9   :  { %v3697_v19 = vpop.eup %3696  ;;  %v531_v21 = vadd.f32 %v3695_v10, %v530_v17 }
  0xda   :  { %v548_v20 = vmul.f32 %v3697_v19, %v546_v2  ;;  %vm553_vm4 = vweird.f32 %v3697_v19  ;;  %v2918_v2 = vld [vmem:[%s5459_s3 + $0x9c] sm:$0xf0]  ;;  %1006 = vmatpush.bf16.msra.mxu1 %v2917_v0  ;;  %v2857_v0 = vor.u32 %v3538_v54, %v2856_v53 }
  0xdb   :  { %v535_v25 = vsel %vm534_vm2, %v3695_v10, %v531_v21  ;;  %vm554_vm6 = vmor %vm552_vm5, %vm553_vm4  ;;  %v2921_v6 = vor.u32 %v3552_v1, %v2918_v2  ;;  %v3550_v10 = vld [vmem:[%s5459_s3 + $0x80] sm:$0xf0]  ;;  %v3547_v21 = vld [vmem:[%s5459_s3 + $0x68] sm:$0xf0] }
  0xdc   :  { %v549_v24 = vsub.f32 1.0, %v548_v20  ;;  %v540_v28 = vsel %vm537_vm3, %v539_v23, %v535_v25  ;;  %v2905_v18 = vor.u32 %v3550_v10, %v2904_v9  ;;  %v2892_v20 = vld [vmem:[%s5459_s3 + $0x60] sm:$0xf]  ;;  %v3546_v23 = vld [vmem:[%s5459_s3 + $0x64] sm:$0xf] }
  0xdd   :  { %v566_v30 = vmul.f32 %v565_v22, %v540_v28  ;;  %1019 = vmatpush.bf16.msra.mxu2 %v2921_v6  ;;  %v2913_v22 = vor.u32 %v3551_v14, %v2912_v13  ;;  %v2900_v25 = vld [vmem:[%s5459_s3 + $0x68] sm:$0xf]  ;;  %v2846_v9 = vld [vmem:[%s5459_s3 + $0xc] sm:$0xf0]  ;;  %v3536_v14 = vld [vmem:[%s5459_s3 + $0x10] sm:$0xf0] }
  0xde   :  { %v550_v29 = vmul.f32 %v3697_v19, %v549_v24  ;;  %v2894_v24 = vld [vmem:[%s5459_s3 + $0x6c] sm:$0xf0]  ;;  %1007 = vmatpush.bf16.msra.mxu1 %v2905_v18  ;;  %v2852_v13 = vld [vmem:[%s5459_s3 + $0x8] sm:$0xf] }
  0xdf   :  { %v567_v32 = vadd.f32 %v566_v30, %v322_v27  ;;  %v2893_v27 = vor.u32 %v3547_v21, %v2892_v20  ;;  %v2880_v30 = vld [vmem:[%s5459_s3 + $0x48] sm:$0xf]  ;;  %1033 = vmatpush.bf16.msra.mxu3 %v2913_v22  ;;  %v2853_v20 = vor.u32 %v3536_v14, %v2852_v13  ;;  %v3010_v13 = vld [vmem:[%s5459_s3 + $0x80] sm:$0xf] }
  0xe0   :  { %v551_v33 = vadd.f32 %v3697_v19, %v550_v29  ;;  %v2897_v29 = vor.u32 %v3546_v23, %v2894_v24 }
  0xe1   :  { %3698 = vtanh.f32 %v567_v32 }
  0xe2   :  { %v555_v35 = vsel %vm554_vm6, %v3697_v19, %v551_v33  ;;  %v2909_v19 = vor.u32 %v3549_v11, %v2906_v12  ;;  %1008 = vmatpush.bf16.msra.mxu1 %v2893_v27 }
  0xe3   :  { %v560_v36 = vsel %vm557_vm7, %v559_v34, %v555_v35  ;;  %v2901_v34 = vor.u32 %v3548_v26, %v2900_v25  ;;  %v3543_v35 = vld [vmem:[%s5459_s3 + $0x4c] sm:$0xf] }
  0xe4   :  { %v569_v37 = vsub.f32 1.0, %v560_v36  ;;  %v571_v40 = vmul.f32 0.0, %v560_v36  ;;  %1020 = vmatpush.bf16.msra.mxu2 %v2909_v19  ;;  %v2882_v36 = vld [vmem:[%s5459_s3 + $0x54] sm:$0xf0] }
  0xe5   :  { %1034 = vmatpush.bf16.msra.mxu3 %v2901_v34 }
  0xe7   :  { %v3699_v38 = vpop.eup %3698 }
  0xe8   :  { %v570_v39 = vmul.f32 %v3699_v38, %v569_v37  ;;  %v2888_v38 = vld [vmem:[%s5459_s3 + $0x50] sm:$0xf]  ;;  %1021 = vmatpush.bf16.msra.mxu2 %v2897_v29 }
  0xea   :  { %v4386_v41 = vadd.f32 %v571_v40, %v570_v39  ;;  %v3545_v39 = vld [vmem:[%s5459_s3 + $0x58] sm:$0xf0]  ;;  %v2881_v40 = vor.u32 %v3544_v31, %v2880_v30 }
  0xec   :  { %573 = vst [vmem:[#allocation4] sm:$0x3] %v4386_v41  ;;  %v577_v42 = vpack.c.bf16 %v4386_v41, %v4386_v41  ;;  %1009 = vmatpush.bf16.msra.mxu1 %v2881_v40 }
  0xee   :  { %746 = vmatmul.bf16.vlgmr.msrb.gmra.mxu2 %v577_v42  ;;  %759 = vmatmul.bf16.vlgmr.msrb.gmra.mxu3 %v577_v42 }
  0xef   :  { %772 = vmatmul.bf16.vlgmr.msra.gmra.mxu0 %v577_v42  ;;  %v2885_v42 = vor.u32 %v3543_v35, %v2882_v36 }
  0xf1   :  { %1022 = vmatpush.bf16.msra.mxu2 %v2885_v42 }
 0x16c   :  { %v4391_v43 = vpop.f32.mrf.mxu0 }
 0x16d   :  { %v823_v10 = vadd.f32 %v4382_v15, %v4391_v43  ;;  %v2849_v43 = vor.u32 %v3534_v8, %v2846_v9  ;;  %v3002_v8 = vld [vmem:[%s5459_s3 + $0x78] sm:$0xf]  ;;  %v3574_v9 = vld [vmem:[%s5459_s3 + $0x80] sm:$0xf0] }
 0x16f   :  { %v825_v21 = vrot.slane %v823_v10, 6  ;;  %v3003_v10 = vor.u32 %v3574_v9, %v3002_v8  ;;  %v2944_v8 = vld [vmem:[%s5459_s3 + $0xc] sm:$0xf0] }
 0x171   :  { %v747_v46 = vpop.f32.mrf.mxu2  ;;  %v760_v47 = vpop.f32.mrf.mxu3 }
 0x172   :  { %v778_v48 = vrot.slane %v747_v46, 6  ;;  %v801_v49 = vrot.slane %v760_v47, 6  ;;  %v3541_v46 = vld [vmem:[%s5459_s3 + $0x38] sm:$0xf0]  ;;  %v3540_v47 = vld [vmem:[%s5459_s3 + $0x34] sm:$0xf] }
 0x174   :  { %v780_v56 = vadd.f32 %v778_v48, %v574_v45  ;;  %v803_v57 = vadd.f32 %v801_v49, %v575_v44  ;;  %v775_v58 = vpop.f32.mrf.mxu0  ;;  %v2868_v45 = vld [vmem:[%s5459_s3 + $0x30] sm:$0xf]  ;;  %v2889_v44 = vor.u32 %v3545_v39, %v2888_v38  ;;  %v2870_v48 = vld [vmem:[%s5459_s3 + $0x3c] sm:$0xf0]  ;;  %v2876_v49 = vld [vmem:[%s5459_s3 + $0x38] sm:$0xf] }
 0x175   :  { %v2869_v51 = vor.u32 %v3541_v46, %v2868_v45  ;;  %v2873_v52 = vor.u32 %v3540_v47, %v2870_v48  ;;  %v2858_v58 = vld [vmem:[%s5459_s3 + $0x24] sm:$0xf0]  ;;  %v838_v46 = vld [vmem:[#allocation3 + $0x28] sm:$0x30]  ;;  %v3580_v47 = vld [vmem:[%s5459_s3 + $0xb0] sm:$0xf0] }
 0x176   :  { %v2840_v4 = vmul.f32 -1.442695, %v780_v56  ;;  %v2841_v5 = vmul.f32 -1.442695, %v803_v57  ;;  %1035 = vmatpush.bf16.msra.mxu3 %v2889_v44  ;;  %v2877_v56 = vor.u32 %v3542_v50, %v2876_v49  ;;  %v3537_v57 = vld [vmem:[%s5459_s3 + $0x1c] sm:$0xf] }
 0x177   :  { %1010 = vmatpush.bf16.msra.mxu1 %v2869_v51  ;;  %1023 = vmatpush.bf16.msra.mxu2 %v2873_v52  ;;  %v2861_v2 = vor.u32 %v3537_v57, %v2858_v58  ;;  %v3579_v48 = vld [vmem:[%s5459_s3 + $0xac] sm:$0xf]  ;;  %v3028_v50 = vld [vmem:[%s5459_s3 + $0xb4] sm:$0xf0]  ;;  %v3034_v51 = vld [vmem:[%s5459_s3 + $0xb0] sm:$0xf] }
 0x178   :  { %3700 = vpow2.f32 %v2840_v4  ;;  %v3535_v4 = vld [vmem:[%s5459_s3 + $0x8] sm:$0xf0]  ;;  %v3581_v52 = vld [vmem:[%s5459_s3 + $0xb8] sm:$0xf0]  ;;  %v3031_v54 = vor.u32 %v3579_v48, %v3028_v50  ;;  %v3566_v48 = vld [vmem:[%s5459_s3 + $0x40] sm:$0xf0] }
 0x179   :  { %3702 = vpow2.f32 %v2841_v5  ;;  %v749_v16 = vpop.f32.mrf.mxu2  ;;  %v762_v17 = vpop.f32.mrf.mxu3 }
 0x17a   :  { %1036 = vmatpush.bf16.msra.mxu3 %v2877_v56  ;;  %v2845_v17 = vor.u32 %v3535_v4, %v2844_v3  ;;  %v839_v56 = vld [vmem:[#allocation3 + $0x10] sm:$0x30] }
 0x17b   :  { %1011 = vmatpush.bf16.msra.mxu1 %v2857_v0  ;;  %1024 = vmatpush.bf16.msra.mxu2 %v2861_v2  ;;  %v3576_v0 = vld [vmem:[%s5459_s3 + $0x94] sm:$0xf]  ;;  %v3022_v2 = vld [vmem:[%s5459_s3 + $0x98] sm:$0xf] }
 0x17e   :  { %v3701_v28 = vpop.eup %3700  ;;  %1037 = vmatpush.bf16.msra.mxu3 %v2865_v7 }
 0x17f   :  { %v3703_v32 = vpop.eup %3702  ;;  %v4471_v33 = vadd.f32 1.0, %v3701_v28  ;;  %1012 = vmatpush.bf16.msra.mxu1 %v2845_v17  ;;  %1025 = vmatpush.bf16.msra.mxu2 %v2849_v43  ;;  %v576_v28 = vld [vmem:[#allocation3 + $0x8] sm:$0xc]  ;;  %v3575_v17 = vld [vmem:[%s5459_s3 + $0x88] sm:$0xf0] }
 0x180   :  { %v4479_v37 = vadd.f32 1.0, %v3703_v32  ;;  %v3571_v43 = vld [vmem:[%s5459_s3 + $0x68] sm:$0xf0] }
 0x181   :  { %3704 = vrcp.f32 %v4471_v33  ;;  %v796_v5 = vand.u32 2147483648, %v4471_v33  ;;  %v794_v12 = vand.u32 2147483647, %v4471_v33  ;;  %vm790_vm9 = vweird.f32 %v4471_v33 }
 0x182   :  { %3706 = vrcp.f32 %v4479_v37  ;;  %v819_v26 = vand.u32 2147483648, %v4479_v37  ;;  %vm813_vm13 = vweird.f32 %v4479_v37  ;;  %v817_v27 = vand.u32 2147483647, %v4479_v37  ;;  %1038 = vmatpush.bf16.msra.mxu3 %v2853_v20 }
 0x183   :  { %v797_v19 = vor.u32 1.1754944e-38, %v796_v5  ;;  %vm795_vm11 = vcmp.eq.f32.partialorder %v794_v12, 8.507059e+37  ;;  %1285 = vmatpush.bf16.msrb.mxu1 %v3031_v54  ;;  %v3578_v5 = vld [vmem:[%s5459_s3 + $0xa0] sm:$0xf0]  ;;  %v3004_v12 = vld [vmem:[%s5459_s3 + $0x84] sm:$0xf0] }
 0x184   :  { %v820_v31 = vor.u32 1.1754944e-38, %v819_v26  ;;  %vm818_vm15 = vcmp.eq.f32.partialorder %v817_v27, 8.507059e+37  ;;  %v2998_v27 = vld [vmem:[%s5459_s3 + $0x68] sm:$0xf]  ;;  %v3562_v54 = vld [vmem:[%s5459_s3 + $0x20] sm:$0xf0] }
 0x187   :  { %v3705_v55 = vpop.eup %3704 }
 0x188   :  { %v3707_v59 = vpop.eup %3706  ;;  %v786_v60 = vmul.f32 %v3705_v55, %v4471_v33  ;;  %vm791_vm8 = vweird.f32 %v3705_v55  ;;  %v833_v33 = vrot.slane %v4386_v41, 6  ;;  %v3026_v41 = vld [vmem:[%s5459_s3 + $0xa8] sm:$0xf] }
 0x189   :  { %v809_v63 = vmul.f32 %v3707_v59, %v4479_v37  ;;  %vm792_vm10 = vmor %vm790_vm9, %vm791_vm8  ;;  %vm814_vm12 = vweird.f32 %v3707_v59  ;;  %v3027_v49 = vor.u32 %v3580_v47, %v3026_v41  ;;  %v2968_v41 = vld [vmem:[%s5459_s3 + $0x3c] sm:$0xf0]  ;;  %v2974_v47 = vld [vmem:[%s5459_s3 + $0x38] sm:$0xf] }
 0x18a   :  { %v787_v1 = vsub.f32 1.0, %v786_v60  ;;  %vm815_vm14 = vmor %vm813_vm13, %vm814_vm12  ;;  %v3014_v60 = vld [vmem:[%s5459_s3 + $0x90] sm:$0xf] }
 0x18b   :  { %v810_v6 = vsub.f32 1.0, %v809_v63  ;;  %1272 = vmatpush.bf16.msrb.mxu0 %v3027_v49  ;;  %v3015_v63 = vor.u32 %v3577_v61, %v3014_v60  ;;  %v2962_v60 = vld [vmem:[%s5459_s3 + $0x20] sm:$0xf]  ;;  %v3563_v61 = vld [vmem:[%s5459_s3 + $0x28] sm:$0xf0] }
 0x18c   :  { %v788_v11 = vmul.f32 %v3705_v55, %v787_v1  ;;  %v3016_v1 = vld [vmem:[%s5459_s3 + $0x9c] sm:$0xf0] }
 0x18d   :  { %v811_v16 = vmul.f32 %v3707_v59, %v810_v6  ;;  %v3019_v4 = vor.u32 %v3576_v0, %v3016_v1  ;;  %v3023_v6 = vor.u32 %v3578_v5, %v3022_v2  ;;  %v3559_v5 = vld [vmem:[%s5459_s3 + $0x8] sm:$0xf0] }
 0x18e   :  { %v789_v18 = vadd.f32 %v3705_v55, %v788_v11  ;;  %v3573_v11 = vld [vmem:[%s5459_s3 + $0x7c] sm:$0xf] }
 0x18f   :  { %v812_v24 = vadd.f32 %v3707_v59, %v811_v16  ;;  %1273 = vmatpush.bf16.msrb.mxu0 %v3015_v63  ;;  %1286 = vmatpush.bf16.msrb.mxu1 %v3019_v4  ;;  %v3007_v16 = vor.u32 %v3573_v11, %v3004_v12  ;;  %v2942_v4 = vld [vmem:[%s5459_s3] sm:$0xf]  ;;  %v2950_v11 = vld [vmem:[%s5459_s3 + $0x8] sm:$0xf]  ;;  %v3560_v12 = vld [vmem:[%s5459_s3 + $0x10] sm:$0xf0] }
 0x190   :  { %v793_v22 = vsel %vm792_vm10, %v3705_v55, %v789_v18  ;;  %v3035_v55 = vor.u32 %v3581_v52, %v3034_v51  ;;  %v2990_v18 = vld [vmem:[%s5459_s3 + $0x60] sm:$0xf] }
 0x191   :  { %v798_v23 = vsel %vm795_vm11, %v797_v19, %v793_v22  ;;  %v816_v30 = vsel %vm815_vm14, %v3707_v59, %v812_v24  ;;  %v2991_v22 = vor.u32 %v3571_v43, %v2990_v18  ;;  %v2992_v24 = vld [vmem:[%s5459_s3 + $0x6c] sm:$0xf0] }
 0x192   :  { %v827_v25 = vmul.f32 %v825_v21, %v798_v23  ;;  %v821_v32 = vsel %vm818_vm15, %v820_v31, %v816_v30  ;;  %1298 = vmatpush.bf16.msrb.mxu2 %v3035_v55  ;;  %v3011_v21 = vor.u32 %v3575_v17, %v3010_v13  ;;  %v3570_v23 = vld [vmem:[%s5459_s3 + $0x64] sm:$0xf]  ;;  %v3568_v30 = vld [vmem:[%s5459_s3 + $0x50] sm:$0xf0]  ;;  %v2975_v55 = vor.u32 %v3566_v48, %v2974_v47  ;;  %v3124_v48 = vld [vmem:[%s5459_s3 + $0xa8] sm:$0xf] }
 0x193   :  { %v830_v34 = vsub.f32 1.0, %v821_v32  ;;  %v835_v38 = vmul.f32 %v833_v33, %v821_v32  ;;  %1274 = vmatpush.bf16.msrb.mxu0 %v3003_v10  ;;  %1287 = vmatpush.bf16.msrb.mxu1 %v3007_v16  ;;  %v2995_v26 = vor.u32 %v3570_v23, %v2992_v24  ;;  %v3567_v32 = vld [vmem:[%s5459_s3 + $0x4c] sm:$0xf]  ;;  %v2980_v33 = vld [vmem:[%s5459_s3 + $0x54] sm:$0xf0]  ;;  %v2943_v16 = vor.u32 %v3559_v5, %v2942_v4 }
 0x194   :  { %v828_v29 = vadd.f32 %v827_v25, %v576_v28  ;;  %v3572_v28 = vld [vmem:[%s5459_s3 + $0x70] sm:$0xf0]  ;;  %v3120_v4 = vld [vmem:[%s5459_s3 + $0x98] sm:$0xf]  ;;  %v3602_v5 = vld [vmem:[%s5459_s3 + $0xa0] sm:$0xf0] }
 0x195   :  { %v2999_v31 = vor.u32 %v3572_v28, %v2998_v27 }
 0x196   :  { %3708 = vtanh.f32 %v828_v29  ;;  %1299 = vmatpush.bf16.msrb.mxu2 %v3023_v6  ;;  %v2978_v29 = vld [vmem:[%s5459_s3 + $0x48] sm:$0xf] }
 0x197   :  { %1275 = vmatpush.bf16.msrb.mxu0 %v2991_v22  ;;  %1288 = vmatpush.bf16.msrb.mxu1 %v2995_v26 }
 0x19a   :  { %1300 = vmatpush.bf16.msrb.mxu2 %v3011_v21 }
 0x19c   :  { %v3709_v35 = vpop.eup %3708 }
 0x19d   :  { %v831_v36 = vmul.f32 %v3709_v35, %v830_v34  ;;  %v2986_v34 = vld [vmem:[%s5459_s3 + $0x50] sm:$0xf]  ;;  %v2979_v35 = vor.u32 %v3568_v30, %v2978_v29 }
 0x19e   :  { %1301 = vmatpush.bf16.msrb.mxu2 %v2999_v31 }
 0x19f   :  { %v4554_v39 = vadd.f32 %v835_v38, %v831_v36  ;;  %v3569_v36 = vld [vmem:[%s5459_s3 + $0x58] sm:$0xf0]  ;;  %1276 = vmatpush.bf16.msrb.mxu0 %v2979_v35 }
 0x1a1   :  { %837 = vst [vmem:[#allocation4] sm:$0xc] %v4554_v39  ;;  %v841_v37 = vpack.c.bf16 %v4554_v39, %v4554_v39 }
 0x1a3   :  { %v875_v40 = vrot.slane %v841_v37, 1  ;;  %v2983_v37 = vor.u32 %v3567_v32, %v2980_v33  ;;  %v1100_v32 = vrot.slane %v4554_v39, 6  ;;  %v1106_v39 = vld [vmem:[#allocation3 + $0x10] sm:$0xc0] }
 0x1a5   :  { %1013 = vmatmul.bf16.vlgmr.msra.gmra.mxu1 %v875_v40  ;;  %1026 = vmatmul.bf16.vlgmr.msra.gmra.mxu2 %v875_v40 }
 0x1a6   :  { %1039 = vmatmul.bf16.vlgmr.msra.gmra.mxu3 %v875_v40  ;;  %v2966_v40 = vld [vmem:[%s5459_s3 + $0x30] sm:$0xf]  ;;  %1289 = vmatpush.bf16.msrb.mxu1 %v2983_v37 }
 0x222   :  { %v1014_v42 = vpop.f32.mrf.mxu1 }
 0x223   :  { %v1045_v45 = vrot.slane %v1014_v42, 4  ;;  %v3565_v42 = vld [vmem:[%s5459_s3 + $0x38] sm:$0xf0] }
 0x224   :  { %v2967_v50 = vor.u32 %v3565_v42, %v2966_v40 }
 0x225   :  { %v1047_v44 = vadd.f32 %v1045_v45, %v838_v46  ;;  %v2987_v46 = vor.u32 %v3569_v36, %v2986_v34 }
 0x226   :  { %1277 = vmatpush.bf16.msrb.mxu0 %v2967_v50  ;;  %v3603_v50 = vld [vmem:[%s5459_s3 + $0xac] sm:$0xf] }
 0x227   :  { %v2938_v53 = vmul.f32 -1.442695, %v1047_v44  ;;  %v3564_v44 = vld [vmem:[%s5459_s3 + $0x34] sm:$0xf]  ;;  %1302 = vmatpush.bf16.msrb.mxu2 %v2987_v46 }
 0x228   :  { %v1027_v57 = vpop.f32.mrf.mxu2  ;;  %v2971_v52 = vor.u32 %v3564_v44, %v2968_v41  ;;  %v1105_v44 = vld [vmem:[#allocation3 + $0x28] sm:$0xc0] }
 0x229   :  { %3710 = vpow2.f32 %v2938_v53  ;;  %v1068_v58 = vrot.slane %v1027_v57, 4  ;;  %v4577_v59 = vpop.f32.mrf.mxu3  ;;  %v2954_v53 = vld [vmem:[%s5459_s3 + $0x18] sm:$0xf]  ;;  %v2956_v57 = vld [vmem:[%s5459_s3 + $0x24] sm:$0xf0] }
 0x22a   :  { %v1016_v62 = vpop.f32.mrf.mxu1  ;;  %v1090_v63 = vadd.f32 %v4382_v15, %v4577_v59  ;;  %v2955_v0 = vor.u32 %v3562_v54, %v2954_v53  ;;  %1290 = vmatpush.bf16.msrb.mxu1 %v2971_v52  ;;  %v3558_v59 = vld [vmem:[%s5459_s3 + $0x4] sm:$0xf]  ;;  %v3126_v54 = vld [vmem:[%s5459_s3 + $0xb4] sm:$0xf0] }
 0x22b   :  { %v1070_v3 = vadd.f32 %v1068_v58, %v839_v56  ;;  %v3561_v56 = vld [vmem:[%s5459_s3 + $0x1c] sm:$0xf]  ;;  %1303 = vmatpush.bf16.msrb.mxu2 %v2975_v55  ;;  %v2947_v43 = vor.u32 %v3558_v59, %v2944_v8  ;;  %v3129_v55 = vor.u32 %v3603_v50, %v3126_v54  ;;  %v3100_v59 = vld [vmem:[%s5459_s3 + $0x78] sm:$0xf]  ;;  %v3598_v8 = vld [vmem:[%s5459_s3 + $0x80] sm:$0xf0] }
 0x22c   :  { %1278 = vmatpush.bf16.msrb.mxu0 %v2955_v0  ;;  %v3601_v0 = vld [vmem:[%s5459_s3 + $0x98] sm:$0xf0]  ;;  %v3586_v54 = vld [vmem:[%s5459_s3 + $0x20] sm:$0xf0] }
 0x22d   :  { %v2939_v7 = vmul.f32 -1.442695, %v1070_v3  ;;  %v2959_v3 = vor.u32 %v3561_v56, %v2956_v57  ;;  %v3132_v56 = vld [vmem:[%s5459_s3 + $0xb0] sm:$0xf]  ;;  %v3605_v57 = vld [vmem:[%s5459_s3 + $0xb8] sm:$0xf0] }
 0x22f   :  { %v3711_v14 = vpop.eup %3710  ;;  %3712 = vpow2.f32 %v2939_v7  ;;  %v2963_v7 = vor.u32 %v3563_v61, %v2962_v60  ;;  %1291 = vmatpush.bf16.msrb.mxu1 %v2959_v3  ;;  %v3133_v60 = vor.u32 %v3605_v57, %v3132_v56  ;;  %v3114_v3 = vld [vmem:[%s5459_s3 + $0x9c] sm:$0xf0]  ;;  %v3585_v57 = vld [vmem:[%s5459_s3 + $0x1c] sm:$0xf] }
 0x230   :  { %v4621_v19 = vadd.f32 1.0, %v3711_v14  ;;  %v1029_v20 = vpop.f32.mrf.mxu2  ;;  %v1092_v14 = vrot.slane %v1090_v63, 4  ;;  %1279 = vmatpush.bf16.msrb.mxu0 %v2943_v16  ;;  %v3112_v63 = vld [vmem:[%s5459_s3 + $0x90] sm:$0xf] }
 0x231   :  { %v1042_v25 = vpop.f32.mrf.mxu3  ;;  %1304 = vmatpush.bf16.msrb.mxu2 %v2963_v7  ;;  %v2951_v20 = vor.u32 %v3560_v12, %v2950_v11  ;;  %v3121_v7 = vor.u32 %v3602_v5, %v3120_v4  ;;  %v3101_v11 = vor.u32 %v3598_v8, %v3100_v59  ;;  %v3102_v12 = vld [vmem:[%s5459_s3 + $0x84] sm:$0xf0]  ;;  %v3582_v8 = vld [vmem:[%s5459_s3 + $0x4] sm:$0xf] }
 0x232   :  { %3714 = vrcp.f32 %v4621_v19  ;;  %v1063_v62 = vand.u32 2147483648, %v4621_v19  ;;  %v1061_v2 = vand.u32 2147483647, %v4621_v19  ;;  %vm1057_vm1 = vweird.f32 %v4621_v19  ;;  %v840_v25 = vld [vmem:[#allocation3 + $0x8] sm:$0x30] }
 0x233   :  { %1292 = vmatpush.bf16.msrb.mxu1 %v2947_v43 }
 0x234   :  { %v1064_v13 = vor.u32 1.1754944e-38, %v1063_v62  ;;  %vm1062_vm3 = vcmp.eq.f32.partialorder %v1061_v2, 8.507059e+37  ;;  %1552 = vmatpush.bf16.msra.mxu0 %v3129_v55  ;;  %v3113_v2 = vor.u32 %v3601_v0, %v3112_v63  ;;  %v3060_v0 = vld [vmem:[%s5459_s3 + $0x20] sm:$0xf] }
 0x235   :  { %v3713_v38 = vpop.eup %3712  ;;  %1305 = vmatpush.bf16.msrb.mxu2 %v2951_v20  ;;  %v3595_v20 = vld [vmem:[%s5459_s3 + $0x68] sm:$0xf0] }
 0x236   :  { %v4660_v45 = vadd.f32 1.0, %v3713_v38 }
 0x237   :  { %1565 = vmatpush.bf16.msra.mxu1 %v3133_v60  ;;  %v3054_v60 = vld [vmem:[%s5459_s3 + $0x24] sm:$0xf0] }
 0x238   :  { %v3715_v49 = vpop.eup %3714  ;;  %3716 = vrcp.f32 %v4660_v45  ;;  %v1086_v22 = vand.u32 2147483648, %v4660_v45  ;;  %v1084_v24 = vand.u32 2147483647, %v4660_v45  ;;  %vm1080_vm5 = vweird.f32 %v4660_v45 }
 0x239   :  { %v1053_v51 = vmul.f32 %v3715_v49, %v4621_v19  ;;  %vm1058_vm0 = vweird.f32 %v3715_v49 }
 0x23a   :  { %vm1059_vm2 = vmor %vm1057_vm1, %vm1058_vm0  ;;  %v1087_v28 = vor.u32 1.1754944e-38, %v1086_v22  ;;  %vm1085_vm7 = vcmp.eq.f32.partialorder %v1084_v24, 8.507059e+37  ;;  %v3594_v24 = vld [vmem:[%s5459_s3 + $0x64] sm:$0xf] }
 0x23b   :  { %v1054_v58 = vsub.f32 1.0, %v1053_v51  ;;  %1566 = vmatpush.bf16.msra.mxu1 %v3121_v7 }
 0x23d   :  { %v1055_v1 = vmul.f32 %v3715_v49, %v1054_v58 }
 0x23e   :  { %v3717_v6 = vpop.eup %3716 }
 0x23f   :  { %v1076_v9 = vmul.f32 %v3717_v6, %v4660_v45  ;;  %v1056_v10 = vadd.f32 %v3715_v49, %v1055_v1  ;;  %vm1081_vm4 = vweird.f32 %v3717_v6  ;;  %v3600_v1 = vld [vmem:[%s5459_s3 + $0x94] sm:$0xf] }
 0x240   :  { %vm1082_vm6 = vmor %vm1080_vm5, %vm1081_vm4 }
 0x241   :  { %v1077_v17 = vsub.f32 1.0, %v1076_v9  ;;  %v1060_v18 = vsel %vm1059_vm2, %v3715_v49, %v1056_v10  ;;  %v3604_v49 = vld [vmem:[%s5459_s3 + $0xb0] sm:$0xf0]  ;;  %v3597_v9 = vld [vmem:[%s5459_s3 + $0x7c] sm:$0xf] }
 0x242   :  { %v1065_v19 = vsel %vm1062_vm3, %v1064_v13, %v1060_v18  ;;  %v3125_v53 = vor.u32 %v3604_v49, %v3124_v48  ;;  %v3108_v13 = vld [vmem:[%s5459_s3 + $0x80] sm:$0xf]  ;;  %v3105_v18 = vor.u32 %v3597_v9, %v3102_v12  ;;  %v3042_v9 = vld [vmem:[%s5459_s3 + $0xc] sm:$0xf0]  ;;  %v3584_v12 = vld [vmem:[%s5459_s3 + $0x10] sm:$0xf0] }
 0x243   :  { %v1078_v21 = vmul.f32 %v3717_v6, %v1077_v17  ;;  %v1094_v23 = vmul.f32 %v1092_v14, %v1065_v19  ;;  %v3599_v14 = vld [vmem:[%s5459_s3 + $0x88] sm:$0xf0]  ;;  %v3088_v19 = vld [vmem:[%s5459_s3 + $0x60] sm:$0xf] }
 0x244   :  { %1539 = vmatpush.bf16.msrb.mxu3 %v3125_v53  ;;  %v3109_v43 = vor.u32 %v3599_v14, %v3108_v13  ;;  %v3052_v53 = vld [vmem:[%s5459_s3 + $0x18] sm:$0xf] }
 0x245   :  { %v1079_v26 = vadd.f32 %v3717_v6, %v1078_v21  ;;  %v1095_v27 = vadd.f32 %v1094_v23, %v840_v25  ;;  %v3089_v23 = vor.u32 %v3595_v20, %v3088_v19  ;;  %v3090_v25 = vld [vmem:[%s5459_s3 + $0x6c] sm:$0xf0]  ;;  %v3053_v4 = vor.u32 %v3586_v54, %v3052_v53 }
 0x246   :  { %1567 = vmatpush.bf16.msra.mxu1 %v3109_v43  ;;  %v3045_v43 = vor.u32 %v3582_v8, %v3042_v9  ;;  %v3210_v54 = vld [vmem:[%s5459_s3 + $0x90] sm:$0xf] }
 0x247   :  { %v1083_v29 = vsel %vm1082_vm6, %v3717_v6, %v1079_v26  ;;  %3718 = vtanh.f32 %v1095_v27  ;;  %v3117_v6 = vor.u32 %v3600_v1, %v3114_v3  ;;  %v3096_v26 = vld [vmem:[%s5459_s3 + $0x68] sm:$0xf]  ;;  %v3596_v27 = vld [vmem:[%s5459_s3 + $0x70] sm:$0xf0]  ;;  %v3587_v1 = vld [vmem:[%s5459_s3 + $0x28] sm:$0xf0] }
 0x248   :  { %v1088_v30 = vsel %vm1085_vm7, %v1087_v28, %v1083_v29  ;;  %1540 = vmatpush.bf16.msrb.mxu3 %v3113_v2  ;;  %v3093_v28 = vor.u32 %v3594_v24, %v3090_v25  ;;  %v3097_v29 = vor.u32 %v3596_v27, %v3096_v26  ;;  %v3061_v59 = vor.u32 %v3587_v1, %v3060_v0  ;;  %v1107_v24 = vld [vmem:[#allocation3 + $0x8] sm:$0xc0] }
 0x249   :  { %v1097_v31 = vsub.f32 1.0, %v1088_v30  ;;  %v1102_v35 = vmul.f32 %v1100_v32, %v1088_v30  ;;  %1553 = vmatpush.bf16.msra.mxu0 %v3117_v6  ;;  %v3076_v30 = vld [vmem:[%s5459_s3 + $0x48] sm:$0xf]  ;;  %v3057_v6 = vor.u32 %v3585_v57, %v3054_v60 }
 0x24a   :  { %1568 = vmatpush.bf16.msra.mxu1 %v3097_v29 }
 0x24c   :  { %1541 = vmatpush.bf16.msrb.mxu3 %v3101_v11  ;;  %v3048_v11 = vld [vmem:[%s5459_s3 + $0x8] sm:$0xf] }
 0x24d   :  { %v3719_v33 = vpop.eup %3718  ;;  %1554 = vmatpush.bf16.msra.mxu0 %v3105_v18 }
 0x24e   :  { %v1098_v34 = vmul.f32 %v3719_v33, %v1097_v31  ;;  %v3592_v31 = vld [vmem:[%s5459_s3 + $0x50] sm:$0xf0]  ;;  %v3591_v33 = vld [vmem:[%s5459_s3 + $0x4c] sm:$0xf] }
 0x24f   :  { %v3077_v32 = vor.u32 %v3592_v31, %v3076_v30 }
 0x250   :  { %v4723_v36 = vadd.f32 %v1102_v35, %v1098_v34  ;;  %1542 = vmatpush.bf16.msrb.mxu3 %v3089_v23  ;;  %v3078_v34 = vld [vmem:[%s5459_s3 + $0x54] sm:$0xf0] }
 0x251   :  { %1555 = vmatpush.bf16.msra.mxu0 %v3093_v28  ;;  %v3081_v35 = vor.u32 %v3591_v33, %v3078_v34 }
 0x252   :  { %1104 = vst [vmem:[#allocation4] sm:$0x30] %v4723_v36  ;;  %v1108_v38 = vpack.c.bf16 %v4723_v36, %v4723_v36  ;;  %v1367_v30 = vrot.slane %v4723_v36, 6 }
 0x254   :  { %v1142_v37 = vrot.slane %v1108_v38, 2  ;;  %v3084_v38 = vld [vmem:[%s5459_s3 + $0x50] sm:$0xf]  ;;  %1543 = vmatpush.bf16.msrb.mxu3 %v3077_v32 }
 0x255   :  { %1556 = vmatpush.bf16.msra.mxu0 %v3081_v35 }
 0x256   :  { %1280 = vmatmul.bf16.vlgmr.msrb.gmra.mxu0 %v1142_v37  ;;  %1293 = vmatmul.bf16.vlgmr.msrb.gmra.mxu1 %v1142_v37 }
 0x257   :  { %1306 = vmatmul.bf16.vlgmr.msrb.gmra.mxu2 %v1142_v37  ;;  %v3593_v37 = vld [vmem:[%s5459_s3 + $0x58] sm:$0xf0] }
 0x2d3   :  { %v1281_v40 = vpop.f32.mrf.mxu0  ;;  %v1294_v42 = vpop.f32.mrf.mxu1 }
 0x2d4   :  { %v1312_v45 = vrot.slane %v1281_v40, 2  ;;  %v1335_v46 = vrot.slane %v1294_v42, 2  ;;  %v3064_v40 = vld [vmem:[%s5459_s3 + $0x30] sm:$0xf]  ;;  %v3085_v42 = vor.u32 %v3593_v37, %v3084_v38  ;;  %v1373_v38 = vld [vmem:[#allocation3 + $0x18] sm:$0x3] }
 0x2d6   :  { %v1314_v41 = vadd.f32 %v1312_v45, %v1105_v44  ;;  %v1337_v47 = vadd.f32 %v1335_v46, %v1106_v39  ;;  %v3589_v45 = vld [vmem:[%s5459_s3 + $0x38] sm:$0xf0]  ;;  %v3588_v46 = vld [vmem:[%s5459_s3 + $0x34] sm:$0xf]  ;;  %v3066_v44 = vld [vmem:[%s5459_s3 + $0x3c] sm:$0xf0]  ;;  %1569 = vmatpush.bf16.msra.mxu1 %v3085_v42 }
 0x2d7   :  { %v3065_v50 = vor.u32 %v3589_v45, %v3064_v40  ;;  %v1372_v45 = vld [vmem:[#allocation3] sm:$0x3] }
 0x2d8   :  { %v3036_v51 = vmul.f32 -1.442695, %v1314_v41  ;;  %v3037_v52 = vmul.f32 -1.442695, %v1337_v47  ;;  %v3072_v41 = vld [vmem:[%s5459_s3 + $0x38] sm:$0xf] }
 0x2d9   :  { %v3590_v47 = vld [vmem:[%s5459_s3 + $0x40] sm:$0xf0]  ;;  %1544 = vmatpush.bf16.msrb.mxu3 %v3065_v50  ;;  %v3629_v50 = vld [vmem:[%s5459_s3 + $0xb8] sm:$0xf0] }
 0x2da   :  { %3720 = vpow2.f32 %v3036_v51  ;;  %v4746_v58 = vpop.f32.mrf.mxu2  ;;  %v3073_v56 = vor.u32 %v3590_v47, %v3072_v41 }
 0x2db   :  { %3722 = vpow2.f32 %v3037_v52  ;;  %v1283_v61 = vpop.f32.mrf.mxu0  ;;  %v1296_v62 = vpop.f32.mrf.mxu1  ;;  %v3069_v52 = vor.u32 %v3588_v46, %v3066_v44  ;;  %v1357_v63 = vadd.f32 %v4382_v15, %v4746_v58  ;;  %v3040_v15 = vld [vmem:[%s5459_s3] sm:$0xf]  ;;  %v3583_v58 = vld [vmem:[%s5459_s3 + $0x8] sm:$0xf0]  ;;  %v3222_v46 = vld [vmem:[%s5459_s3 + $0xa8] sm:$0xf] }
 0x2dc   :  { %1570 = vmatpush.bf16.msra.mxu1 %v3073_v56  ;;  %v3628_v44 = vld [vmem:[%s5459_s3 + $0xb0] sm:$0xf0] }
 0x2dd   :  { %1557 = vmatpush.bf16.msra.mxu0 %v3069_v52  ;;  %v1359_v14 = vrot.slane %v1357_v63, 2  ;;  %1545 = vmatpush.bf16.msrb.mxu3 %v3053_v4  ;;  %v3223_v47 = vor.u32 %v3628_v44, %v3222_v46  ;;  %v3624_v56 = vld [vmem:[%s5459_s3 + $0x94] sm:$0xf]  ;;  %v3626_v63 = vld [vmem:[%s5459_s3 + $0xa0] sm:$0xf0] }
 0x2de   :  { %v3198_v4 = vld [vmem:[%s5459_s3 + $0x78] sm:$0xf] }
 0x2df   :  { %1794 = vmatpush.bf16.msra.mxu2 %v3223_v47  ;;  %v3150_v47 = vld [vmem:[%s5459_s3 + $0x18] sm:$0xf] }
 0x2e0   :  { %v3721_v10 = vpop.eup %3720  ;;  %1571 = vmatpush.bf16.msra.mxu1 %v3061_v59  ;;  %v3623_v59 = vld [vmem:[%s5459_s3 + $0x88] sm:$0xf0] }
 0x2e1   :  { %v3723_v16 = vpop.eup %3722  ;;  %v4784_v17 = vadd.f32 1.0, %v3721_v10  ;;  %1558 = vmatpush.bf16.msra.mxu0 %v3057_v6  ;;  %v3621_v6 = vld [vmem:[%s5459_s3 + $0x7c] sm:$0xf] }
 0x2e2   :  { %v4792_v21 = vadd.f32 1.0, %v3723_v16  ;;  %v1309_v22 = vpop.f32.mrf.mxu2  ;;  %v3041_v16 = vor.u32 %v3583_v58, %v3040_v15  ;;  %v3200_v15 = vld [vmem:[%s5459_s3 + $0x84] sm:$0xf0]  ;;  %v3206_v58 = vld [vmem:[%s5459_s3 + $0x80] sm:$0xf] }
 0x2e3   :  { %3724 = vrcp.f32 %v4784_v17  ;;  %v1330_v62 = vand.u32 2147483648, %v4784_v17  ;;  %v1328_v3 = vand.u32 2147483647, %v4784_v17  ;;  %vm1324_vm9 = vweird.f32 %v4784_v17 }
 0x2e4   :  { %3726 = vrcp.f32 %v4792_v21  ;;  %v1353_v19 = vand.u32 2147483648, %v4792_v21  ;;  %v3049_v22 = vor.u32 %v3584_v12, %v3048_v11  ;;  %vm1347_vm13 = vweird.f32 %v4792_v21  ;;  %1546 = vmatpush.bf16.msrb.mxu3 %v3041_v16  ;;  %v3186_v12 = vld [vmem:[%s5459_s3 + $0x60] sm:$0xf] }
 0x2e5   :  { %v1331_v10 = vor.u32 1.1754944e-38, %v1330_v62  ;;  %vm1329_vm11 = vcmp.eq.f32.partialorder %v1328_v3, 8.507059e+37  ;;  %v1351_v23 = vand.u32 2147483647, %v4792_v21  ;;  %1559 = vmatpush.bf16.msra.mxu0 %v3045_v43  ;;  %v3218_v62 = vld [vmem:[%s5459_s3 + $0x98] sm:$0xf]  ;;  %v3207_v11 = vor.u32 %v3623_v59, %v3206_v58 }
 0x2e6   :  { %v1354_v27 = vor.u32 1.1754944e-38, %v1353_v19  ;;  %1572 = vmatpush.bf16.msra.mxu1 %v3049_v22  ;;  %v3219_v3 = vor.u32 %v3626_v63, %v3218_v62  ;;  %v3620_v43 = vld [vmem:[%s5459_s3 + $0x70] sm:$0xf0] }
 0x2e7   :  { %vm1352_vm15 = vcmp.eq.f32.partialorder %v1351_v23, 8.507059e+37 }
 0x2e9   :  { %v3725_v39 = vpop.eup %3724 }
 0x2ea   :  { %v4844_v48 = vpop.eup %3726  ;;  %v1320_v49 = vmul.f32 %v3725_v39, %v4784_v17  ;;  %vm1325_vm8 = vweird.f32 %v3725_v39 }
 0x2eb   :  { %v1343_v51 = vmul.f32 %v4844_v48, %v4792_v21  ;;  %vm1326_vm10 = vmor %vm1324_vm9, %vm1325_vm8  ;;  %vm1348_vm12 = vweird.f32 %v4844_v48 }
 0x2ec   :  { %v1321_v55 = vsub.f32 1.0, %v1320_v49  ;;  %vm1349_vm14 = vmor %vm1347_vm13, %vm1348_vm12  ;;  %v3230_v49 = vld [vmem:[%s5459_s3 + $0xb0] sm:$0xf] }
 0x2ed   :  { %v1344_v61 = vsub.f32 1.0, %v1343_v51  ;;  %v3231_v53 = vor.u32 %v3629_v50, %v3230_v49  ;;  %v3609_v49 = vld [vmem:[%s5459_s3 + $0x1c] sm:$0xf] }
 0x2ee   :  { %v1322_v2 = vmul.f32 %v3725_v39, %v1321_v55  ;;  %v3625_v55 = vld [vmem:[%s5459_s3 + $0x98] sm:$0xf0] }
 0x2ef   :  { %v1345_v5 = vmul.f32 %v4844_v48, %v1344_v61  ;;  %v3211_v60 = vor.u32 %v3625_v55, %v3210_v54  ;;  %v3212_v61 = vld [vmem:[%s5459_s3 + $0x9c] sm:$0xf0]  ;;  %1820 = vmatpush.bf16.msrb.mxu0 %v3231_v53  ;;  %v3611_v53 = vld [vmem:[%s5459_s3 + $0x28] sm:$0xf0] }
 0x2f0   :  { %v1323_v7 = vadd.f32 %v3725_v39, %v1322_v2  ;;  %v3215_v2 = vor.u32 %v3624_v56, %v3212_v61 }
 0x2f1   :  { %v1346_v18 = vadd.f32 %v4844_v48, %v1345_v5  ;;  %v3622_v5 = vld [vmem:[%s5459_s3 + $0x80] sm:$0xf0]  ;;  %1795 = vmatpush.bf16.msra.mxu2 %v3211_v60 }
 0x2f2   :  { %v1327_v13 = vsel %vm1326_vm10, %v3725_v39, %v1323_v7  ;;  %v3627_v39 = vld [vmem:[%s5459_s3 + $0xac] sm:$0xf]  ;;  %v3199_v9 = vor.u32 %v3622_v5, %v3198_v4  ;;  %v3608_v4 = vld [vmem:[%s5459_s3 + $0x10] sm:$0xf0] }
 0x2f3   :  { %v1332_v17 = vsel %vm1329_vm11, %v1331_v10, %v1327_v13  ;;  %v1350_v26 = vsel %vm1349_vm14, %v4844_v48, %v1346_v18  ;;  %v3224_v48 = vld [vmem:[%s5459_s3 + $0xb4] sm:$0xf0]  ;;  %1821 = vmatpush.bf16.msrb.mxu0 %v3219_v3  ;;  %v3203_v10 = vor.u32 %v3621_v6, %v3200_v15  ;;  %v3619_v13 = vld [vmem:[%s5459_s3 + $0x68] sm:$0xf0]  ;;  %v3194_v18 = vld [vmem:[%s5459_s3 + $0x68] sm:$0xf] }
 0x2f4   :  { %v1361_v20 = vmul.f32 %v1359_v14, %v1332_v17  ;;  %v1355_v28 = vsel %vm1352_vm15, %v1354_v27, %v1350_v26  ;;  %v3227_v52 = vor.u32 %v3627_v39, %v3224_v48  ;;  %v3618_v14 = vld [vmem:[%s5459_s3 + $0x64] sm:$0xf]  ;;  %v3188_v17 = vld [vmem:[%s5459_s3 + $0x6c] sm:$0xf0]  ;;  %v3187_v19 = vor.u32 %v3619_v13, %v3186_v12  ;;  %v3615_v26 = vld [vmem:[%s5459_s3 + $0x4c] sm:$0xf] }
 0x2f5   :  { %v1364_v29 = vsub.f32 1.0, %v1355_v28  ;;  %v1369_v33 = vmul.f32 %v1367_v30, %v1355_v28  ;;  %1796 = vmatpush.bf16.msra.mxu2 %v3199_v9  ;;  %v3191_v23 = vor.u32 %v3618_v14, %v3188_v17  ;;  %v3176_v27 = vld [vmem:[%s5459_s3 + $0x54] sm:$0xf0]  ;;  %v3617_v30 = vld [vmem:[%s5459_s3 + $0x58] sm:$0xf0] }
 0x2f6   :  { %v1362_v25 = vadd.f32 %v1361_v20, %v1107_v24  ;;  %1807 = vmatpush.bf16.msra.mxu3 %v3227_v52  ;;  %v3174_v20 = vld [vmem:[%s5459_s3 + $0x48] sm:$0xf]  ;;  %v3195_v24 = vor.u32 %v3620_v43, %v3194_v18  ;;  %v3610_v48 = vld [vmem:[%s5459_s3 + $0x20] sm:$0xf0]  ;;  %v3158_v52 = vld [vmem:[%s5459_s3 + $0x20] sm:$0xf] }
 0x2f7   :  { %1822 = vmatpush.bf16.msrb.mxu0 %v3207_v11  ;;  %v3151_v56 = vor.u32 %v3610_v48, %v3150_v47  ;;  %v3159_v63 = vor.u32 %v3611_v53, %v3158_v52  ;;  %v3146_v3 = vld [vmem:[%s5459_s3 + $0x8] sm:$0xf]  ;;  %v5068_v11 = vld [vmem:[%s5461_s5] ss:$0 sm:$0xff]  ;;  %v3653_v48 = vld [vmem:[%s5459_s3 + $0xb8] sm:$0xf0] }
 0x2f8   :  { %3728 = vtanh.f32 %v1362_v25  ;;  %v3616_v25 = vld [vmem:[%s5459_s3 + $0x50] sm:$0xf0]  ;;  %v3147_v9 = vor.u32 %v3608_v4, %v3146_v3  ;;  %v3304_v3 = vld [vmem:[%s5459_s3 + $0x80] sm:$0xf]  ;;  %v3647_v4 = vld [vmem:[%s5459_s3 + $0x88] sm:$0xf0] }
 0x2f9   :  { %1797 = vmatpush.bf16.msra.mxu2 %v3187_v19  ;;  %v1374_v19 = vld [vmem:[#allocation3 + $0x20] sm:$0x3]  ;;  %v3648_v53 = vld [vmem:[%s5459_s3 + $0x94] sm:$0xf] }
 0x2fa   :  { %1808 = vmatpush.bf16.msra.mxu3 %v3215_v2  ;;  %v3140_v2 = vld [vmem:[%s5459_s3 + $0xc] sm:$0xf0] }
 0x2fb   :  { %1823 = vmatpush.bf16.msrb.mxu0 %v3195_v24 }
 0x2fe   :  { %v3729_v31 = vpop.eup %3728  ;;  %1809 = vmatpush.bf16.msra.mxu3 %v3203_v10 }
 0x2ff   :  { %v1365_v32 = vmul.f32 %v3729_v31, %v1364_v29  ;;  %v3182_v29 = vld [vmem:[%s5459_s3 + $0x50] sm:$0xf]  ;;  %v3175_v31 = vor.u32 %v3616_v25, %v3174_v20 }
 0x301   :  { %v4899_v34 = vadd.f32 %v1369_v33, %v1365_v32  ;;  %v3179_v33 = vor.u32 %v3615_v26, %v3176_v27  ;;  %1798 = vmatpush.bf16.msra.mxu2 %v3175_v31  ;;  %v1630_v31 = vld [vmem:[#allocation3] sm:$0xc] }
 0x302   :  { %1810 = vmatpush.bf16.msra.mxu3 %v3191_v23 }
 0x303   :  { %1371 = vst [vmem:[#allocation4] sm:$0xc0] %v4899_v34  ;;  %v1375_v21 = vpack.c.bf16 %v4899_v34, %v4899_v34  ;;  %v1625_v25 = vrot.slane %v4899_v34, 6 }
 0x305   :  { %v1409_v35 = vrot.slane %v1375_v21, 3  ;;  %v3183_v21 = vor.u32 %v3617_v30, %v3182_v29 }
 0x306   :  { %1811 = vmatpush.bf16.msra.mxu3 %v3179_v33  ;;  %v1631_v33 = vld [vmem:[#allocation3 + $0x18] sm:$0xc] }
 0x307   :  { %1547 = vmatmul.bf16.vlgmr.msrb.gmra.mxu3 %v1409_v35  ;;  %1560 = vmatmul.bf16.vlgmr.msra.gmra.mxu0 %v1409_v35 }
 0x308   :  { %1573 = vmatmul.bf16.vlgmr.msra.gmra.mxu1 %v1409_v35  ;;  %v3162_v35 = vld [vmem:[%s5459_s3 + $0x30] sm:$0xf]  ;;  %1824 = vmatpush.bf16.msrb.mxu0 %v3183_v21 }
 0x384   :  { %v1561_v37 = vpop.f32.mrf.mxu0 }
 0x385   :  { %v1598_v40 = vadd.f32 %v1561_v37, %v1373_v38  ;;  %v4904_v42 = vpop.f32.mrf.mxu1  ;;  %v3613_v38 = vld [vmem:[%s5459_s3 + $0x38] sm:$0xf0]  ;;  %v3612_v37 = vld [vmem:[%s5459_s3 + $0x34] sm:$0xf] }
 0x386   :  { %v3163_v44 = vor.u32 %v3613_v38, %v3162_v35  ;;  %v1618_v12 = vadd.f32 %v5068_v11, %v4904_v42  ;;  %v3320_v38 = vld [vmem:[%s5459_s3 + $0xa8] sm:$0xf] }
 0x387   :  { %v3135_v36 = vmul.f32 -1.442695, %v1598_v40  ;;  %v3164_v40 = vld [vmem:[%s5459_s3 + $0x3c] sm:$0xf0] }
 0x388   :  { %v3167_v39 = vor.u32 %v3612_v37, %v3164_v40  ;;  %1799 = vmatpush.bf16.msra.mxu2 %v3163_v44  ;;  %v3652_v37 = vld [vmem:[%s5459_s3 + $0xb0] sm:$0xf0] }
 0x389   :  { %3730 = vpow2.f32 %v3135_v36  ;;  %v3170_v36 = vld [vmem:[%s5459_s3 + $0x38] sm:$0xf]  ;;  %v3321_v40 = vor.u32 %v3652_v37, %v3320_v38  ;;  %v3638_v38 = vld [vmem:[%s5459_s3 + $0x40] sm:$0xf0] }
 0x38a   :  { %v1548_v41 = vpop.f32.mrf.mxu3  ;;  %1812 = vmatpush.bf16.msra.mxu3 %v3167_v39 }
 0x38b   :  { %v1578_v51 = vadd.f32 %v1548_v41, %v1372_v45  ;;  %v3614_v45 = vld [vmem:[%s5459_s3 + $0x40] sm:$0xf0]  ;;  %2061 = vmatpush.bf16.msrb.mxu1 %v3321_v40 }
 0x38c   :  { %v1563_v57 = vpop.f32.mrf.mxu0  ;;  %v3171_v41 = vor.u32 %v3614_v45, %v3170_v36  ;;  %1800 = vmatpush.bf16.msra.mxu2 %v3151_v56  ;;  %v3651_v36 = vld [vmem:[%s5459_s3 + $0xac] sm:$0xf]  ;;  %v3322_v45 = vld [vmem:[%s5459_s3 + $0xb4] sm:$0xf0] }
 0x38d   :  { %v3134_v0 = vmul.f32 -1.442695, %v1578_v51  ;;  %v1576_v1 = vpop.f32.mrf.mxu1  ;;  %v3152_v51 = vld [vmem:[%s5459_s3 + $0x24] sm:$0xf0]  ;;  %v3138_v57 = vld [vmem:[%s5459_s3] sm:$0xf]  ;;  %v3325_v47 = vor.u32 %v3651_v36, %v3322_v45 }
 0x38e   :  { %1825 = vmatpush.bf16.msrb.mxu0 %v3171_v41  ;;  %v3155_v62 = vor.u32 %v3609_v49, %v3152_v51  ;;  %v3606_v1 = vld [vmem:[%s5459_s3 + $0x4] sm:$0xf]  ;;  %v3308_v49 = vld [vmem:[%s5459_s3 + $0x90] sm:$0xf]  ;;  %v3248_v36 = vld [vmem:[%s5459_s3 + $0x18] sm:$0xf] }
 0x38f   :  { %v3731_v7 = vpop.eup %3730  ;;  %3732 = vpow2.f32 %v3134_v0  ;;  %v3607_v0 = vld [vmem:[%s5459_s3 + $0x8] sm:$0xf0]  ;;  %v3143_v59 = vor.u32 %v3606_v1, %v3140_v2  ;;  %v3645_v1 = vld [vmem:[%s5459_s3 + $0x7c] sm:$0xf]  ;;  %v3298_v2 = vld [vmem:[%s5459_s3 + $0x84] sm:$0xf0] }
 0x390   :  { %v4960_v8 = vadd.f32 1.0, %v3731_v7  ;;  %v3139_v58 = vor.u32 %v3607_v0, %v3138_v57  ;;  %1813 = vmatpush.bf16.msra.mxu3 %v3155_v62  ;;  %v3646_v0 = vld [vmem:[%s5459_s3 + $0x80] sm:$0xf0] }
 0x391   :  { %v3634_v45 = vld [vmem:[%s5459_s3 + $0x20] sm:$0xf0] }
 0x392   :  { %v1550_v16 = vpop.f32.mrf.mxu3  ;;  %3734 = vrcp.f32 %v4960_v8  ;;  %1826 = vmatpush.bf16.msrb.mxu0 %v3159_v63  ;;  %1801 = vmatpush.bf16.msra.mxu2 %v3139_v58  ;;  %v1614_v17 = vand.u32 2147483648, %v4960_v8  ;;  %vm1608_vm5 = vweird.f32 %v4960_v8  ;;  %v1612_v43 = vand.u32 2147483647, %v4960_v8  ;;  %v3296_v63 = vld [vmem:[%s5459_s3 + $0x78] sm:$0xf] }
 0x393   :  { %v3301_v58 = vor.u32 %v3645_v1, %v3298_v2 }
 0x394   :  { %1814 = vmatpush.bf16.msra.mxu3 %v3143_v59  ;;  %vm1613_vm7 = vcmp.eq.f32.partialorder %v1612_v43, 8.507059e+37  ;;  %v3643_v59 = vld [vmem:[%s5459_s3 + $0x68] sm:$0xf0]  ;;  %v3272_v43 = vld [vmem:[%s5459_s3 + $0x48] sm:$0xf] }
 0x395   :  { %v3733_v22 = vpop.eup %3732 }
 0x396   :  { %v4993_v28 = vadd.f32 1.0, %v3733_v22  ;;  %1827 = vmatpush.bf16.msrb.mxu0 %v3147_v9  ;;  %v1615_v22 = vor.u32 1.1754944e-38, %v1614_v17  ;;  %2074 = vmatpush.bf16.msrb.mxu2 %v3325_v47  ;;  %v3305_v9 = vor.u32 %v3647_v4, %v3304_v3  ;;  %v3244_v3 = vld [vmem:[%s5459_s3 + $0x8] sm:$0xf]  ;;  %v3632_v4 = vld [vmem:[%s5459_s3 + $0x10] sm:$0xf0] }
 0x398   :  { %3736 = vrcp.f32 %v4993_v28  ;;  %v5002_v32 = vpop.eup %3734  ;;  %v1594_v61 = vand.u32 2147483648, %v4993_v28  ;;  %v1592_v6 = vand.u32 2147483647, %v4993_v28  ;;  %vm1588_vm1 = vweird.f32 %v4993_v28 }
 0x399   :  { %v1604_v46 = vmul.f32 %v5002_v32, %v4960_v8  ;;  %vm1609_vm4 = vweird.f32 %v5002_v32 }
 0x39a   :  { %v1595_v10 = vor.u32 1.1754944e-38, %v1594_v61  ;;  %vm1593_vm3 = vcmp.eq.f32.partialorder %v1592_v6, 8.507059e+37  ;;  %vm1610_vm6 = vmor %vm1608_vm5, %vm1609_vm4  ;;  %v3650_v61 = vld [vmem:[%s5459_s3 + $0xa0] sm:$0xf0] }
 0x39b   :  { %v1605_v55 = vsub.f32 1.0, %v1604_v46  ;;  %v3328_v46 = vld [vmem:[%s5459_s3 + $0xb0] sm:$0xf] }
 0x39c   :  { %v3329_v51 = vor.u32 %v3653_v48, %v3328_v46 }
 0x39d   :  { %v1606_v15 = vmul.f32 %v5002_v32, %v1605_v55  ;;  %v3316_v55 = vld [vmem:[%s5459_s3 + $0x98] sm:$0xf] }
 0x39e   :  { %v3737_v50 = vpop.eup %3736  ;;  %2087 = vmatpush.bf16.msrb.mxu3 %v3329_v51  ;;  %v3317_v62 = vor.u32 %v3650_v61, %v3316_v55  ;;  %v3236_v55 = vld [vmem:[%s5459_s3] sm:$0xf] }
 0x39f   :  { %v1584_v54 = vmul.f32 %v3737_v50, %v4993_v28  ;;  %vm1589_vm0 = vweird.f32 %v3737_v50  ;;  %v1607_v14 = vadd.f32 %v5002_v32, %v1606_v15  ;;  %v3297_v15 = vor.u32 %v3646_v0, %v3296_v63  ;;  %v3238_v63 = vld [vmem:[%s5459_s3 + $0xc] sm:$0xf0] }
 0x3a0   :  { %vm1590_vm2 = vmor %vm1588_vm1, %vm1589_vm0 }
 0x3a1   :  { %v1585_v60 = vsub.f32 1.0, %v1584_v54  ;;  %v1611_v20 = vsel %vm1610_vm6, %v5002_v32, %v1607_v14  ;;  %v3310_v54 = vld [vmem:[%s5459_s3 + $0x9c] sm:$0xf0]  ;;  %v3644_v14 = vld [vmem:[%s5459_s3 + $0x70] sm:$0xf0] }
 0x3a2   :  { %v1616_v23 = vsel %vm1613_vm7, %v1615_v22, %v1611_v20  ;;  %2088 = vmatpush.bf16.msrb.mxu3 %v3317_v62  ;;  %v3630_v62 = vld [vmem:[%s5459_s3 + $0x4] sm:$0xf] }
 0x3a3   :  { %v1586_v5 = vmul.f32 %v3737_v50, %v1585_v60  ;;  %v1622_v24 = vsub.f32 1.0, %v1616_v23  ;;  %v1627_v28 = vmul.f32 %v1625_v25, %v1616_v23  ;;  %v3313_v60 = vor.u32 %v3648_v53, %v3310_v54  ;;  %v3639_v23 = vld [vmem:[%s5459_s3 + $0x4c] sm:$0xf] }
 0x3a5   :  { %v1587_v7 = vadd.f32 %v3737_v50, %v1586_v5  ;;  %2075 = vmatpush.bf16.msrb.mxu2 %v3313_v60 }
 0x3a6   :  { %2089 = vmatpush.bf16.msrb.mxu3 %v3305_v9 }
 0x3a7   :  { %v1591_v13 = vsel %vm1590_vm2, %v3737_v50, %v1587_v7  ;;  %v3649_v50 = vld [vmem:[%s5459_s3 + $0x98] sm:$0xf0]  ;;  %v3284_v7 = vld [vmem:[%s5459_s3 + $0x60] sm:$0xf] }
 0x3a8   :  { %v1596_v16 = vsel %vm1593_vm3, %v1595_v10, %v1591_v13  ;;  %v3309_v52 = vor.u32 %v3649_v50, %v3308_v49  ;;  %v3642_v10 = vld [vmem:[%s5459_s3 + $0x64] sm:$0xf]  ;;  %v3292_v13 = vld [vmem:[%s5459_s3 + $0x68] sm:$0xf]  ;;  %v3256_v49 = vld [vmem:[%s5459_s3 + $0x20] sm:$0xf] }
 0x3a9   :  { %v1619_v18 = vmul.f32 %v1618_v12, %v1596_v16  ;;  %v3286_v12 = vld [vmem:[%s5459_s3 + $0x6c] sm:$0xf0]  ;;  %v3285_v16 = vor.u32 %v3643_v59, %v3284_v7  ;;  %2076 = vmatpush.bf16.msrb.mxu2 %v3301_v58  ;;  %v3293_v22 = vor.u32 %v3644_v14, %v3292_v13  ;;  %v3635_v50 = vld [vmem:[%s5459_s3 + $0x28] sm:$0xf0]  ;;  %v3245_v7 = vor.u32 %v3632_v4, %v3244_v3 }
 0x3aa   :  { %2062 = vmatpush.bf16.msrb.mxu1 %v3309_v52  ;;  %v3249_v52 = vor.u32 %v3634_v45, %v3248_v36  ;;  %v3257_v61 = vor.u32 %v3635_v50, %v3256_v49  ;;  %v3676_v36 = vld [vmem:[%s5459_s3 + $0xb0] sm:$0xf0]  ;;  %v3675_v45 = vld [vmem:[%s5459_s3 + $0xac] sm:$0xf] }
 0x3ab   :  { %v1620_v42 = vadd.f32 %v1619_v18, %v1374_v19  ;;  %v3289_v18 = vor.u32 %v3642_v10, %v3286_v12  ;;  %v3640_v19 = vld [vmem:[%s5459_s3 + $0x50] sm:$0xf0]  ;;  %2090 = vmatpush.bf16.msrb.mxu3 %v3293_v22 }
 0x3ad   :  { %3738 = vtanh.f32 %v1620_v42  ;;  %2077 = vmatpush.bf16.msrb.mxu2 %v3289_v18 }
 0x3ae   :  { %2063 = vmatpush.bf16.msrb.mxu1 %v3297_v15 }
 0x3b2   :  { %2064 = vmatpush.bf16.msrb.mxu1 %v3285_v16 }
 0x3b3   :  { %v3739_v26 = vpop.eup %3738 }
 0x3b4   :  { %v1623_v27 = vmul.f32 %v3739_v26, %v1622_v24  ;;  %v3274_v24 = vld [vmem:[%s5459_s3 + $0x54] sm:$0xf0]  ;;  %v3280_v26 = vld [vmem:[%s5459_s3 + $0x50] sm:$0xf] }
 0x3b6   :  { %v5079_v29 = vadd.f32 %v1627_v28, %v1623_v27  ;;  %v3641_v27 = vld [vmem:[%s5459_s3 + $0x58] sm:$0xf0]  ;;  %v3273_v28 = vor.u32 %v3640_v19, %v3272_v43 }
 0x3b8   :  { %1629 = vst [vmem:[#allocation4 + $0x8] sm:$0x3] %v5079_v29  ;;  %v1633_v8 = vpack.c.bf16 %v5079_v29, %v5079_v29  ;;  %2065 = vmatpush.bf16.msrb.mxu1 %v3273_v28  ;;  %v1889_v22 = vrot.slane %v5079_v29, 6 }
 0x3ba   :  { %1802 = vmatmul.bf16.vlgmr.msra.gmra.mxu2 %v1633_v8  ;;  %1815 = vmatmul.bf16.vlgmr.msra.gmra.mxu3 %v1633_v8 }
 0x3bb   :  { %1828 = vmatmul.bf16.vlgmr.msrb.gmra.mxu0 %v1633_v8  ;;  %v3277_v8 = vor.u32 %v3639_v23, %v3274_v24 }
 0x3bd   :  { %2078 = vmatpush.bf16.msrb.mxu2 %v3277_v8 }
 0x438   :  { %v5084_v30 = vpop.f32.mrf.mxu0 }
 0x439   :  { %v1879_v0 = vadd.f32 %v5068_v11, %v5084_v30  ;;  %v3241_v30 = vor.u32 %v3630_v62, %v3238_v63 }
 0x43b   :  { %v1881_v59 = vrot.slane %v1879_v0, 6 }
 0x43d   :  { %v1803_v32 = vpop.f32.mrf.mxu2  ;;  %v1816_v21 = vpop.f32.mrf.mxu3 }
 0x43e   :  { %v1834_v34 = vrot.slane %v1803_v32, 6  ;;  %v1857_v35 = vrot.slane %v1816_v21, 6  ;;  %v3637_v32 = vld [vmem:[%s5459_s3 + $0x38] sm:$0xf0]  ;;  %v3636_v21 = vld [vmem:[%s5459_s3 + $0x34] sm:$0xf] }
 0x440   :  { %v1836_v44 = vadd.f32 %v1834_v34, %v1630_v31  ;;  %v1859_v39 = vadd.f32 %v1857_v35, %v1631_v33  ;;  %v1831_v41 = vpop.f32.mrf.mxu0  ;;  %v3260_v31 = vld [vmem:[%s5459_s3 + $0x30] sm:$0xf]  ;;  %v3281_v33 = vor.u32 %v3641_v27, %v3280_v26  ;;  %v3262_v34 = vld [vmem:[%s5459_s3 + $0x3c] sm:$0xf0]  ;;  %v3268_v35 = vld [vmem:[%s5459_s3 + $0x38] sm:$0xf] }
 0x441   :  { %v3261_v37 = vor.u32 %v3637_v32, %v3260_v31  ;;  %v3265_v40 = vor.u32 %v3636_v21, %v3262_v34  ;;  %v3250_v41 = vld [vmem:[%s5459_s3 + $0x24] sm:$0xf0]  ;;  %v1894_v32 = vld [vmem:[#allocation3] sm:$0x30]  ;;  %v1895_v34 = vld [vmem:[#allocation3 + $0x18] sm:$0x30] }
 0x442   :  { %v3232_v56 = vmul.f32 -1.442695, %v1836_v44  ;;  %v3233_v57 = vmul.f32 -1.442695, %v1859_v39  ;;  %2091 = vmatpush.bf16.msrb.mxu3 %v3281_v33  ;;  %v3269_v44 = vor.u32 %v3638_v38, %v3268_v35  ;;  %v3633_v39 = vld [vmem:[%s5459_s3 + $0x1c] sm:$0xf] }
 0x443   :  { %2066 = vmatpush.bf16.msrb.mxu1 %v3261_v37  ;;  %2079 = vmatpush.bf16.msrb.mxu2 %v3265_v40  ;;  %v3253_v54 = vor.u32 %v3633_v39, %v3250_v41  ;;  %v3418_v40 = vld [vmem:[%s5459_s3 + $0xa8] sm:$0xf]  ;;  %v3420_v39 = vld [vmem:[%s5459_s3 + $0xb4] sm:$0xf0]  ;;  %v3426_v41 = vld [vmem:[%s5459_s3 + $0xb0] sm:$0xf] }
 0x444   :  { %3740 = vpow2.f32 %v3232_v56  ;;  %v3631_v56 = vld [vmem:[%s5459_s3 + $0x8] sm:$0xf0] }
 0x445   :  { %3742 = vpow2.f32 %v3233_v57  ;;  %v1805_v5 = vpop.f32.mrf.mxu2  ;;  %v1818_v6 = vpop.f32.mrf.mxu3 }
 0x446   :  { %2092 = vmatpush.bf16.msrb.mxu3 %v3269_v44  ;;  %v3237_v6 = vor.u32 %v3631_v56, %v3236_v55  ;;  %v3419_v44 = vor.u32 %v3676_v36, %v3418_v40  ;;  %v3408_v56 = vld [vmem:[%s5459_s3 + $0x9c] sm:$0xf0]  ;;  %v3662_v40 = vld [vmem:[%s5459_s3 + $0x40] sm:$0xf0] }
 0x447   :  { %2067 = vmatpush.bf16.msrb.mxu1 %v3249_v52  ;;  %2080 = vmatpush.bf16.msrb.mxu2 %v3253_v54  ;;  %v3673_v52 = vld [vmem:[%s5459_s3 + $0x98] sm:$0xf0] }
 0x448   :  { %2328 = vmatpush.bf16.msra.mxu0 %v3419_v44 }
 0x44a   :  { %v3741_v17 = vpop.eup %3740  ;;  %2093 = vmatpush.bf16.msrb.mxu3 %v3257_v61 }
 0x44b   :  { %v3743_v42 = vpop.eup %3742  ;;  %v5164_v20 = vadd.f32 1.0, %v3741_v17  ;;  %2068 = vmatpush.bf16.msrb.mxu1 %v3237_v6  ;;  %2081 = vmatpush.bf16.msrb.mxu2 %v3241_v30  ;;  %v1632_v17 = vld [vmem:[#allocation3 + $0x20] sm:$0xc]  ;;  %v3396_v6 = vld [vmem:[%s5459_s3 + $0x84] sm:$0xf0] }
 0x44c   :  { %v5172_v25 = vadd.f32 1.0, %v3743_v42  ;;  %v3671_v30 = vld [vmem:[%s5459_s3 + $0x88] sm:$0xf0] }
 0x44d   :  { %3744 = vrcp.f32 %v5164_v20  ;;  %v1852_v57 = vand.u32 2147483648, %v5164_v20  ;;  %v1850_v2 = vand.u32 2147483647, %v5164_v20  ;;  %vm1846_vm9 = vweird.f32 %v5164_v20 }
 0x44e   :  { %3746 = vrcp.f32 %v5172_v25  ;;  %v1875_v14 = vand.u32 2147483648, %v5172_v25  ;;  %vm1869_vm13 = vweird.f32 %v5172_v25  ;;  %v1873_v16 = vand.u32 2147483647, %v5172_v25  ;;  %2094 = vmatpush.bf16.msrb.mxu3 %v3245_v7 }
 0x44f   :  { %v1853_v58 = vor.u32 1.1754944e-38, %v1852_v57  ;;  %vm1851_vm11 = vcmp.eq.f32.partialorder %v1850_v2, 8.507059e+37  ;;  %v3414_v57 = vld [vmem:[%s5459_s3 + $0x98] sm:$0xf]  ;;  %v3670_v2 = vld [vmem:[%s5459_s3 + $0x80] sm:$0xf0] }
 0x450   :  { %v1876_v19 = vor.u32 1.1754944e-38, %v1875_v14  ;;  %vm1874_vm15 = vcmp.eq.f32.partialorder %v1873_v16, 8.507059e+37 }
 0x453   :  { %v3745_v46 = vpop.eup %3744 }
 0x454   :  { %v3747_v47 = vpop.eup %3746  ;;  %v1842_v48 = vmul.f32 %v3745_v46, %v5164_v20  ;;  %vm1847_vm8 = vweird.f32 %v3745_v46 }
 0x455   :  { %v1865_v51 = vmul.f32 %v3747_v47, %v5172_v25  ;;  %vm1848_vm10 = vmor %vm1846_vm9, %vm1847_vm8  ;;  %vm1870_vm12 = vweird.f32 %v3747_v47 }
 0x456   :  { %v1843_v53 = vsub.f32 1.0, %v1842_v48  ;;  %vm1871_vm14 = vmor %vm1869_vm13, %vm1870_vm12  ;;  %v3423_v48 = vor.u32 %v3675_v45, %v3420_v39 }
 0x457   :  { %v1866_v60 = vsub.f32 1.0, %v1865_v51  ;;  %v3406_v51 = vld [vmem:[%s5459_s3 + $0x90] sm:$0xf] }
 0x458   :  { %v1844_v1 = vmul.f32 %v3745_v46, %v1843_v53  ;;  %2341 = vmatpush.bf16.msra.mxu1 %v3423_v48  ;;  %v3672_v53 = vld [vmem:[%s5459_s3 + $0x94] sm:$0xf]  ;;  %v3407_v55 = vor.u32 %v3673_v52, %v3406_v51 }
 0x459   :  { %v1867_v5 = vmul.f32 %v3747_v47, %v1866_v60  ;;  %v3674_v60 = vld [vmem:[%s5459_s3 + $0xa0] sm:$0xf0]  ;;  %v3411_v63 = vor.u32 %v3672_v53, %v3408_v56  ;;  %v3348_v53 = vld [vmem:[%s5459_s3 + $0x24] sm:$0xf0] }
 0x45a   :  { %v1845_v15 = vadd.f32 %v3745_v46, %v1844_v1  ;;  %v3415_v0 = vor.u32 %v3674_v60, %v3414_v57  ;;  %v3394_v1 = vld [vmem:[%s5459_s3 + $0x78] sm:$0xf]  ;;  %2329 = vmatpush.bf16.msra.mxu0 %v3407_v55  ;;  %v3659_v55 = vld [vmem:[%s5459_s3 + $0x28] sm:$0xf0] }
 0x45b   :  { %v1868_v12 = vadd.f32 %v3747_v47, %v1867_v5  ;;  %v3395_v4 = vor.u32 %v3670_v2, %v3394_v1  ;;  %v3669_v5 = vld [vmem:[%s5459_s3 + $0x7c] sm:$0xf] }
 0x45c   :  { %v1849_v9 = vsel %vm1848_vm10, %v3745_v46, %v1845_v15  ;;  %v3402_v15 = vld [vmem:[%s5459_s3 + $0x80] sm:$0xf]  ;;  %2342 = vmatpush.bf16.msra.mxu1 %v3411_v63 }
 0x45d   :  { %v1854_v10 = vsel %vm1851_vm11, %v1853_v58, %v1849_v9  ;;  %v1872_v43 = vsel %vm1871_vm14, %v3747_v47, %v1868_v12  ;;  %v3677_v47 = vld [vmem:[%s5459_s3 + $0xb8] sm:$0xf0]  ;;  %v3399_v58 = vor.u32 %v3669_v5, %v3396_v6  ;;  %v3403_v7 = vor.u32 %v3671_v30, %v3402_v15  ;;  %v3667_v9 = vld [vmem:[%s5459_s3 + $0x68] sm:$0xf0]  ;;  %v3384_v12 = vld [vmem:[%s5459_s3 + $0x6c] sm:$0xf0] }
 0x45e   :  { %v1883_v13 = vmul.f32 %v1881_v59, %v1854_v10  ;;  %v1877_v42 = vsel %vm1874_vm15, %v1876_v19, %v1872_v43  ;;  %v3427_v49 = vor.u32 %v3677_v47, %v3426_v41  ;;  %v3382_v59 = vld [vmem:[%s5459_s3 + $0x60] sm:$0xf]  ;;  %v3666_v10 = vld [vmem:[%s5459_s3 + $0x64] sm:$0xf]  ;;  %2330 = vmatpush.bf16.msra.mxu0 %v3395_v4  ;;  %v3655_v4 = vld [vmem:[%s5459_s3 + $0x8] sm:$0xf0] }
 0x45f   :  { %v1886_v20 = vsub.f32 1.0, %v1877_v42  ;;  %v1891_v26 = vmul.f32 %v1889_v22, %v1877_v42  ;;  %v3383_v16 = vor.u32 %v3667_v9, %v3382_v59  ;;  %v3387_v19 = vor.u32 %v3666_v10, %v3384_v12  ;;  %v3663_v22 = vld [vmem:[%s5459_s3 + $0x4c] sm:$0xf]  ;;  %v3654_v5 = vld [vmem:[%s5459_s3 + $0x4] sm:$0xf] }
 0x460   :  { %v1884_v18 = vadd.f32 %v1883_v13, %v1632_v17  ;;  %2354 = vmatpush.bf16.msra.mxu2 %v3427_v49  ;;  %v3390_v13 = vld [vmem:[%s5459_s3 + $0x68] sm:$0xf]  ;;  %v3668_v17 = vld [vmem:[%s5459_s3 + $0x70] sm:$0xf0]  ;;  %2343 = vmatpush.bf16.msra.mxu1 %v3399_v58  ;;  %v3346_v49 = vld [vmem:[%s5459_s3 + $0x18] sm:$0xf] }
 0x461   :  { %v3391_v42 = vor.u32 %v3668_v17, %v3390_v13  ;;  %v3336_v30 = vld [vmem:[%s5459_s3 + $0xc] sm:$0xf0]  ;;  %v3342_v58 = vld [vmem:[%s5459_s3 + $0x8] sm:$0xf]  ;;  %v1896_v9 = vld [vmem:[#allocation3 + $0x20] sm:$0x30] }
 0x462   :  { %3748 = vtanh.f32 %v1884_v18  ;;  %v3370_v18 = vld [vmem:[%s5459_s3 + $0x48] sm:$0xf]  ;;  %2331 = vmatpush.bf16.msra.mxu0 %v3383_v16 }
 0x464   :  { %2355 = vmatpush.bf16.msra.mxu2 %v3415_v0  ;;  %2344 = vmatpush.bf16.msra.mxu1 %v3387_v19 }
 0x468   :  { %v3749_v23 = vpop.eup %3748  ;;  %2356 = vmatpush.bf16.msra.mxu2 %v3403_v7  ;;  %v3656_v7 = vld [vmem:[%s5459_s3 + $0x10] sm:$0xf0] }
 0x469   :  { %v1887_v24 = vmul.f32 %v3749_v23, %v1886_v20  ;;  %v3664_v20 = vld [vmem:[%s5459_s3 + $0x50] sm:$0xf0]  ;;  %v3372_v23 = vld [vmem:[%s5459_s3 + $0x54] sm:$0xf0]  ;;  %v3343_v16 = vor.u32 %v3656_v7, %v3342_v58 }
 0x46a   :  { %v3680_v58 = vld [vmem:[%s5462_s6 + $0x10] sm:$0xff] }
 0x46b   :  { %v5247_v27 = vadd.f32 %v1891_v26, %v1887_v24  ;;  %v3378_v24 = vld [vmem:[%s5459_s3 + $0x50] sm:$0xf]  ;;  %v3665_v26 = vld [vmem:[%s5459_s3 + $0x58] sm:$0xf0] }
 0x46c   :  { %2357 = vmatpush.bf16.msra.mxu2 %v3391_v42 }
 0x46d   :  { %1893 = vst [vmem:[#allocation4 + $0x8] sm:$0xc] %v5247_v27  ;;  %v1897_v25 = vpack.c.bf16 %v5247_v27, %v5247_v27 }
 0x46f   :  { %v1931_v28 = vrot.slane %v1897_v25, 1 }
 0x471   :  { %2069 = vmatmul.bf16.vlgmr.msrb.gmra.mxu1 %v1931_v28  ;;  %2082 = vmatmul.bf16.vlgmr.msrb.gmra.mxu2 %v1931_v28 }
 0x472   :  { %2095 = vmatmul.bf16.vlgmr.msrb.gmra.mxu3 %v1931_v28 }
 0x4ee   :  { %v2070_v8 = vpop.f32.mrf.mxu1 }
 0x4ef   :  { %v2101_v31 = vrot.slane %v2070_v8, 4  ;;  %v3371_v8 = vor.u32 %v3664_v20, %v3370_v18 }
 0x4f1   :  { %v2103_v33 = vadd.f32 %v2101_v31, %v1894_v32  ;;  %v3358_v31 = vld [vmem:[%s5459_s3 + $0x30] sm:$0xf]  ;;  %v3375_v32 = vor.u32 %v3663_v22, %v3372_v23  ;;  %2332 = vmatpush.bf16.msra.mxu0 %v3371_v8 }
 0x4f3   :  { %v3330_v21 = vmul.f32 -1.442695, %v2103_v33  ;;  %v3379_v33 = vor.u32 %v3665_v26, %v3378_v24  ;;  %2345 = vmatpush.bf16.msra.mxu1 %v3375_v32 }
 0x4f4   :  { %v2083_v29 = vpop.f32.mrf.mxu2 }
 0x4f5   :  { %3750 = vpow2.f32 %v3330_v21  ;;  %v2124_v35 = vrot.slane %v2083_v29, 4  ;;  %v5252_v38 = vpop.f32.mrf.mxu3  ;;  %v3661_v21 = vld [vmem:[%s5459_s3 + $0x38] sm:$0xf0]  ;;  %v3660_v29 = vld [vmem:[%s5459_s3 + $0x34] sm:$0xf]  ;;  %2358 = vmatpush.bf16.msra.mxu2 %v3379_v33 }
 0x4f6   :  { %v2072_v37 = vpop.f32.mrf.mxu1  ;;  %v3359_v39 = vor.u32 %v3661_v21, %v3358_v31  ;;  %v2161_v33 = vld [vmem:[#allocation3] sm:$0xc0] }
 0x4f7   :  { %v2126_v46 = vadd.f32 %v2124_v35, %v1895_v34  ;;  %v3360_v34 = vld [vmem:[%s5459_s3 + $0x3c] sm:$0xf0]  ;;  %v3366_v37 = vld [vmem:[%s5459_s3 + $0x38] sm:$0xf] }
 0x4f8   :  { %v3363_v47 = vor.u32 %v3660_v29, %v3360_v34  ;;  %v3367_v48 = vor.u32 %v3662_v40, %v3366_v37  ;;  %2333 = vmatpush.bf16.msra.mxu0 %v3359_v39 }
 0x4f9   :  { %v3331_v50 = vmul.f32 -1.442695, %v2126_v46  ;;  %v2146_v46 = vadd.f32 %v5068_v11, %v5252_v38  ;;  %v3657_v38 = vld [vmem:[%s5459_s3 + $0x1c] sm:$0xf] }
 0x4fa   :  { %2346 = vmatpush.bf16.msra.mxu1 %v3363_v47  ;;  %2359 = vmatpush.bf16.msra.mxu2 %v3367_v48  ;;  %v3351_v1 = vor.u32 %v3657_v38, %v3348_v53  ;;  %v3685_v47 = vld [vmem:[%s5462_s6 + $0x38] sm:$0xff]  ;;  %v3684_v48 = vld [vmem:[%s5462_s6 + $0x30] sm:$0xff] }
 0x4fb   :  { %v3751_v54 = vpop.eup %3750  ;;  %3752 = vpow2.f32 %v3331_v50  ;;  %v3658_v50 = vld [vmem:[%s5459_s3 + $0x20] sm:$0xf0]  ;;  %v2148_v57 = vrot.slane %v2146_v46, 4  ;;  %2499 = vmatpush.bf16.msra.mxu3 %v3685_v47 }
 0x4fc   :  { %v5290_v61 = vadd.f32 1.0, %v3751_v54  ;;  %v2085_v62 = vpop.f32.mrf.mxu2  ;;  %v3354_v54 = vld [vmem:[%s5459_s3 + $0x20] sm:$0xf]  ;;  %v3347_v63 = vor.u32 %v3658_v50, %v3346_v49  ;;  %v3683_v50 = vld [vmem:[%s5462_s6 + $0x28] sm:$0xff] }
 0x4fd   :  { %v2098_v3 = vpop.f32.mrf.mxu3  ;;  %v3355_v2 = vor.u32 %v3659_v55, %v3354_v54 }
 0x4fe   :  { %3754 = vrcp.f32 %v5290_v61  ;;  %v2117_v36 = vand.u32 2147483647, %v5290_v61  ;;  %v2119_v45 = vand.u32 2147483648, %v5290_v61  ;;  %vm2113_vm1 = vweird.f32 %v5290_v61  ;;  %v3334_v3 = vld [vmem:[%s5459_s3] sm:$0xf]  ;;  %2334 = vmatpush.bf16.msra.mxu0 %v3347_v63  ;;  %2347 = vmatpush.bf16.msra.mxu1 %v3351_v1  ;;  %v3681_v1 = vld [vmem:[%s5462_s6 + $0x18] sm:$0xff] }
 0x4ff   :  { %v3335_v13 = vor.u32 %v3655_v4, %v3334_v3  ;;  %2360 = vmatpush.bf16.msra.mxu2 %v3355_v2  ;;  %2500 = vmatpush.bf16.msra.mxu3 %v3684_v48 }
 0x500   :  { %vm2118_vm3 = vcmp.eq.f32.partialorder %v2117_v36, 8.507059e+37  ;;  %v2120_v56 = vor.u32 1.1754944e-38, %v2119_v45 }
 0x501   :  { %v3753_v14 = vpop.eup %3752 }
 0x502   :  { %v5332_v43 = vadd.f32 1.0, %v3753_v14  ;;  %v3339_v14 = vor.u32 %v3654_v5, %v3336_v30  ;;  %2335 = vmatpush.bf16.msra.mxu0 %v3335_v13  ;;  %v2163_v30 = vld [vmem:[#allocation3 + $0x20] sm:$0xc0] }
 0x503   :  { %2361 = vmatpush.bf16.msra.mxu2 %v3343_v16  ;;  %2501 = vmatpush.bf16.msra.mxu3 %v3683_v50  ;;  %v3678_v16 = vld [vmem:[%s5462_s6] sm:$0xff] }
 0x504   :  { %v3755_v25 = vpop.eup %3754  ;;  %3756 = vrcp.f32 %v5332_v43  ;;  %v2140_v59 = vand.u32 2147483647, %v5332_v43  ;;  %vm2136_vm5 = vweird.f32 %v5332_v43  ;;  %2348 = vmatpush.bf16.msra.mxu1 %v3339_v14 }
 0x505   :  { %v2109_v28 = vmul.f32 %v3755_v25, %v5290_v61  ;;  %vm2114_vm0 = vweird.f32 %v3755_v25  ;;  %v2142_v61 = vand.u32 2147483648, %v5332_v43 }
 0x506   :  { %vm2115_vm2 = vmor %vm2113_vm1, %vm2114_vm0  ;;  %vm2141_vm7 = vcmp.eq.f32.partialorder %v2140_v59, 8.507059e+37 }
 0x507   :  { %v2110_v35 = vsub.f32 1.0, %v2109_v28  ;;  %v2143_v17 = vor.u32 1.1754944e-38, %v2142_v61 }
 0x509   :  { %v2111_v44 = vmul.f32 %v3755_v25, %v2110_v35 }
 0x50a   :  { %v3757_v41 = vpop.eup %3756 }
 0x50b   :  { %v2132_v51 = vmul.f32 %v3757_v41, %v5332_v43  ;;  %v2112_v52 = vadd.f32 %v3755_v25, %v2111_v44  ;;  %vm2137_vm4 = vweird.f32 %v3757_v41  ;;  %v2156_v43 = vrot.slane %v5247_v27, 6  ;;  %v2162_v27 = vld [vmem:[#allocation3 + $0x18] sm:$0xc0] }
 0x50c   :  { %vm2138_vm6 = vmor %vm2136_vm5, %vm2137_vm4 }
 0x50d   :  { %v2133_v60 = vsub.f32 1.0, %v2132_v51  ;;  %v2116_v62 = vsel %vm2115_vm2, %v3755_v25, %v2112_v52 }
 0x50e   :  { %v2121_v0 = vsel %vm2118_vm3, %v2120_v56, %v2116_v62  ;;  %v3682_v56 = vld [vmem:[%s5462_s6 + $0x20] sm:$0xff] }
 0x50f   :  { %v2134_v6 = vmul.f32 %v3757_v41, %v2133_v60  ;;  %v2150_v15 = vmul.f32 %v2148_v57, %v2121_v0  ;;  %2502 = vmatpush.bf16.msra.mxu3 %v3682_v56 }
 0x511   :  { %v2135_v10 = vadd.f32 %v3757_v41, %v2134_v6  ;;  %v2151_v12 = vadd.f32 %v2150_v15, %v1896_v9 }
 0x513   :  { %v2139_v18 = vsel %vm2138_vm6, %v3757_v41, %v2135_v10  ;;  %3758 = vtanh.f32 %v2151_v12  ;;  %2503 = vmatpush.bf16.msra.mxu3 %v3681_v1  ;;  %v3679_v10 = vld [vmem:[%s5462_s6 + $0x8] sm:$0xff] }
 0x514   :  { %v2144_v19 = vsel %vm2141_vm7, %v2143_v17, %v2139_v18 }
 0x515   :  { %v2153_v42 = vsub.f32 1.0, %v2144_v19  ;;  %v2158_v23 = vmul.f32 %v2156_v43, %v2144_v19  ;;  %v2428_v43 = vld [vmem:[#allocation4] sm:$0xff] }
 0x517   :  { %2504 = vmatpush.bf16.msra.mxu3 %v3680_v58 }
 0x519   :  { %v3759_v20 = vpop.eup %3758 }
 0x51a   :  { %v2154_v22 = vmul.f32 %v3759_v20, %v2153_v42 }
 0x51b   :  { %2505 = vmatpush.bf16.msra.mxu3 %v3679_v10 }
 0x51c   :  { %v5416_v24 = vadd.f32 %v2158_v23, %v2154_v22  ;;  %v3689_v23 = vld [vmem:[%s5463_s7] ss:$0 sm:$0xff] }
 0x51e   :  { %2160 = vst [vmem:[#allocation4 + $0x8] sm:$0x30] %v5416_v24  ;;  %v2164_v26 = vpack.c.bf16 %v5416_v24, %v5416_v24  ;;  %v2423_v13 = vrot.slane %v5416_v24, 6 }
 0x51f   :  { %2506 = vmatpush.bf16.msra.mxu3 %v3678_v16 }
 0x520   :  { %v2198_v25 = vrot.slane %v2164_v26, 2 }
 0x522   :  { %2336 = vmatmul.bf16.vlgmr.msra.gmra.mxu0 %v2198_v25  ;;  %2349 = vmatmul.bf16.vlgmr.msra.gmra.mxu1 %v2198_v25 }
 0x523   :  { %2362 = vmatmul.bf16.vlgmr.msra.gmra.mxu2 %v2198_v25 }
 0x59f   :  { %v2337_v28 = vpop.f32.mrf.mxu0  ;;  %v2350_v8 = vpop.f32.mrf.mxu1 }
 0x5a0   :  { %v2368_v31 = vrot.slane %v2337_v28, 2  ;;  %v2391_v32 = vrot.slane %v2350_v8, 2 }
 0x5a2   :  { %v2370_v21 = vadd.f32 %v2368_v31, %v2161_v33  ;;  %v2393_v29 = vadd.f32 %v2391_v32, %v2162_v27 }
 0x5a4   :  { %v3428_v34 = vmul.f32 -1.442695, %v2370_v21  ;;  %v3429_v35 = vmul.f32 -1.442695, %v2393_v29 }
 0x5a6   :  { %3760 = vpow2.f32 %v3428_v34  ;;  %v2363_v37 = vpop.f32.mrf.mxu2 }
 0x5a7   :  { %3762 = vpow2.f32 %v3429_v35  ;;  %v2339_v40 = vpop.f32.mrf.mxu0  ;;  %v2352_v36 = vpop.f32.mrf.mxu1  ;;  %v2413_v61 = vadd.f32 %v5068_v11, %v2363_v37 }
 0x5a9   :  { %v2415_v3 = vrot.slane %v2413_v61, 2 }
 0x5ac   :  { %v3761_v45 = vpop.eup %3760 }
 0x5ad   :  { %v3763_v46 = vpop.eup %3762  ;;  %v2374_v44 = vadd.f32 1.0, %v3761_v45 }
 0x5ae   :  { %v2397_v39 = vadd.f32 1.0, %v3763_v46  ;;  %v2365_v41 = vpop.f32.mrf.mxu2 }
 0x5af   :  { %3764 = vrcp.f32 %v2374_v44  ;;  %v2386_v55 = vand.u32 2147483648, %v2374_v44  ;;  %v2384_v60 = vand.u32 2147483647, %v2374_v44  ;;  %vm2380_vm9 = vweird.f32 %v2374_v44 }
 0x5b0   :  { %3766 = vrcp.f32 %v2397_v39  ;;  %v2409_v6 = vand.u32 2147483648, %v2397_v39  ;;  %vm2403_vm13 = vweird.f32 %v2397_v39  ;;  %v2407_v11 = vand.u32 2147483647, %v2397_v39 }
 0x5b1   :  { %v2387_v0 = vor.u32 1.1754944e-38, %v2386_v55  ;;  %vm2385_vm11 = vcmp.eq.f32.partialorder %v2384_v60, 8.507059e+37 }
 0x5b2   :  { %v2410_v9 = vor.u32 1.1754944e-38, %v2409_v6  ;;  %vm2408_vm15 = vcmp.eq.f32.partialorder %v2407_v11, 8.507059e+37 }
 0x5b5   :  { %v3765_v49 = vpop.eup %3764 }
 0x5b6   :  { %v3767_v38 = vpop.eup %3766  ;;  %v2376_v51 = vmul.f32 %v3765_v49, %v2374_v44  ;;  %vm2381_vm8 = vweird.f32 %v3765_v49 }
 0x5b7   :  { %v2399_v52 = vmul.f32 %v3767_v38, %v2397_v39  ;;  %vm2382_vm10 = vmor %vm2380_vm9, %vm2381_vm8  ;;  %vm2404_vm12 = vweird.f32 %v3767_v38 }
 0x5b8   :  { %v2377_v53 = vsub.f32 1.0, %v2376_v51  ;;  %vm2405_vm14 = vmor %vm2403_vm13, %vm2404_vm12 }
 0x5b9   :  { %v2400_v54 = vsub.f32 1.0, %v2399_v52 }
 0x5ba   :  { %v2378_v57 = vmul.f32 %v3765_v49, %v2377_v53 }
 0x5bb   :  { %v2401_v62 = vmul.f32 %v3767_v38, %v2400_v54 }
 0x5bc   :  { %v2379_v63 = vadd.f32 %v3765_v49, %v2378_v57 }
 0x5bd   :  { %v2402_v5 = vadd.f32 %v3767_v38, %v2401_v62 }
 0x5be   :  { %v2383_v2 = vsel %vm2382_vm10, %v3765_v49, %v2379_v63 }
 0x5bf   :  { %v2388_v4 = vsel %vm2385_vm11, %v2387_v0, %v2383_v2  ;;  %v2406_v59 = vsel %vm2405_vm14, %v3767_v38, %v2402_v5 }
 0x5c0   :  { %v2417_v15 = vmul.f32 %v2415_v3, %v2388_v4  ;;  %v2411_v12 = vsel %vm2408_vm15, %v2410_v9, %v2406_v59 }
 0x5c1   :  { %v2420_v14 = vsub.f32 1.0, %v2411_v12  ;;  %v2425_v19 = vmul.f32 %v2423_v13, %v2411_v12 }
 0x5c2   :  { %v2418_v7 = vadd.f32 %v2417_v15, %v2163_v30 }
 0x5c4   :  { %3768 = vtanh.f32 %v2418_v7 }
 0x5ca   :  { %v3769_v17 = vpop.eup %3768 }
 0x5cb   :  { %v2421_v18 = vmul.f32 %v3769_v17, %v2420_v14 }
 0x5cd   :  { %v2426_v42 = vadd.f32 %v2425_v19, %v2421_v18 }
 0x5cf   :  { %2427 = vst [vmem:[#allocation4 + $0x8] sm:$0xc0] %v2426_v42 }
 0x5d6   :  { %v2429_v20 = vld [vmem:[#allocation4 + $0x8] sm:$0xff] }
 0x5d7   :  { %v2430_v22 = vpack.c.bf16 %v2429_v20, %v2428_v43 }
 0x5d9   :  { %2507 = vmatmul.bf16.vlgmr.msra.gmra.mxu3 %v2430_v22 }
 0x65c   :  { %v2508_v24 = vpop.f32.mrf.mxu3 }
 0x65d   :  { %v2509_v26 = vadd.f32 %v3689_v23, %v2508_v24 }
 0x65f   :  { %2513 = vst [vmem:[%s5464_s8] sm:$0xff] %v2509_v26 }
 0x664   :  { %v2510_v25 = vpop.f32.mrf.mxu3 }
 0x665   :  { %v2511_v28 = vadd.f32 %v3689_v23, %v2510_v25 }
 0x667   :  { %2514 = vst [vmem:[%s5464_s8 + $0x8] sm:$0xff] %v2511_v28 }

</bundles_post_ra>
